<compile_context>
chip_gen: v7x
topology: tpu7x:2x2x1
jax: 0.10.0
libtpu: 0.0.40
codegen_flags: <defaults>
</compile_context>

<pallas_src>
import functools

import numpy as np
import jax
import jax.numpy as jnp
from jax import lax
from jax.experimental import pallas as pl
from jax.experimental.pallas import tpu as pltpu

K = 3  # kernel size of every layer in the module

# ConvTranspose2d(k=3, s=2, p=1, op=1) 4-phase sub-pixel decomposition:
# output phase (oi, oj) -> list of (input shift (dh, dw), kh, kw).
_PHASE_TAPS = {
    (0, 0): [((0, 0), 1, 1)],
    (0, 1): [((0, 1), 1, 0), ((0, 0), 1, 2)],
    (1, 0): [((1, 0), 0, 1), ((0, 0), 2, 1)],
    (1, 1): [((1, 1), 0, 0), ((1, 0), 0, 2), ((0, 1), 2, 0), ((0, 0), 2, 2)],
}


# ----------------------------------------------------------------------------
# In-kernel building blocks (operate on VMEM-resident values; only use
# leading-dim concats / reshapes / static slices, 2-D dots and elementwise ops)
# ----------------------------------------------------------------------------
def _pad_hw(x, top, bottom, left, right):
    """Zero-pad the two leading (spatial) axes of a (H, W, N, C) value."""
    h, w, n, c = x.shape
    dt = x.dtype
    rows = []
    if top:
        rows.append(jnp.zeros((top, w, n, c), dt))
    rows.append(x)
    if bottom:
        rows.append(jnp.zeros((bottom, w, n, c), dt))
    if len(rows) > 1:
        x = jnp.concatenate(rows, axis=0)
    hp = x.shape[0]
    cols = []
    if left:
        cols.append(jnp.zeros((hp, left, n, c), dt))
    cols.append(x)
    if right:
        cols.append(jnp.zeros((hp, right, n, c), dt))
    if len(cols) > 1:
        x = jnp.concatenate(cols, axis=1)
    return x


def _conv_s2_relu(x, w_pack, bias):
    """nn.Conv2d(Ci, Co, k=3, stride=2, pad=1) + ReLU, fully in-kernel.

    x: (H, W, N, Ci) value, w_pack: (9*Ci, Co) (tap-major), bias: (1, Co).
    Returns (Ho, Wo, N, Co) with Ho = H//2, Wo = W//2.
    """
    h, w, n, ci = x.shape
    co = w_pack.shape[1]
    ho, wo = h // 2, w // 2
    m = ho * wo * n
    # Pad by 1 on every side; the extra bottom/right row only keeps the padded
    # dims even so the stride-2 tap gather below is a pure leading-dim reshape
    # followed by static unit-stride slices (no strided loads).
    xp = _pad_hw(x, 1, 1, 1, 1)                           # (H+2, W+2, N, Ci)
    xr = xp.reshape((h + 2) // 2, 2, (w + 2) // 2, 2, n, ci)
    acc = jnp.zeros((m, co), jnp.float32)
    for kh in range(K):
        ah, bh = kh // 2, kh % 2
        for kw in range(K):
            aw, bw = kw // 2, kw % 2
            # padded row index 2p + kh == 2*(p + kh//2) + kh%2 -> slice + parity
            tap = xr[ah:ah + ho, bh:bh + 1, aw:aw + wo, bw:bw + 1, :, :]
            tap = tap.reshape(m, ci)
            t = kh * K + kw
            acc = acc + jnp.dot(tap, w_pack[t * ci:(t + 1) * ci, :],
                                preferred_element_type=jnp.float32)
    out = jnp.maximum(acc + bias, 0.0)
    return out.reshape(ho, wo, n, co)


def _deconv_s2_relu_phases(x, w_pack, bias):
    """nn.ConvTranspose2d(Ci, Co, k=3, s=2, p=1, op=1) + ReLU, 4-phase form.

    x: (H, W, N, Ci) value, w_pack: (9*Ci, Co) (tap-major), bias: (1, Co).
    Returns {(oi, oj): (H*W*N, Co)} phase outputs (output pixel (2r+oi, 2c+oj)).
    """
    h, w, n, ci = x.shape
    co = w_pack.shape[1]
    m = h * w * n
    xp = _pad_hw(x, 0, 1, 0, 1)                           # zero bottom/right
    views = {}
    for dh in (0, 1):
        for dw in (0, 1):
            views[(dh, dw)] = xp[dh:dh + h, dw:dw + w, :, :].reshape(m, ci)
    phases = {}
    for (oi, oj), taps in _PHASE_TAPS.items():
        acc = jnp.zeros((m, co), jnp.float32)
        for (shift, kh, kw) in taps:
            t = kh * K + kw
            acc = acc + jnp.dot(views[shift], w_pack[t * ci:(t + 1) * ci, :],
                                preferred_element_type=jnp.float32)
        phases[(oi, oj)] = jnp.maximum(acc + bias, 0.0)
    return phases


def _interleave_phases(phases, h, w, n, co):
    """Re-interleave 4 sub-pixel phases to (2H, 2W, N, Co), in VMEM only.

    Uses expand-dim + leading-axis concat + leading-dim reshape (all safe);
    only used BETWEEN decoder layers (the final layer stays phase-major)."""
    p = {k: v.reshape(h, w, n, co) for k, v in phases.items()}
    rows = []
    for j in (0, 1):
        r = jnp.concatenate([p[(0, j)][:, None], p[(1, j)][:, None]], axis=1)
        rows.append(r.reshape(2 * h, w, n, co))
    y = jnp.concatenate([rows[0][:, :, None], rows[1][:, :, None]], axis=2)
    return y.reshape(2 * h, 2 * w, n, co)


def _make_fused_kernel(n, h, w, channels):
    """Build the single fused kernel for the whole autoencoder forward."""
    num_layers = len(channels) - 1

    def kernel(*refs):
        x_ref = refs[0]
        param_refs = refs[1:-1]          # (w_pack, bias) per layer, enc then dec
        out_ref = refs[-1]

        x = x_ref[...].reshape(h, w, n, channels[0])
        idx = 0
        # ------------------------- encoder -------------------------
        for _ in range(num_layers):
            wp = param_refs[idx][...]
            b = param_refs[idx + 1][...]
            idx += 2
            x = _conv_s2_relu(x, wp, b)
        # ------------------------- decoder -------------------------
        for li in range(num_layers):
            wp = param_refs[idx][...]
            b = param_refs[idx + 1][...]
            idx += 2
            hh, ww = x.shape[0], x.shape[1]
            co = wp.shape[1]
            phases = _deconv_s2_relu_phases(x, wp, b)
            if li < num_layers - 1:
                # interleave in VMEM so the next deconv reads a plain layout
                x = _interleave_phases(phases, hh, ww, n, co)
            else:
                # final layer: write the 4 sub-pixel phase blocks straight to
                # the output (single HBM store of the fused kernel); the
                # wrapper does the one un-interleave transpose.
                for (oi, oj), ph in phases.items():
                    out_ref[oi, oj, :, :] = ph.astype(out_ref.dtype)

    return kernel


# ----------------------------------------------------------------------------
# Wrapper: one pallas_call for the whole network
# ----------------------------------------------------------------------------
def _tiled_bytes(shape, itemsize=4):
    """VMEM footprint of an array once padded to (8, 128) tiles."""
    shape = tuple(shape)
    if len(shape) == 1:
        shape = (1,) + shape
    lead = 1
    for d in shape[:-2]:
        lead *= int(d)
    sl = -(-int(shape[-2]) // 8) * 8
    ln = -(-int(shape[-1]) // 128) * 128
    return lead * sl * ln * itemsize


def _zero_map(ndim):
    return lambda i: (0,) * ndim


def autoencoder_forward(x_nchw, packed, filters, in_ch):
    n, c, h, w = x_nchw.shape
    assert c == in_ch
    num_layers = len(filters)
    assert h % (2 ** num_layers) == 0 and w % (2 ** num_layers) == 0
    channels = [in_ch] + list(filters)

    # channel-minor, spatial-major layout for the kernel (layout plumbing only)
    x_in = jnp.transpose(x_nchw, (2, 3, 0, 1)).reshape(h * w * n, in_ch)

    hf, wf = h // 2, w // 2              # spatial dims of the final deconv input
    m_out = hf * wf * n
    out_shape = jax.ShapeDtypeStruct((2, 2, m_out, in_ch), jnp.float32)

    operands = [x_in] + list(packed)

    # VMEM-budget-aware limit: tiled operand footprint + per-layer padded
    # activations (x3 for pad / reshaped / tap temporaries), with headroom,
    # capped at 48 MiB (safe on v7x's 64 MiB VMEM).
    est = sum(_tiled_bytes(op.shape) for op in operands)
    est += _tiled_bytes(out_shape.shape)
    hh, ww = h, w
    for ch in channels + list(reversed(channels[:-1])):
        est += 3 * _tiled_bytes((hh + 2, ww + 2, n, ch))
        hh, ww = max(hh // 2, 1), max(ww // 2, 1)
    vmem_limit = int(min(48 * 1024 * 1024, max(32 * 1024 * 1024, 4 * est)))

    in_specs = [pl.BlockSpec(tuple(op.shape), _zero_map(op.ndim))
                for op in operands]
    out_spec = pl.BlockSpec((2, 2, m_out, in_ch), _zero_map(4))

    out = pl.pallas_call(
        _make_fused_kernel(n, h, w, channels),
        out_shape=out_shape,
        grid_spec=pltpu.PrefetchScalarGridSpec(
            num_scalar_prefetch=0,
            grid=(1,),
            in_specs=in_specs,
            out_specs=out_spec,
        ),
        compiler_params=pltpu.CompilerParams(
            dimension_semantics=("arbitrary",),
            vmem_limit_bytes=vmem_limit,
        ),
    )(*operands)

    # Un-interleave the final sub-pixel phases (only layout op outside the
    # kernel) and return NCHW.
    o6 = out.reshape(2, 2, hf, wf, n, in_ch)          # (oi, oj, r, c, n, co)
    o6 = jnp.transpose(o6, (4, 5, 2, 0, 3, 1))        # (n, co, r, oi, c, oj)
    return o6.reshape(n, in_ch, h, w)


# ----------------------------------------------------------------------------
# Parameters: deterministic synthetic init + one-time packing (outside jit)
# ----------------------------------------------------------------------------
def init_params(key, filters, in_ch=3):
    channels = [in_ch] + list(filters)
    enc, dec = [], []
    for cin, cout in zip(channels[:-1], channels[1:]):
        key, kw_, kb_ = jax.random.split(key, 3)
        enc.append((0.1 * jax.random.normal(kw_, (cout, cin, K, K), jnp.float32),
                    0.05 * jax.random.normal(kb_, (cout,), jnp.float32)))
    rchannels = channels[::-1]
    for cin, cout in zip(rchannels[:-1], rchannels[1:]):
        key, kw_, kb_ = jax.random.split(key, 3)
        # ConvTranspose2d weight layout: (in_ch, out_ch, kH, kW)
        dec.append((0.1 * jax.random.normal(kw_, (cin, cout, K, K), jnp.float32),
                    0.05 * jax.random.normal(kb_, (cout,), jnp.float32)))
    return {"encoder": enc, "decoder": dec}


def pack_params(params):
    """Pack per-tap weight blocks (9*Ci, Co) + (1, Co) biases ONCE, outside jit."""
    packed = []
    for w_, b_ in params["encoder"]:
        co, ci = w_.shape[0], w_.shape[1]
        # tap t = kh*3 + kw block = w[:, :, kh, kw].T  (Ci, Co)
        packed.append(jnp.transpose(w_, (2, 3, 1, 0)).reshape(K * K * ci, co))
        packed.append(b_.reshape(1, co))
    for w_, b_ in params["decoder"]:
        ci, co = w_.shape[0], w_.shape[1]
        # tap t = kh*3 + kw block = w[:, :, kh, kw]  (Ci, Co)
        packed.append(jnp.transpose(w_, (2, 3, 0, 1)).reshape(K * K * ci, co))
        packed.append(b_.reshape(1, co))
    return packed


# ----------------------------------------------------------------------------
# Pure-JAX/XLA reference mirroring PyTorch semantics
# ----------------------------------------------------------------------------
def reference_forward(x_nchw, params):
    x = jnp.transpose(x_nchw, (0, 2, 3, 1))
    dn = ('NHWC', 'HWIO', 'NHWC')
    for w, b in params["encoder"]:
        w_hwio = jnp.transpose(w, (2, 3, 1, 0))
        x = lax.conv_general_dilated(x, w_hwio, (2, 2), ((1, 1), (1, 1)),
                                     dimension_numbers=dn)
        x = jax.nn.relu(x + b)
    for w, b in params["decoder"]:
        w_hwio = jnp.transpose(jnp.flip(w, axis=(2, 3)), (2, 3, 0, 1))
        x = lax.conv_general_dilated(x, w_hwio, (1, 1), ((1, 2), (1, 2)),
                                     lhs_dilation=(2, 2),
                                     dimension_numbers=dn)
        x = jax.nn.relu(x + b)
    return jnp.transpose(x, (0, 3, 1, 2))


if __name__ == "__main__":
    key = jax.random.PRNGKey(0)
    kx, kp = jax.random.split(key)

    filters = [8, 16]            # AutoEncoder(filters=[8, 16], in_ch=3)
    in_ch = 3
    x = jax.random.normal(kx, (2, in_ch, 16, 16), jnp.float32)   # NCHW

    params = init_params(kp, filters, in_ch=in_ch)
    packed = pack_params(params)                 # hoisted out of the forward

    fwd = jax.jit(functools.partial(autoencoder_forward,
                                    filters=filters, in_ch=in_ch))
    out = jax.block_until_ready(fwd(x, packed))
    assert out.shape == x.shape, (out.shape, x.shape)

    ref = jax.block_until_ready(reference_forward(x, params))
    np.testing.assert_allclose(np.asarray(out), np.asarray(ref),
                               rtol=1e-4, atol=1e-4)

    print("KERNEL_OK")
</pallas_src>

<mosaic_0001>
module attributes {stable_mosaic.version = 11 : i64} {
  func.func @kernel(%arg0: i32, %arg1: memref<512x3xf32, #tpu.memory_space<vmem>>, %arg2: memref<27x8xf32, #tpu.memory_space<vmem>>, %arg3: memref<1x8xf32, #tpu.memory_space<vmem>>, %arg4: memref<72x16xf32, #tpu.memory_space<vmem>>, %arg5: memref<1x16xf32, #tpu.memory_space<vmem>>, %arg6: memref<144x8xf32, #tpu.memory_space<vmem>>, %arg7: memref<1x8xf32, #tpu.memory_space<vmem>>, %arg8: memref<72x3xf32, #tpu.memory_space<vmem>>, %arg9: memref<1x3xf32, #tpu.memory_space<vmem>>, %arg10: memref<2x2x128x3xf32, #tpu.memory_space<vmem>>) attributes {dimension_semantics = [#tpu.dimension_semantics<arbitrary>], iteration_bounds = array<i64: 1>, scalar_prefetch = 0 : i64, scratch_operands = 0 : i64, tpu.core_type = #tpu.core_type<tc>, window_params = [{pipeline_mode = #tpu.pipeline_mode<synchronous>, transform_indices = @transform_0, window_bounds = array<i64: 512, 3>}, {pipeline_mode = #tpu.pipeline_mode<synchronous>, transform_indices = @transform_1, window_bounds = array<i64: 27, 8>}, {pipeline_mode = #tpu.pipeline_mode<synchronous>, transform_indices = @transform_2, window_bounds = array<i64: 1, 8>}, {pipeline_mode = #tpu.pipeline_mode<synchronous>, transform_indices = @transform_3, window_bounds = array<i64: 72, 16>}, {pipeline_mode = #tpu.pipeline_mode<synchronous>, transform_indices = @transform_4, window_bounds = array<i64: 1, 16>}, {pipeline_mode = #tpu.pipeline_mode<synchronous>, transform_indices = @transform_5, window_bounds = array<i64: 144, 8>}, {pipeline_mode = #tpu.pipeline_mode<synchronous>, transform_indices = @transform_6, window_bounds = array<i64: 1, 8>}, {pipeline_mode = #tpu.pipeline_mode<synchronous>, transform_indices = @transform_7, window_bounds = array<i64: 72, 3>}, {pipeline_mode = #tpu.pipeline_mode<synchronous>, transform_indices = @transform_8, window_bounds = array<i64: 1, 3>}, {pipeline_mode = #tpu.pipeline_mode<synchronous>, transform_indices = @transform_9, window_bounds = array<i64: 2, 2, 128, 3>}]} {
    %c0 = arith.constant 0 : index
    %c0_0 = arith.constant 0 : index
    %0 = vector.load %arg1[%c0, %c0_0] : memref<512x3xf32, #tpu.memory_space<vmem>>, vector<512x3xf32>
    %1 = vector.shape_cast %0 : vector<512x3xf32> to vector<16x16x2x3xf32>
    %c0_1 = arith.constant 0 : index
    %c0_2 = arith.constant 0 : index
    %2 = vector.load %arg2[%c0_1, %c0_2] : memref<27x8xf32, #tpu.memory_space<vmem>>, vector<27x8xf32>
    %c0_3 = arith.constant 0 : index
    %c0_4 = arith.constant 0 : index
    %3 = vector.load %arg3[%c0_3, %c0_4] : memref<1x8xf32, #tpu.memory_space<vmem>>, vector<1x8xf32>
    %cst = arith.constant 0.000000e+00 : f32
    %4 = vector.broadcast %cst : f32 to vector<1x16x2x3xf32>
    %cst_5 = arith.constant 0.000000e+00 : f32
    %5 = vector.broadcast %cst_5 : f32 to vector<1x16x2x3xf32>
    %6 = tpu.concatenate %4, %1, %5 in 0 : vector<1x16x2x3xf32>, vector<16x16x2x3xf32>, vector<1x16x2x3xf32> -> vector<18x16x2x3xf32>
    %cst_6 = arith.constant 0.000000e+00 : f32
    %7 = vector.broadcast %cst_6 : f32 to vector<18x1x2x3xf32>
    %cst_7 = arith.constant 0.000000e+00 : f32
    %8 = vector.broadcast %cst_7 : f32 to vector<18x1x2x3xf32>
    %9 = tpu.concatenate %7, %6, %8 in 1 : vector<18x1x2x3xf32>, vector<18x16x2x3xf32>, vector<18x1x2x3xf32> -> vector<18x18x2x3xf32>
    %10 = vector.shape_cast %9 : vector<18x18x2x3xf32> to vector<9x2x9x2x2x3xf32>
    %cst_8 = arith.constant 0.000000e+00 : f32
    %11 = vector.broadcast %cst_8 : f32 to vector<128x8xf32>
    %12 = vector.extract_strided_slice %10 {offsets = [0, 0, 0, 0, 0, 0], sizes = [8, 1, 8, 1, 2, 3], strides = [1, 1, 1, 1, 1, 1]} : vector<9x2x9x2x2x3xf32> to vector<8x1x8x1x2x3xf32>
    %13 = vector.shape_cast %12 : vector<8x1x8x1x2x3xf32> to vector<128x3xf32>
    %14 = vector.extract_strided_slice %2 {offsets = [0, 0], sizes = [3, 8], strides = [1, 1]} : vector<27x8xf32> to vector<3x8xf32>
    %cst_9 = arith.constant dense<0.000000e+00> : vector<128x8xf32>
    %15 = tpu.matmul %13, %14, %cst_9 {dimension_numbers = #tpu.dot_dimension_numbers<[1], [0], [0], [1], [0, 0, 1, 1], [], []>} : vector<128x3xf32>, vector<3x8xf32>, vector<128x8xf32> -> vector<128x8xf32>
    %16 = arith.addf %11, %15 : vector<128x8xf32>
    %17 = vector.extract_strided_slice %10 {offsets = [0, 0, 0, 1, 0, 0], sizes = [8, 1, 8, 1, 2, 3], strides = [1, 1, 1, 1, 1, 1]} : vector<9x2x9x2x2x3xf32> to vector<8x1x8x1x2x3xf32>
    %18 = vector.shape_cast %17 : vector<8x1x8x1x2x3xf32> to vector<128x3xf32>
    %19 = vector.extract_strided_slice %2 {offsets = [3, 0], sizes = [3, 8], strides = [1, 1]} : vector<27x8xf32> to vector<3x8xf32>
    %cst_10 = arith.constant dense<0.000000e+00> : vector<128x8xf32>
    %20 = tpu.matmul %18, %19, %cst_10 {dimension_numbers = #tpu.dot_dimension_numbers<[1], [0], [0], [1], [0, 0, 1, 1], [], []>} : vector<128x3xf32>, vector<3x8xf32>, vector<128x8xf32> -> vector<128x8xf32>
    %21 = arith.addf %16, %20 : vector<128x8xf32>
    %22 = vector.extract_strided_slice %10 {offsets = [0, 0, 1, 0, 0, 0], sizes = [8, 1, 8, 1, 2, 3], strides = [1, 1, 1, 1, 1, 1]} : vector<9x2x9x2x2x3xf32> to vector<8x1x8x1x2x3xf32>
    %23 = vector.shape_cast %22 : vector<8x1x8x1x2x3xf32> to vector<128x3xf32>
    %24 = vector.extract_strided_slice %2 {offsets = [6, 0], sizes = [3, 8], strides = [1, 1]} : vector<27x8xf32> to vector<3x8xf32>
    %cst_11 = arith.constant dense<0.000000e+00> : vector<128x8xf32>
    %25 = tpu.matmul %23, %24, %cst_11 {dimension_numbers = #tpu.dot_dimension_numbers<[1], [0], [0], [1], [0, 0, 1, 1], [], []>} : vector<128x3xf32>, vector<3x8xf32>, vector<128x8xf32> -> vector<128x8xf32>
    %26 = arith.addf %21, %25 : vector<128x8xf32>
    %27 = vector.extract_strided_slice %10 {offsets = [0, 1, 0, 0, 0, 0], sizes = [8, 1, 8, 1, 2, 3], strides = [1, 1, 1, 1, 1, 1]} : vector<9x2x9x2x2x3xf32> to vector<8x1x8x1x2x3xf32>
    %28 = vector.shape_cast %27 : vector<8x1x8x1x2x3xf32> to vector<128x3xf32>
    %29 = vector.extract_strided_slice %2 {offsets = [9, 0], sizes = [3, 8], strides = [1, 1]} : vector<27x8xf32> to vector<3x8xf32>
    %cst_12 = arith.constant dense<0.000000e+00> : vector<128x8xf32>
    %30 = tpu.matmul %28, %29, %cst_12 {dimension_numbers = #tpu.dot_dimension_numbers<[1], [0], [0], [1], [0, 0, 1, 1], [], []>} : vector<128x3xf32>, vector<3x8xf32>, vector<128x8xf32> -> vector<128x8xf32>
    %31 = arith.addf %26, %30 : vector<128x8xf32>
    %32 = vector.extract_strided_slice %10 {offsets = [0, 1, 0, 1, 0, 0], sizes = [8, 1, 8, 1, 2, 3], strides = [1, 1, 1, 1, 1, 1]} : vector<9x2x9x2x2x3xf32> to vector<8x1x8x1x2x3xf32>
    %33 = vector.shape_cast %32 : vector<8x1x8x1x2x3xf32> to vector<128x3xf32>
    %34 = vector.extract_strided_slice %2 {offsets = [12, 0], sizes = [3, 8], strides = [1, 1]} : vector<27x8xf32> to vector<3x8xf32>
    %cst_13 = arith.constant dense<0.000000e+00> : vector<128x8xf32>
    %35 = tpu.matmul %33, %34, %cst_13 {dimension_numbers = #tpu.dot_dimension_numbers<[1], [0], [0], [1], [0, 0, 1, 1], [], []>} : vector<128x3xf32>, vector<3x8xf32>, vector<128x8xf32> -> vector<128x8xf32>
    %36 = arith.addf %31, %35 : vector<128x8xf32>
    %37 = vector.extract_strided_slice %10 {offsets = [0, 1, 1, 0, 0, 0], sizes = [8, 1, 8, 1, 2, 3], strides = [1, 1, 1, 1, 1, 1]} : vector<9x2x9x2x2x3xf32> to vector<8x1x8x1x2x3xf32>
    %38 = vector.shape_cast %37 : vector<8x1x8x1x2x3xf32> to vector<128x3xf32>
    %39 = vector.extract_strided_slice %2 {offsets = [15, 0], sizes = [3, 8], strides = [1, 1]} : vector<27x8xf32> to vector<3x8xf32>
    %cst_14 = arith.constant dense<0.000000e+00> : vector<128x8xf32>
    %40 = tpu.matmul %38, %39, %cst_14 {dimension_numbers = #tpu.dot_dimension_numbers<[1], [0], [0], [1], [0, 0, 1, 1], [], []>} : vector<128x3xf32>, vector<3x8xf32>, vector<128x8xf32> -> vector<128x8xf32>
    %41 = arith.addf %36, %40 : vector<128x8xf32>
    %42 = vector.extract_strided_slice %10 {offsets = [1, 0, 0, 0, 0, 0], sizes = [8, 1, 8, 1, 2, 3], strides = [1, 1, 1, 1, 1, 1]} : vector<9x2x9x2x2x3xf32> to vector<8x1x8x1x2x3xf32>
    %43 = vector.shape_cast %42 : vector<8x1x8x1x2x3xf32> to vector<128x3xf32>
    %44 = vector.extract_strided_slice %2 {offsets = [18, 0], sizes = [3, 8], strides = [1, 1]} : vector<27x8xf32> to vector<3x8xf32>
    %cst_15 = arith.constant dense<0.000000e+00> : vector<128x8xf32>
    %45 = tpu.matmul %43, %44, %cst_15 {dimension_numbers = #tpu.dot_dimension_numbers<[1], [0], [0], [1], [0, 0, 1, 1], [], []>} : vector<128x3xf32>, vector<3x8xf32>, vector<128x8xf32> -> vector<128x8xf32>
    %46 = arith.addf %41, %45 : vector<128x8xf32>
    %47 = vector.extract_strided_slice %10 {offsets = [1, 0, 0, 1, 0, 0], sizes = [8, 1, 8, 1, 2, 3], strides = [1, 1, 1, 1, 1, 1]} : vector<9x2x9x2x2x3xf32> to vector<8x1x8x1x2x3xf32>
    %48 = vector.shape_cast %47 : vector<8x1x8x1x2x3xf32> to vector<128x3xf32>
    %49 = vector.extract_strided_slice %2 {offsets = [21, 0], sizes = [3, 8], strides = [1, 1]} : vector<27x8xf32> to vector<3x8xf32>
    %cst_16 = arith.constant dense<0.000000e+00> : vector<128x8xf32>
    %50 = tpu.matmul %48, %49, %cst_16 {dimension_numbers = #tpu.dot_dimension_numbers<[1], [0], [0], [1], [0, 0, 1, 1], [], []>} : vector<128x3xf32>, vector<3x8xf32>, vector<128x8xf32> -> vector<128x8xf32>
    %51 = arith.addf %46, %50 : vector<128x8xf32>
    %52 = vector.extract_strided_slice %10 {offsets = [1, 0, 1, 0, 0, 0], sizes = [8, 1, 8, 1, 2, 3], strides = [1, 1, 1, 1, 1, 1]} : vector<9x2x9x2x2x3xf32> to vector<8x1x8x1x2x3xf32>
    %53 = vector.shape_cast %52 : vector<8x1x8x1x2x3xf32> to vector<128x3xf32>
    %54 = vector.extract_strided_slice %2 {offsets = [24, 0], sizes = [3, 8], strides = [1, 1]} : vector<27x8xf32> to vector<3x8xf32>
    %cst_17 = arith.constant dense<0.000000e+00> : vector<128x8xf32>
    %55 = tpu.matmul %53, %54, %cst_17 {dimension_numbers = #tpu.dot_dimension_numbers<[1], [0], [0], [1], [0, 0, 1, 1], [], []>} : vector<128x3xf32>, vector<3x8xf32>, vector<128x8xf32> -> vector<128x8xf32>
    %56 = arith.addf %51, %55 : vector<128x8xf32>
    %57 = vector.broadcast %3 : vector<1x8xf32> to vector<128x8xf32>
    %58 = arith.addf %56, %57 : vector<128x8xf32>
    %cst_18 = arith.constant 0.000000e+00 : f32
    %59 = vector.broadcast %cst_18 : f32 to vector<128x8xf32>
    %60 = arith.maximumf %58, %59 : vector<128x8xf32>
    %61 = vector.shape_cast %60 : vector<128x8xf32> to vector<8x8x2x8xf32>
    %c0_19 = arith.constant 0 : index
    %c0_20 = arith.constant 0 : index
    %62 = vector.load %arg4[%c0_19, %c0_20] : memref<72x16xf32, #tpu.memory_space<vmem>>, vector<72x16xf32>
    %c0_21 = arith.constant 0 : index
    %c0_22 = arith.constant 0 : index
    %63 = vector.load %arg5[%c0_21, %c0_22] : memref<1x16xf32, #tpu.memory_space<vmem>>, vector<1x16xf32>
    %cst_23 = arith.constant 0.000000e+00 : f32
    %64 = vector.broadcast %cst_23 : f32 to vector<1x8x2x8xf32>
    %cst_24 = arith.constant 0.000000e+00 : f32
    %65 = vector.broadcast %cst_24 : f32 to vector<1x8x2x8xf32>
    %66 = tpu.concatenate %64, %61, %65 in 0 : vector<1x8x2x8xf32>, vector<8x8x2x8xf32>, vector<1x8x2x8xf32> -> vector<10x8x2x8xf32>
    %cst_25 = arith.constant 0.000000e+00 : f32
    %67 = vector.broadcast %cst_25 : f32 to vector<10x1x2x8xf32>
    %cst_26 = arith.constant 0.000000e+00 : f32
    %68 = vector.broadcast %cst_26 : f32 to vector<10x1x2x8xf32>
    %69 = tpu.concatenate %67, %66, %68 in 1 : vector<10x1x2x8xf32>, vector<10x8x2x8xf32>, vector<10x1x2x8xf32> -> vector<10x10x2x8xf32>
    %70 = vector.shape_cast %69 : vector<10x10x2x8xf32> to vector<5x2x5x2x2x8xf32>
    %cst_27 = arith.constant 0.000000e+00 : f32
    %71 = vector.broadcast %cst_27 : f32 to vector<32x16xf32>
    %72 = vector.extract_strided_slice %70 {offsets = [0, 0, 0, 0, 0, 0], sizes = [4, 1, 4, 1, 2, 8], strides = [1, 1, 1, 1, 1, 1]} : vector<5x2x5x2x2x8xf32> to vector<4x1x4x1x2x8xf32>
    %73 = vector.shape_cast %72 : vector<4x1x4x1x2x8xf32> to vector<32x8xf32>
    %74 = vector.extract_strided_slice %62 {offsets = [0, 0], sizes = [8, 16], strides = [1, 1]} : vector<72x16xf32> to vector<8x16xf32>
    %cst_28 = arith.constant dense<0.000000e+00> : vector<32x16xf32>
    %75 = tpu.matmul %73, %74, %cst_28 {dimension_numbers = #tpu.dot_dimension_numbers<[1], [0], [0], [1], [0, 0, 1, 1], [], []>} : vector<32x8xf32>, vector<8x16xf32>, vector<32x16xf32> -> vector<32x16xf32>
    %76 = arith.addf %71, %75 : vector<32x16xf32>
    %77 = vector.extract_strided_slice %70 {offsets = [0, 0, 0, 1, 0, 0], sizes = [4, 1, 4, 1, 2, 8], strides = [1, 1, 1, 1, 1, 1]} : vector<5x2x5x2x2x8xf32> to vector<4x1x4x1x2x8xf32>
    %78 = vector.shape_cast %77 : vector<4x1x4x1x2x8xf32> to vector<32x8xf32>
    %79 = vector.extract_strided_slice %62 {offsets = [8, 0], sizes = [8, 16], strides = [1, 1]} : vector<72x16xf32> to vector<8x16xf32>
    %cst_29 = arith.constant dense<0.000000e+00> : vector<32x16xf32>
    %80 = tpu.matmul %78, %79, %cst_29 {dimension_numbers = #tpu.dot_dimension_numbers<[1], [0], [0], [1], [0, 0, 1, 1], [], []>} : vector<32x8xf32>, vector<8x16xf32>, vector<32x16xf32> -> vector<32x16xf32>
    %81 = arith.addf %76, %80 : vector<32x16xf32>
    %82 = vector.extract_strided_slice %70 {offsets = [0, 0, 1, 0, 0, 0], sizes = [4, 1, 4, 1, 2, 8], strides = [1, 1, 1, 1, 1, 1]} : vector<5x2x5x2x2x8xf32> to vector<4x1x4x1x2x8xf32>
    %83 = vector.shape_cast %82 : vector<4x1x4x1x2x8xf32> to vector<32x8xf32>
    %84 = vector.extract_strided_slice %62 {offsets = [16, 0], sizes = [8, 16], strides = [1, 1]} : vector<72x16xf32> to vector<8x16xf32>
    %cst_30 = arith.constant dense<0.000000e+00> : vector<32x16xf32>
    %85 = tpu.matmul %83, %84, %cst_30 {dimension_numbers = #tpu.dot_dimension_numbers<[1], [0], [0], [1], [0, 0, 1, 1], [], []>} : vector<32x8xf32>, vector<8x16xf32>, vector<32x16xf32> -> vector<32x16xf32>
    %86 = arith.addf %81, %85 : vector<32x16xf32>
    %87 = vector.extract_strided_slice %70 {offsets = [0, 1, 0, 0, 0, 0], sizes = [4, 1, 4, 1, 2, 8], strides = [1, 1, 1, 1, 1, 1]} : vector<5x2x5x2x2x8xf32> to vector<4x1x4x1x2x8xf32>
    %88 = vector.shape_cast %87 : vector<4x1x4x1x2x8xf32> to vector<32x8xf32>
    %89 = vector.extract_strided_slice %62 {offsets = [24, 0], sizes = [8, 16], strides = [1, 1]} : vector<72x16xf32> to vector<8x16xf32>
    %cst_31 = arith.constant dense<0.000000e+00> : vector<32x16xf32>
    %90 = tpu.matmul %88, %89, %cst_31 {dimension_numbers = #tpu.dot_dimension_numbers<[1], [0], [0], [1], [0, 0, 1, 1], [], []>} : vector<32x8xf32>, vector<8x16xf32>, vector<32x16xf32> -> vector<32x16xf32>
    %91 = arith.addf %86, %90 : vector<32x16xf32>
    %92 = vector.extract_strided_slice %70 {offsets = [0, 1, 0, 1, 0, 0], sizes = [4, 1, 4, 1, 2, 8], strides = [1, 1, 1, 1, 1, 1]} : vector<5x2x5x2x2x8xf32> to vector<4x1x4x1x2x8xf32>
    %93 = vector.shape_cast %92 : vector<4x1x4x1x2x8xf32> to vector<32x8xf32>
    %94 = vector.extract_strided_slice %62 {offsets = [32, 0], sizes = [8, 16], strides = [1, 1]} : vector<72x16xf32> to vector<8x16xf32>
    %cst_32 = arith.constant dense<0.000000e+00> : vector<32x16xf32>
    %95 = tpu.matmul %93, %94, %cst_32 {dimension_numbers = #tpu.dot_dimension_numbers<[1], [0], [0], [1], [0, 0, 1, 1], [], []>} : vector<32x8xf32>, vector<8x16xf32>, vector<32x16xf32> -> vector<32x16xf32>
    %96 = arith.addf %91, %95 : vector<32x16xf32>
    %97 = vector.extract_strided_slice %70 {offsets = [0, 1, 1, 0, 0, 0], sizes = [4, 1, 4, 1, 2, 8], strides = [1, 1, 1, 1, 1, 1]} : vector<5x2x5x2x2x8xf32> to vector<4x1x4x1x2x8xf32>
    %98 = vector.shape_cast %97 : vector<4x1x4x1x2x8xf32> to vector<32x8xf32>
    %99 = vector.extract_strided_slice %62 {offsets = [40, 0], sizes = [8, 16], strides = [1, 1]} : vector<72x16xf32> to vector<8x16xf32>
    %cst_33 = arith.constant dense<0.000000e+00> : vector<32x16xf32>
    %100 = tpu.matmul %98, %99, %cst_33 {dimension_numbers = #tpu.dot_dimension_numbers<[1], [0], [0], [1], [0, 0, 1, 1], [], []>} : vector<32x8xf32>, vector<8x16xf32>, vector<32x16xf32> -> vector<32x16xf32>
    %101 = arith.addf %96, %100 : vector<32x16xf32>
    %102 = vector.extract_strided_slice %70 {offsets = [1, 0, 0, 0, 0, 0], sizes = [4, 1, 4, 1, 2, 8], strides = [1, 1, 1, 1, 1, 1]} : vector<5x2x5x2x2x8xf32> to vector<4x1x4x1x2x8xf32>
    %103 = vector.shape_cast %102 : vector<4x1x4x1x2x8xf32> to vector<32x8xf32>
    %104 = vector.extract_strided_slice %62 {offsets = [48, 0], sizes = [8, 16], strides = [1, 1]} : vector<72x16xf32> to vector<8x16xf32>
    %cst_34 = arith.constant dense<0.000000e+00> : vector<32x16xf32>
    %105 = tpu.matmul %103, %104, %cst_34 {dimension_numbers = #tpu.dot_dimension_numbers<[1], [0], [0], [1], [0, 0, 1, 1], [], []>} : vector<32x8xf32>, vector<8x16xf32>, vector<32x16xf32> -> vector<32x16xf32>
    %106 = arith.addf %101, %105 : vector<32x16xf32>
    %107 = vector.extract_strided_slice %70 {offsets = [1, 0, 0, 1, 0, 0], sizes = [4, 1, 4, 1, 2, 8], strides = [1, 1, 1, 1, 1, 1]} : vector<5x2x5x2x2x8xf32> to vector<4x1x4x1x2x8xf32>
    %108 = vector.shape_cast %107 : vector<4x1x4x1x2x8xf32> to vector<32x8xf32>
    %109 = vector.extract_strided_slice %62 {offsets = [56, 0], sizes = [8, 16], strides = [1, 1]} : vector<72x16xf32> to vector<8x16xf32>
    %cst_35 = arith.constant dense<0.000000e+00> : vector<32x16xf32>
    %110 = tpu.matmul %108, %109, %cst_35 {dimension_numbers = #tpu.dot_dimension_numbers<[1], [0], [0], [1], [0, 0, 1, 1], [], []>} : vector<32x8xf32>, vector<8x16xf32>, vector<32x16xf32> -> vector<32x16xf32>
    %111 = arith.addf %106, %110 : vector<32x16xf32>
    %112 = vector.extract_strided_slice %70 {offsets = [1, 0, 1, 0, 0, 0], sizes = [4, 1, 4, 1, 2, 8], strides = [1, 1, 1, 1, 1, 1]} : vector<5x2x5x2x2x8xf32> to vector<4x1x4x1x2x8xf32>
    %113 = vector.shape_cast %112 : vector<4x1x4x1x2x8xf32> to vector<32x8xf32>
    %114 = vector.extract_strided_slice %62 {offsets = [64, 0], sizes = [8, 16], strides = [1, 1]} : vector<72x16xf32> to vector<8x16xf32>
    %cst_36 = arith.constant dense<0.000000e+00> : vector<32x16xf32>
    %115 = tpu.matmul %113, %114, %cst_36 {dimension_numbers = #tpu.dot_dimension_numbers<[1], [0], [0], [1], [0, 0, 1, 1], [], []>} : vector<32x8xf32>, vector<8x16xf32>, vector<32x16xf32> -> vector<32x16xf32>
    %116 = arith.addf %111, %115 : vector<32x16xf32>
    %117 = vector.broadcast %63 : vector<1x16xf32> to vector<32x16xf32>
    %118 = arith.addf %116, %117 : vector<32x16xf32>
    %cst_37 = arith.constant 0.000000e+00 : f32
    %119 = vector.broadcast %cst_37 : f32 to vector<32x16xf32>
    %120 = arith.maximumf %118, %119 : vector<32x16xf32>
    %121 = vector.shape_cast %120 : vector<32x16xf32> to vector<4x4x2x16xf32>
    %c0_38 = arith.constant 0 : index
    %c0_39 = arith.constant 0 : index
    %122 = vector.load %arg6[%c0_38, %c0_39] : memref<144x8xf32, #tpu.memory_space<vmem>>, vector<144x8xf32>
    %c0_40 = arith.constant 0 : index
    %c0_41 = arith.constant 0 : index
    %123 = vector.load %arg7[%c0_40, %c0_41] : memref<1x8xf32, #tpu.memory_space<vmem>>, vector<1x8xf32>
    %cst_42 = arith.constant 0.000000e+00 : f32
    %124 = vector.broadcast %cst_42 : f32 to vector<1x4x2x16xf32>
    %125 = tpu.concatenate %121, %124 in 0 : vector<4x4x2x16xf32>, vector<1x4x2x16xf32> -> vector<5x4x2x16xf32>
    %cst_43 = arith.constant 0.000000e+00 : f32
    %126 = vector.broadcast %cst_43 : f32 to vector<5x1x2x16xf32>
    %127 = tpu.concatenate %125, %126 in 1 : vector<5x4x2x16xf32>, vector<5x1x2x16xf32> -> vector<5x5x2x16xf32>
    %128 = vector.extract_strided_slice %127 {offsets = [0, 0, 0, 0], sizes = [4, 4, 2, 16], strides = [1, 1, 1, 1]} : vector<5x5x2x16xf32> to vector<4x4x2x16xf32>
    %129 = vector.shape_cast %128 : vector<4x4x2x16xf32> to vector<32x16xf32>
    %130 = vector.extract_strided_slice %127 {offsets = [0, 1, 0, 0], sizes = [4, 4, 2, 16], strides = [1, 1, 1, 1]} : vector<5x5x2x16xf32> to vector<4x4x2x16xf32>
    %131 = vector.shape_cast %130 : vector<4x4x2x16xf32> to vector<32x16xf32>
    %132 = vector.extract_strided_slice %127 {offsets = [1, 0, 0, 0], sizes = [4, 4, 2, 16], strides = [1, 1, 1, 1]} : vector<5x5x2x16xf32> to vector<4x4x2x16xf32>
    %133 = vector.shape_cast %132 : vector<4x4x2x16xf32> to vector<32x16xf32>
    %134 = vector.extract_strided_slice %127 {offsets = [1, 1, 0, 0], sizes = [4, 4, 2, 16], strides = [1, 1, 1, 1]} : vector<5x5x2x16xf32> to vector<4x4x2x16xf32>
    %135 = vector.shape_cast %134 : vector<4x4x2x16xf32> to vector<32x16xf32>
    %cst_44 = arith.constant 0.000000e+00 : f32
    %136 = vector.broadcast %cst_44 : f32 to vector<32x8xf32>
    %137 = vector.extract_strided_slice %122 {offsets = [64, 0], sizes = [16, 8], strides = [1, 1]} : vector<144x8xf32> to vector<16x8xf32>
    %cst_45 = arith.constant dense<0.000000e+00> : vector<32x8xf32>
    %138 = tpu.matmul %129, %137, %cst_45 {dimension_numbers = #tpu.dot_dimension_numbers<[1], [0], [0], [1], [0, 0, 1, 1], [], []>} : vector<32x16xf32>, vector<16x8xf32>, vector<32x8xf32> -> vector<32x8xf32>
    %139 = arith.addf %136, %138 : vector<32x8xf32>
    %140 = vector.broadcast %123 : vector<1x8xf32> to vector<32x8xf32>
    %141 = arith.addf %139, %140 : vector<32x8xf32>
    %cst_46 = arith.constant 0.000000e+00 : f32
    %142 = vector.broadcast %cst_46 : f32 to vector<32x8xf32>
    %143 = arith.maximumf %141, %142 : vector<32x8xf32>
    %cst_47 = arith.constant 0.000000e+00 : f32
    %144 = vector.broadcast %cst_47 : f32 to vector<32x8xf32>
    %145 = vector.extract_strided_slice %122 {offsets = [48, 0], sizes = [16, 8], strides = [1, 1]} : vector<144x8xf32> to vector<16x8xf32>
    %cst_48 = arith.constant dense<0.000000e+00> : vector<32x8xf32>
    %146 = tpu.matmul %131, %145, %cst_48 {dimension_numbers = #tpu.dot_dimension_numbers<[1], [0], [0], [1], [0, 0, 1, 1], [], []>} : vector<32x16xf32>, vector<16x8xf32>, vector<32x8xf32> -> vector<32x8xf32>
    %147 = arith.addf %144, %146 : vector<32x8xf32>
    %148 = vector.extract_strided_slice %122 {offsets = [80, 0], sizes = [16, 8], strides = [1, 1]} : vector<144x8xf32> to vector<16x8xf32>
    %cst_49 = arith.constant dense<0.000000e+00> : vector<32x8xf32>
    %149 = tpu.matmul %129, %148, %cst_49 {dimension_numbers = #tpu.dot_dimension_numbers<[1], [0], [0], [1], [0, 0, 1, 1], [], []>} : vector<32x16xf32>, vector<16x8xf32>, vector<32x8xf32> -> vector<32x8xf32>
    %150 = arith.addf %147, %149 : vector<32x8xf32>
    %151 = vector.broadcast %123 : vector<1x8xf32> to vector<32x8xf32>
    %152 = arith.addf %150, %151 : vector<32x8xf32>
    %cst_50 = arith.constant 0.000000e+00 : f32
    %153 = vector.broadcast %cst_50 : f32 to vector<32x8xf32>
    %154 = arith.maximumf %152, %153 : vector<32x8xf32>
    %cst_51 = arith.constant 0.000000e+00 : f32
    %155 = vector.broadcast %cst_51 : f32 to vector<32x8xf32>
    %156 = vector.extract_strided_slice %122 {offsets = [16, 0], sizes = [16, 8], strides = [1, 1]} : vector<144x8xf32> to vector<16x8xf32>
    %cst_52 = arith.constant dense<0.000000e+00> : vector<32x8xf32>
    %157 = tpu.matmul %133, %156, %cst_52 {dimension_numbers = #tpu.dot_dimension_numbers<[1], [0], [0], [1], [0, 0, 1, 1], [], []>} : vector<32x16xf32>, vector<16x8xf32>, vector<32x8xf32> -> vector<32x8xf32>
    %158 = arith.addf %155, %157 : vector<32x8xf32>
    %159 = vector.extract_strided_slice %122 {offsets = [112, 0], sizes = [16, 8], strides = [1, 1]} : vector<144x8xf32> to vector<16x8xf32>
    %cst_53 = arith.constant dense<0.000000e+00> : vector<32x8xf32>
    %160 = tpu.matmul %129, %159, %cst_53 {dimension_numbers = #tpu.dot_dimension_numbers<[1], [0], [0], [1], [0, 0, 1, 1], [], []>} : vector<32x16xf32>, vector<16x8xf32>, vector<32x8xf32> -> vector<32x8xf32>
    %161 = arith.addf %158, %160 : vector<32x8xf32>
    %162 = vector.broadcast %123 : vector<1x8xf32> to vector<32x8xf32>
    %163 = arith.addf %161, %162 : vector<32x8xf32>
    %cst_54 = arith.constant 0.000000e+00 : f32
    %164 = vector.broadcast %cst_54 : f32 to vector<32x8xf32>
    %165 = arith.maximumf %163, %164 : vector<32x8xf32>
    %cst_55 = arith.constant 0.000000e+00 : f32
    %166 = vector.broadcast %cst_55 : f32 to vector<32x8xf32>
    %167 = vector.extract_strided_slice %122 {offsets = [0, 0], sizes = [16, 8], strides = [1, 1]} : vector<144x8xf32> to vector<16x8xf32>
    %cst_56 = arith.constant dense<0.000000e+00> : vector<32x8xf32>
    %168 = tpu.matmul %135, %167, %cst_56 {dimension_numbers = #tpu.dot_dimension_numbers<[1], [0], [0], [1], [0, 0, 1, 1], [], []>} : vector<32x16xf32>, vector<16x8xf32>, vector<32x8xf32> -> vector<32x8xf32>
    %169 = arith.addf %166, %168 : vector<32x8xf32>
    %170 = vector.extract_strided_slice %122 {offsets = [32, 0], sizes = [16, 8], strides = [1, 1]} : vector<144x8xf32> to vector<16x8xf32>
    %cst_57 = arith.constant dense<0.000000e+00> : vector<32x8xf32>
    %171 = tpu.matmul %133, %170, %cst_57 {dimension_numbers = #tpu.dot_dimension_numbers<[1], [0], [0], [1], [0, 0, 1, 1], [], []>} : vector<32x16xf32>, vector<16x8xf32>, vector<32x8xf32> -> vector<32x8xf32>
    %172 = arith.addf %169, %171 : vector<32x8xf32>
    %173 = vector.extract_strided_slice %122 {offsets = [96, 0], sizes = [16, 8], strides = [1, 1]} : vector<144x8xf32> to vector<16x8xf32>
    %cst_58 = arith.constant dense<0.000000e+00> : vector<32x8xf32>
    %174 = tpu.matmul %131, %173, %cst_58 {dimension_numbers = #tpu.dot_dimension_numbers<[1], [0], [0], [1], [0, 0, 1, 1], [], []>} : vector<32x16xf32>, vector<16x8xf32>, vector<32x8xf32> -> vector<32x8xf32>
    %175 = arith.addf %172, %174 : vector<32x8xf32>
    %176 = vector.extract_strided_slice %122 {offsets = [128, 0], sizes = [16, 8], strides = [1, 1]} : vector<144x8xf32> to vector<16x8xf32>
    %cst_59 = arith.constant dense<0.000000e+00> : vector<32x8xf32>
    %177 = tpu.matmul %129, %176, %cst_59 {dimension_numbers = #tpu.dot_dimension_numbers<[1], [0], [0], [1], [0, 0, 1, 1], [], []>} : vector<32x16xf32>, vector<16x8xf32>, vector<32x8xf32> -> vector<32x8xf32>
    %178 = arith.addf %175, %177 : vector<32x8xf32>
    %179 = vector.broadcast %123 : vector<1x8xf32> to vector<32x8xf32>
    %180 = arith.addf %178, %179 : vector<32x8xf32>
    %cst_60 = arith.constant 0.000000e+00 : f32
    %181 = vector.broadcast %cst_60 : f32 to vector<32x8xf32>
    %182 = arith.maximumf %180, %181 : vector<32x8xf32>
    %183 = vector.shape_cast %143 : vector<32x8xf32> to vector<4x4x2x8xf32>
    %184 = vector.shape_cast %154 : vector<32x8xf32> to vector<4x4x2x8xf32>
    %185 = vector.shape_cast %165 : vector<32x8xf32> to vector<4x4x2x8xf32>
    %186 = vector.shape_cast %182 : vector<32x8xf32> to vector<4x4x2x8xf32>
    %187 = vector.shape_cast %183 : vector<4x4x2x8xf32> to vector<4x1x4x2x8xf32>
    %188 = vector.shape_cast %185 : vector<4x4x2x8xf32> to vector<4x1x4x2x8xf32>
    %189 = tpu.concatenate %187, %188 in 1 : vector<4x1x4x2x8xf32>, vector<4x1x4x2x8xf32> -> vector<4x2x4x2x8xf32>
    %190 = vector.shape_cast %189 : vector<4x2x4x2x8xf32> to vector<8x4x2x8xf32>
    %191 = vector.shape_cast %184 : vector<4x4x2x8xf32> to vector<4x1x4x2x8xf32>
    %192 = vector.shape_cast %186 : vector<4x4x2x8xf32> to vector<4x1x4x2x8xf32>
    %193 = tpu.concatenate %191, %192 in 1 : vector<4x1x4x2x8xf32>, vector<4x1x4x2x8xf32> -> vector<4x2x4x2x8xf32>
    %194 = vector.shape_cast %193 : vector<4x2x4x2x8xf32> to vector<8x4x2x8xf32>
    %195 = vector.shape_cast %190 : vector<8x4x2x8xf32> to vector<8x4x1x2x8xf32>
    %196 = vector.shape_cast %194 : vector<8x4x2x8xf32> to vector<8x4x1x2x8xf32>
    %197 = tpu.concatenate %195, %196 in 2 : vector<8x4x1x2x8xf32>, vector<8x4x1x2x8xf32> -> vector<8x4x2x2x8xf32>
    %198 = vector.shape_cast %197 : vector<8x4x2x2x8xf32> to vector<8x8x2x8xf32>
    %c0_61 = arith.constant 0 : index
    %c0_62 = arith.constant 0 : index
    %199 = vector.load %arg8[%c0_61, %c0_62] : memref<72x3xf32, #tpu.memory_space<vmem>>, vector<72x3xf32>
    %c0_63 = arith.constant 0 : index
    %c0_64 = arith.constant 0 : index
    %200 = vector.load %arg9[%c0_63, %c0_64] : memref<1x3xf32, #tpu.memory_space<vmem>>, vector<1x3xf32>
    %cst_65 = arith.constant 0.000000e+00 : f32
    %201 = vector.broadcast %cst_65 : f32 to vector<1x8x2x8xf32>
    %202 = tpu.concatenate %198, %201 in 0 : vector<8x8x2x8xf32>, vector<1x8x2x8xf32> -> vector<9x8x2x8xf32>
    %cst_66 = arith.constant 0.000000e+00 : f32
    %203 = vector.broadcast %cst_66 : f32 to vector<9x1x2x8xf32>
    %204 = tpu.concatenate %202, %203 in 1 : vector<9x8x2x8xf32>, vector<9x1x2x8xf32> -> vector<9x9x2x8xf32>
    %205 = vector.extract_strided_slice %204 {offsets = [0, 0, 0, 0], sizes = [8, 8, 2, 8], strides = [1, 1, 1, 1]} : vector<9x9x2x8xf32> to vector<8x8x2x8xf32>
    %206 = vector.shape_cast %205 : vector<8x8x2x8xf32> to vector<128x8xf32>
    %207 = vector.extract_strided_slice %204 {offsets = [0, 1, 0, 0], sizes = [8, 8, 2, 8], strides = [1, 1, 1, 1]} : vector<9x9x2x8xf32> to vector<8x8x2x8xf32>
    %208 = vector.shape_cast %207 : vector<8x8x2x8xf32> to vector<128x8xf32>
    %209 = vector.extract_strided_slice %204 {offsets = [1, 0, 0, 0], sizes = [8, 8, 2, 8], strides = [1, 1, 1, 1]} : vector<9x9x2x8xf32> to vector<8x8x2x8xf32>
    %210 = vector.shape_cast %209 : vector<8x8x2x8xf32> to vector<128x8xf32>
    %211 = vector.extract_strided_slice %204 {offsets = [1, 1, 0, 0], sizes = [8, 8, 2, 8], strides = [1, 1, 1, 1]} : vector<9x9x2x8xf32> to vector<8x8x2x8xf32>
    %212 = vector.shape_cast %211 : vector<8x8x2x8xf32> to vector<128x8xf32>
    %cst_67 = arith.constant 0.000000e+00 : f32
    %213 = vector.broadcast %cst_67 : f32 to vector<128x3xf32>
    %214 = vector.extract_strided_slice %199 {offsets = [32, 0], sizes = [8, 3], strides = [1, 1]} : vector<72x3xf32> to vector<8x3xf32>
    %cst_68 = arith.constant dense<0.000000e+00> : vector<128x3xf32>
    %215 = tpu.matmul %206, %214, %cst_68 {dimension_numbers = #tpu.dot_dimension_numbers<[1], [0], [0], [1], [0, 0, 1, 1], [], []>} : vector<128x8xf32>, vector<8x3xf32>, vector<128x3xf32> -> vector<128x3xf32>
    %216 = arith.addf %213, %215 : vector<128x3xf32>
    %217 = vector.broadcast %200 : vector<1x3xf32> to vector<128x3xf32>
    %218 = arith.addf %216, %217 : vector<128x3xf32>
    %cst_69 = arith.constant 0.000000e+00 : f32
    %219 = vector.broadcast %cst_69 : f32 to vector<128x3xf32>
    %220 = arith.maximumf %218, %219 : vector<128x3xf32>
    %cst_70 = arith.constant 0.000000e+00 : f32
    %221 = vector.broadcast %cst_70 : f32 to vector<128x3xf32>
    %222 = vector.extract_strided_slice %199 {offsets = [24, 0], sizes = [8, 3], strides = [1, 1]} : vector<72x3xf32> to vector<8x3xf32>
    %cst_71 = arith.constant dense<0.000000e+00> : vector<128x3xf32>
    %223 = tpu.matmul %208, %222, %cst_71 {dimension_numbers = #tpu.dot_dimension_numbers<[1], [0], [0], [1], [0, 0, 1, 1], [], []>} : vector<128x8xf32>, vector<8x3xf32>, vector<128x3xf32> -> vector<128x3xf32>
    %224 = arith.addf %221, %223 : vector<128x3xf32>
    %225 = vector.extract_strided_slice %199 {offsets = [40, 0], sizes = [8, 3], strides = [1, 1]} : vector<72x3xf32> to vector<8x3xf32>
    %cst_72 = arith.constant dense<0.000000e+00> : vector<128x3xf32>
    %226 = tpu.matmul %206, %225, %cst_72 {dimension_numbers = #tpu.dot_dimension_numbers<[1], [0], [0], [1], [0, 0, 1, 1], [], []>} : vector<128x8xf32>, vector<8x3xf32>, vector<128x3xf32> -> vector<128x3xf32>
    %227 = arith.addf %224, %226 : vector<128x3xf32>
    %228 = vector.broadcast %200 : vector<1x3xf32> to vector<128x3xf32>
    %229 = arith.addf %227, %228 : vector<128x3xf32>
    %cst_73 = arith.constant 0.000000e+00 : f32
    %230 = vector.broadcast %cst_73 : f32 to vector<128x3xf32>
    %231 = arith.maximumf %229, %230 : vector<128x3xf32>
    %cst_74 = arith.constant 0.000000e+00 : f32
    %232 = vector.broadcast %cst_74 : f32 to vector<128x3xf32>
    %233 = vector.extract_strided_slice %199 {offsets = [8, 0], sizes = [8, 3], strides = [1, 1]} : vector<72x3xf32> to vector<8x3xf32>
    %cst_75 = arith.constant dense<0.000000e+00> : vector<128x3xf32>
    %234 = tpu.matmul %210, %233, %cst_75 {dimension_numbers = #tpu.dot_dimension_numbers<[1], [0], [0], [1], [0, 0, 1, 1], [], []>} : vector<128x8xf32>, vector<8x3xf32>, vector<128x3xf32> -> vector<128x3xf32>
    %235 = arith.addf %232, %234 : vector<128x3xf32>
    %236 = vector.extract_strided_slice %199 {offsets = [56, 0], sizes = [8, 3], strides = [1, 1]} : vector<72x3xf32> to vector<8x3xf32>
    %cst_76 = arith.constant dense<0.000000e+00> : vector<128x3xf32>
    %237 = tpu.matmul %206, %236, %cst_76 {dimension_numbers = #tpu.dot_dimension_numbers<[1], [0], [0], [1], [0, 0, 1, 1], [], []>} : vector<128x8xf32>, vector<8x3xf32>, vector<128x3xf32> -> vector<128x3xf32>
    %238 = arith.addf %235, %237 : vector<128x3xf32>
    %239 = vector.broadcast %200 : vector<1x3xf32> to vector<128x3xf32>
    %240 = arith.addf %238, %239 : vector<128x3xf32>
    %cst_77 = arith.constant 0.000000e+00 : f32
    %241 = vector.broadcast %cst_77 : f32 to vector<128x3xf32>
    %242 = arith.maximumf %240, %241 : vector<128x3xf32>
    %cst_78 = arith.constant 0.000000e+00 : f32
    %243 = vector.broadcast %cst_78 : f32 to vector<128x3xf32>
    %244 = vector.extract_strided_slice %199 {offsets = [0, 0], sizes = [8, 3], strides = [1, 1]} : vector<72x3xf32> to vector<8x3xf32>
    %cst_79 = arith.constant dense<0.000000e+00> : vector<128x3xf32>
    %245 = tpu.matmul %212, %244, %cst_79 {dimension_numbers = #tpu.dot_dimension_numbers<[1], [0], [0], [1], [0, 0, 1, 1], [], []>} : vector<128x8xf32>, vector<8x3xf32>, vector<128x3xf32> -> vector<128x3xf32>
    %246 = arith.addf %243, %245 : vector<128x3xf32>
    %247 = vector.extract_strided_slice %199 {offsets = [16, 0], sizes = [8, 3], strides = [1, 1]} : vector<72x3xf32> to vector<8x3xf32>
    %cst_80 = arith.constant dense<0.000000e+00> : vector<128x3xf32>
    %248 = tpu.matmul %210, %247, %cst_80 {dimension_numbers = #tpu.dot_dimension_numbers<[1], [0], [0], [1], [0, 0, 1, 1], [], []>} : vector<128x8xf32>, vector<8x3xf32>, vector<128x3xf32> -> vector<128x3xf32>
    %249 = arith.addf %246, %248 : vector<128x3xf32>
    %250 = vector.extract_strided_slice %199 {offsets = [48, 0], sizes = [8, 3], strides = [1, 1]} : vector<72x3xf32> to vector<8x3xf32>
    %cst_81 = arith.constant dense<0.000000e+00> : vector<128x3xf32>
    %251 = tpu.matmul %208, %250, %cst_81 {dimension_numbers = #tpu.dot_dimension_numbers<[1], [0], [0], [1], [0, 0, 1, 1], [], []>} : vector<128x8xf32>, vector<8x3xf32>, vector<128x3xf32> -> vector<128x3xf32>
    %252 = arith.addf %249, %251 : vector<128x3xf32>
    %253 = vector.extract_strided_slice %199 {offsets = [64, 0], sizes = [8, 3], strides = [1, 1]} : vector<72x3xf32> to vector<8x3xf32>
    %cst_82 = arith.constant dense<0.000000e+00> : vector<128x3xf32>
    %254 = tpu.matmul %206, %253, %cst_82 {dimension_numbers = #tpu.dot_dimension_numbers<[1], [0], [0], [1], [0, 0, 1, 1], [], []>} : vector<128x8xf32>, vector<8x3xf32>, vector<128x3xf32> -> vector<128x3xf32>
    %255 = arith.addf %252, %254 : vector<128x3xf32>
    %256 = vector.broadcast %200 : vector<1x3xf32> to vector<128x3xf32>
    %257 = arith.addf %255, %256 : vector<128x3xf32>
    %cst_83 = arith.constant 0.000000e+00 : f32
    %258 = vector.broadcast %cst_83 : f32 to vector<128x3xf32>
    %259 = arith.maximumf %257, %258 : vector<128x3xf32>
    %c0_84 = arith.constant 0 : index
    %c0_85 = arith.constant 0 : index
    %c0_86 = arith.constant 0 : index
    %c0_87 = arith.constant 0 : index
    %260 = vector.load %arg10[%c0_84, %c0_85, %c0_86, %c0_87] : memref<2x2x128x3xf32, #tpu.memory_space<vmem>>, vector<1x1x128x3xf32>
    %261 = vector.shape_cast %260 : vector<1x1x128x3xf32> to vector<128x3xf32>
    %262 = vector.shape_cast %220 : vector<128x3xf32> to vector<1x1x128x3xf32>
    tpu.vector_store %arg10[%c0_84, %c0_85, %c0_86, %c0_87], %262 {strides = array<i32>} : memref<2x2x128x3xf32, #tpu.memory_space<vmem>>, vector<1x1x128x3xf32>,
    %c0_88 = arith.constant 0 : index
    %c1 = arith.constant 1 : index
    %c0_89 = arith.constant 0 : index
    %c0_90 = arith.constant 0 : index
    %263 = vector.load %arg10[%c0_88, %c1, %c0_89, %c0_90] : memref<2x2x128x3xf32, #tpu.memory_space<vmem>>, vector<1x1x128x3xf32>
    %264 = vector.shape_cast %263 : vector<1x1x128x3xf32> to vector<128x3xf32>
    %265 = vector.shape_cast %231 : vector<128x3xf32> to vector<1x1x128x3xf32>
    tpu.vector_store %arg10[%c0_88, %c1, %c0_89, %c0_90], %265 {strides = array<i32>} : memref<2x2x128x3xf32, #tpu.memory_space<vmem>>, vector<1x1x128x3xf32>,
    %c1_91 = arith.constant 1 : index
    %c0_92 = arith.constant 0 : index
    %c0_93 = arith.constant 0 : index
    %c0_94 = arith.constant 0 : index
    %266 = vector.load %arg10[%c1_91, %c0_92, %c0_93, %c0_94] : memref<2x2x128x3xf32, #tpu.memory_space<vmem>>, vector<1x1x128x3xf32>
    %267 = vector.shape_cast %266 : vector<1x1x128x3xf32> to vector<128x3xf32>
    %268 = vector.shape_cast %242 : vector<128x3xf32> to vector<1x1x128x3xf32>
    tpu.vector_store %arg10[%c1_91, %c0_92, %c0_93, %c0_94], %268 {strides = array<i32>} : memref<2x2x128x3xf32, #tpu.memory_space<vmem>>, vector<1x1x128x3xf32>,
    %c1_95 = arith.constant 1 : index
    %c1_96 = arith.constant 1 : index
    %c0_97 = arith.constant 0 : index
    %c0_98 = arith.constant 0 : index
    %269 = vector.load %arg10[%c1_95, %c1_96, %c0_97, %c0_98] : memref<2x2x128x3xf32, #tpu.memory_space<vmem>>, vector<1x1x128x3xf32>
    %270 = vector.shape_cast %269 : vector<1x1x128x3xf32> to vector<128x3xf32>
    %271 = vector.shape_cast %259 : vector<128x3xf32> to vector<1x1x128x3xf32>
    tpu.vector_store %arg10[%c1_95, %c1_96, %c0_97, %c0_98], %271 {strides = array<i32>} : memref<2x2x128x3xf32, #tpu.memory_space<vmem>>, vector<1x1x128x3xf32>,
    return
  }
  func.func @transform_0(%arg0: i32) -> (i32, i32) {
    %c0_i32 = arith.constant 0 : i32
    %c0_i32_0 = arith.constant 0 : i32
    %c0_i32_1 = arith.constant 0 : i32
    return %c0_i32, %c0_i32_0 : i32, i32
  }
  func.func @transform_1(%arg0: i32) -> (i32, i32) {
    %c0_i32 = arith.constant 0 : i32
    %c0_i32_0 = arith.constant 0 : i32
    %c0_i32_1 = arith.constant 0 : i32
    return %c0_i32, %c0_i32_0 : i32, i32
  }
  func.func @transform_2(%arg0: i32) -> (i32, i32) {
    %c0_i32 = arith.constant 0 : i32
    %c0_i32_0 = arith.constant 0 : i32
    %c0_i32_1 = arith.constant 0 : i32
    return %c0_i32, %c0_i32_0 : i32, i32
  }
  func.func @transform_3(%arg0: i32) -> (i32, i32) {
    %c0_i32 = arith.constant 0 : i32
    %c0_i32_0 = arith.constant 0 : i32
    %c0_i32_1 = arith.constant 0 : i32
    return %c0_i32, %c0_i32_0 : i32, i32
  }
  func.func @transform_4(%arg0: i32) -> (i32, i32) {
    %c0_i32 = arith.constant 0 : i32
    %c0_i32_0 = arith.constant 0 : i32
    %c0_i32_1 = arith.constant 0 : i32
    return %c0_i32, %c0_i32_0 : i32, i32
  }
  func.func @transform_5(%arg0: i32) -> (i32, i32) {
    %c0_i32 = arith.constant 0 : i32
    %c0_i32_0 = arith.constant 0 : i32
    %c0_i32_1 = arith.constant 0 : i32
    return %c0_i32, %c0_i32_0 : i32, i32
  }
  func.func @transform_6(%arg0: i32) -> (i32, i32) {
    %c0_i32 = arith.constant 0 : i32
    %c0_i32_0 = arith.constant 0 : i32
    %c0_i32_1 = arith.constant 0 : i32
    return %c0_i32, %c0_i32_0 : i32, i32
  }
  func.func @transform_7(%arg0: i32) -> (i32, i32) {
    %c0_i32 = arith.constant 0 : i32
    %c0_i32_0 = arith.constant 0 : i32
    %c0_i32_1 = arith.constant 0 : i32
    return %c0_i32, %c0_i32_0 : i32, i32
  }
  func.func @transform_8(%arg0: i32) -> (i32, i32) {
    %c0_i32 = arith.constant 0 : i32
    %c0_i32_0 = arith.constant 0 : i32
    %c0_i32_1 = arith.constant 0 : i32
    return %c0_i32, %c0_i32_0 : i32, i32
  }
  func.func @transform_9(%arg0: i32) -> (i32, i32, i32, i32) {
    %c0_i32 = arith.constant 0 : i32
    %c0_i32_0 = arith.constant 0 : i32
    %c0_i32_1 = arith.constant 0 : i32
    %c0_i32_2 = arith.constant 0 : i32
    %c0_i32_3 = arith.constant 0 : i32
    return %c0_i32, %c0_i32_0, %c0_i32_1, %c0_i32_2 : i32, i32, i32, i32
  }
}

</mosaic_0001>

<bundles_post_ra>
// kernel: autoencoder_forward.1
= control target key start
LH: loop header
LB: loop body
LE: loop exit
PB: predicated region body
PF: predicated region fallthrough
CT: control target
= control target key end

     0   :  { %vm1534_vm0 = vcmask 1042432   ;;  %v164_v0 = vlaneseq  ;;  %v11603_v2 = vmov 1983009808   ;;  %v15065_v4 = vmov 0.0   ;;  %s15054_s1 = inlined_call_operand.vmem [shape: f32[27,8], index: 1, kind: input, shape index: {}]   ;;  %s15055_s0 = inlined_call_operand.vmem [shape: f32[512,3], index: 0, kind: input, shape index: {}]   ;;  %s15056_s3 = inlined_call_operand.vmem [shape: f32[72,16], index: 3, kind: input, shape index: {}]   ;;  %s15057_s2 = inlined_call_operand.vmem [shape: f32[1,8], index: 2, kind: input, shape index: {}]   ;;  %s15058_s5 = inlined_call_operand.vmem [shape: f32[144,8], index: 5, kind: input, shape index: {}]   ;;  %s15059_s4 = inlined_call_operand.vmem [shape: f32[1,16], index: 4, kind: input, shape index: {}]   ;;  %s15060_s7 = inlined_call_operand.vmem [shape: f32[72,3], index: 7, kind: input, shape index: {}]   ;;  %s15061_s6 = inlined_call_operand.vmem [shape: f32[1,8], index: 6, kind: input, shape index: {}]   ;;  %s15062_s8 = inlined_call_operand.vmem [shape: f32[1,3], index: 8, kind: input, shape index: {}]   ;;  %s15063_s9 = inlined_call_operand.vmem [shape: f32[2,2,128,3], index: 9, kind: output, shape index: {}]  }
   0x1   :  { %v1248_v1 = vld [vmem:[%s15054_s1] sm:$0xff]  ;;  %v162_v3 = vunpack.c.l.s4 %v11603_v2  ;;  %v1254_v5 = vcombine.low %v15065_v4, %v15065_v4  ;;  %vm1503_vm1 = vcmask 23552   ;;  %v11663_v6 = vld [vmem:[%s15054_s1 + $0x8] sm:$0xff]  ;;  %vm2334_vm2 = vcmask 1041408   ;;  %v38_v13 = vld [vmem:[%s15055_s0 + $0x30] sm:$0xff] }
   0x2   :  { %v36_v7 = vld [vmem:[%s15055_s0 + $0x20] sm:$0xff]  ;;  %10634 = vmatprep.subr.msk.mxu0 %vm1534_vm0, %v1248_v1  ;;  %v165_v8 = vshrl.u32 %v164_v0, 7  ;;  %v2335_v9 = vrot.slane %v1248_v1, 6  ;;  %v2336_v10 = vrot.slane %v11663_v6, 6  ;;  %v37_v11 = vld [vmem:[%s15055_s0 + $0x28] sm:$0xff]  ;;  %v39_v14 = vld [vmem:[%s15055_s0 + $0x38] sm:$0xff]  ;;  %v262_v17 = vcombine.high %v38_v13, %v38_v13 }
   0x3   :  { %v228_v12 = vcombine.high %v36_v7, %v36_v7  ;;  %10635 = vmatpush3.msk.msra.mxu0 %vm1534_vm0, %v1248_v1  ;;  %v163_v15 = vunpack.c.0.s8 %v162_v3  ;;  %v245_v16 = vcombine.high %v37_v11, %v37_v11  ;;  %v2801_v18 = vrot.slane %v11663_v6, 1  ;;  %v44_v19 = vld [vmem:[%s15055_s0 + $0x60] sm:$0xff]  ;;  %v45_v20 = vld [vmem:[%s15055_s0 + $0x68] sm:$0xff]  ;;  %v11690_v21 = vld [vmem:[%s15055_s0 + $0x70] sm:$0xff] }
   0x4   :  { %v2337_v22 = vsel %vm2334_vm2, %v2335_v9, %v2336_v10  ;;  %v279_v23 = vcombine.high %v39_v14, %v39_v14  ;;  %v364_v24 = vcombine.high %v44_v19, %v44_v19  ;;  %v381_v25 = vcombine.high %v45_v20, %v45_v20  ;;  %v47_v26 = vld [vmem:[%s15055_s0 + $0x78] sm:$0xff]  ;;  %v11699_v27 = vld [vmem:[%s15055_s0 + $0xa0] sm:$0xff]  ;;  %v11704_v28 = vld [vmem:[%s15055_s0 + $0xa8] sm:$0xff] }
   0x5   :  { %v11706_v29 = vsub.s32 %v163_v15, %v165_v8  ;;  %10660 = vmatprep.subr.msk.mxu0 %vm1534_vm0, %v2337_v22  ;;  %v398_v30 = vcombine.high %v11690_v21, %v11690_v21  ;;  %v415_v31 = vcombine.high %v47_v26, %v47_v26  ;;  %v500_v32 = vcombine.high %v11699_v27, %v11699_v27  ;;  %v11716_v33 = vld [vmem:[%s15055_s0 + $0xb0] sm:$0xff]  ;;  %v11721_v34 = vld [vmem:[%s15055_s0 + $0xb8] sm:$0xff]  ;;  %v11726_v35 = vld [vmem:[%s15055_s0 + $0xe0] sm:$0xff] }
   0x6   :  { %v517_v36 = vcombine.high %v11704_v28, %v11704_v28  ;;  %v534_v37 = vcombine.high %v11716_v33, %v11716_v33  ;;  %v551_v38 = vcombine.high %v11721_v34, %v11721_v34  ;;  %v636_v39 = vcombine.high %v11726_v35, %v11726_v35 }
   0x7   :  { %v1261_v40 = vrot.slane %v1254_v5, %v11706_v29  ;;  %v11738_v41 = vrot.slane %v36_v7, %v11706_v29  ;;  %v11741_v42 = vrot.slane %v228_v12, %v11706_v29  ;;  %v11744_v43 = vrot.slane %v37_v11, %v11706_v29 }
   0x8   :  { %v11747_v44 = vrot.slane %v245_v16, %v11706_v29  ;;  %v11750_v45 = vrot.slane %v38_v13, %v11706_v29  ;;  %v11753_v46 = vrot.slane %v262_v17, %v11706_v29  ;;  %v11756_v47 = vrot.slane %v39_v14, %v11706_v29 }
   0x9   :  { %15236 = vst [vmem:[#allocation2_spill] sm:$0xff] %v11738_v41  ;;  %15237 = vst [vmem:[#allocation3_spill] sm:$0xff] %v11741_v42  ;;  %v11758_v48 = vcombine.low %v1261_v40, %v1261_v40  ;;  %v243_v49 = vcombine.high %v11738_v41, %v11738_v41  ;;  %v9647_v50 = vcombine.high %v11741_v42, %v11744_v43  ;;  %vm3738_vm3 = vcmask 1040384  }
   0xa   :  { %15238 = vst [vmem:[#allocation4_spill] sm:$0xff] %v11744_v43  ;;  %15239 = vst [vmem:[#allocation5_spill] sm:$0xff] %v11747_v44  ;;  %v9685_v51 = vcombine.high %v11738_v41, %v11741_v42  ;;  %v9648_v52 = vcombine.high %v11747_v44, %v11750_v45  ;;  %v9649_v53 = vcombine.high %v11753_v46, %v11756_v47  ;;  %vm4930_vm4 = vcmask 64512  }
   0xb   :  { %15240 = vst [vmem:[#allocation6_spill] sm:$0xff] %v11750_v45  ;;  %15241 = vst [vmem:[#allocation7_spill] sm:$0xff] %v11753_v46  ;;  %v9686_v54 = vcombine.high %v11744_v43, %v11747_v44  ;;  %v11773_v55 = vrot.slane %v279_v23, %v11706_v29  ;;  %10636 = vmatprep.mubr.msk.f32.mxu0 %vm1503_vm1, %v11758_v48  ;;  %v1682_v56 = vcombine.low %v15065_v4, %v243_v49  ;;  %vm6310_vm5 = vcmask 130048  }
   0xc   :  { %15242 = vst [vmem:[#allocation8_spill] sm:$0xff] %v11756_v47  ;;  %15243 = vst [vmem:[#allocation9_spill] sm:$0xff] %v11758_v48  ;;  %v1697_v57 = vrot.slane %v9647_v50, %v11706_v29  ;;  %v2103_v58 = vrot.slane %v9685_v51, %v11706_v29  ;;  %v9687_v59 = vcombine.high %v11750_v45, %v11753_v46  ;;  %10637 = vmatmul.mubr.msk.f32.vlgmr.msra.gmra.mrb[0].mxu0 %vm1503_vm1, %v11758_v48  ;;  %v61_v50 = vld [vmem:[%s15055_s0 + $0xe8] sm:$0xff] }
   0xd   :  { %15244 = vst [vmem:[#allocation10_spill] sm:$0xff] %v11773_v55  ;;  %v1707_v60 = vrot.slane %v9648_v52, %v11706_v29  ;;  %v1714_v61 = vrot.slane %v9649_v53, %v11706_v29  ;;  %v2110_v62 = vrot.slane %v9686_v54, %v11706_v29  ;;  %v9688_v63 = vcombine.high %v11756_v47, %v11773_v55  ;;  %v62_v53 = vld [vmem:[%s15055_s0 + $0xf0] sm:$0xff] }
   0xe   :  { %10661 = vmatpush3.msk.msra.mxu0 %vm1534_vm0, %v2337_v22  ;;  %v1690_v0 = vrot.slane %v1682_v56, %v11706_v29  ;;  %v2120_v1 = vrot.slane %v9687_v59, %v11706_v29  ;;  %v11793_v2 = vrot.slane %v44_v19, %v11706_v29  ;;  %v11796_v3 = vrot.slane %v364_v24, %v11706_v29 }
   0xf   :  { %v11798_v5 = vcombine.low %v1707_v60, %v1714_v61  ;;  %10686 = vmatprep.subr.msk.mxu0 %vm1534_vm0, %v2801_v18  ;;  %v11803_v7 = vcombine.low %v2103_v58, %v2110_v62  ;;  %v2127_v8 = vrot.slane %v9688_v63, %v11706_v29  ;;  %v11807_v9 = vrot.slane %v45_v20, %v11706_v29 }
  0x10   :  { %15245 = vst [vmem:[#allocation11_spill] sm:$0xff] %v11793_v2  ;;  %15246 = vst [vmem:[#allocation12_spill] sm:$0xff] %v11796_v3  ;;  %v11809_v10 = vcombine.low %v1690_v0, %v1697_v57  ;;  %v11812_v11 = vrot.slane %v381_v25, %v11706_v29  ;;  %v9689_v12 = vcombine.high %v11793_v2, %v11796_v3  ;;  %10610 = vmatprep.mubr.msk.f32.mxu1 %vm1503_vm1, %v11758_v48 }
  0x11   :  { %15247 = vst [vmem:[#allocation13_spill] sm:$0xff] %v11798_v5  ;;  %15248 = vst [vmem:[#allocation14_spill] sm:$0xff] %v11803_v7  ;;  %v11818_v13 = vrot.slane %v11690_v21, %v11706_v29  ;;  %v11822_v14 = vcombine.low %v2120_v1, %v2127_v8  ;;  %v11825_v15 = vrot.slane %v398_v30, %v11706_v29 }
  0x12   :  { %15249 = vst [vmem:[#allocation15_spill] sm:$0xff] %v11807_v9  ;;  %15250 = vst [vmem:[#allocation16_spill] sm:$0xff] %v11809_v10  ;;  %v11828_v16 = vrot.slane %v47_v26, %v11706_v29  ;;  %v11831_v17 = vrot.slane %v415_v31, %v11706_v29  ;;  %10639 = vmatprep.mubr.msk.f32.mxu0 %vm1503_vm1, %v11809_v10  ;;  %v9690_v19 = vcombine.high %v11807_v9, %v11812_v11 }
  0x13   :  { %15251 = vst [vmem:[#allocation17_spill] sm:$0xff] %v11812_v11  ;;  %15252 = vst [vmem:[#allocation18_spill] sm:$0xff] %v11818_v13  ;;  %v2137_v20 = vrot.slane %v9689_v12, %v11706_v29  ;;  %v11840_v21 = vrot.slane %v11699_v27, %v11706_v29  ;;  %v11843_v22 = vrot.slane %v500_v32, %v11706_v29  ;;  %10640 = vmatmul.mubr.msk.f32.gmra.mrb[2].mxu0 %vm1503_vm1, %v11798_v5 }
  0x14   :  { %15253 = vst [vmem:[#allocation19_spill] sm:$0xff] %v11822_v14  ;;  %15254 = vst [vmem:[#allocation20_spill] sm:$0xff] %v11825_v15  ;;  %v9691_v23 = vcombine.high %v11818_v13, %v11825_v15  ;;  %v9692_v24 = vcombine.high %v11828_v16, %v11831_v17  ;;  %v11853_v25 = vrot.slane %v11704_v28, %v11706_v29  ;;  %10662 = vmatprep.mubr.msk.f32.mxu0 %vm1503_vm1, %v11758_v48  ;;  %v73_v15 = vld [vmem:[%s15055_s0 + $0x148] sm:$0xff] }
  0x15   :  { %15255 = vst [vmem:[#allocation21_spill] sm:$0xff] %v11828_v16  ;;  %15256 = vst [vmem:[#allocation22_spill] sm:$0xff] %v11831_v17  ;;  %v11856_v26 = vrot.slane %v517_v36, %v11706_v29  ;;  %v2144_v27 = vrot.slane %v9690_v19, %v11706_v29  ;;  %v9693_v30 = vcombine.high %v11840_v21, %v11843_v22  ;;  %v69_v19 = vld [vmem:[%s15055_s0 + $0x128] sm:$0xff] }
  0x16   :  { %15257 = vst [vmem:[#allocation23_spill] sm:$0xff] %v11840_v21  ;;  %15258 = vst [vmem:[#allocation24_spill] sm:$0xff] %v11843_v22  ;;  %v11865_v31 = vrot.slane %v11716_v33, %v11706_v29  ;;  %v11868_v32 = vrot.slane %v534_v37, %v11706_v29  ;;  %v2154_v28 = vrot.slane %v9691_v23, %v11706_v29 }
  0x17   :  { %15259 = vst [vmem:[#allocation25_spill] sm:$0xff] %v11853_v25  ;;  %15260 = vst [vmem:[#allocation26_spill] sm:$0xff] %v11856_v26  ;;  %v2161_v36 = vrot.slane %v9692_v24, %v11706_v29  ;;  %v9694_v40 = vcombine.high %v11853_v25, %v11856_v26  ;;  %v11876_v49 = vrot.slane %v11721_v34, %v11706_v29  ;;  %10663 = vmatmul.mubr.msk.f32.vlgmr.msra.gmra.mrb[0].mxu0 %vm1503_vm1, %v11758_v48 }
  0x18   :  { %15261 = vst [vmem:[#allocation27_spill] sm:$0xff] %v11865_v31  ;;  %15262 = vst [vmem:[#allocation28_spill] sm:$0xff] %v11868_v32  ;;  %v11881_v33 = vcombine.low %v2137_v20, %v2144_v27  ;;  %v2171_v37 = vrot.slane %v9693_v30, %v11706_v29  ;;  %v11888_v51 = vrot.slane %v551_v38, %v11706_v29  ;;  %v63_v38 = vld [vmem:[%s15055_s0 + $0xf8] sm:$0xff]  ;;  %10687 = vmatpush3.msk.msra.mxu0 %vm1534_vm0, %v2801_v18  ;;  %v70_v30 = vld [vmem:[%s15055_s0 + $0x130] sm:$0xff] }
  0x19   :  { %15263 = vst [vmem:[#allocation29_spill] sm:$0xff] %v11876_v49  ;;  %v9695_v52 = vcombine.high %v11865_v31, %v11868_v32  ;;  %v11897_v54 = vcombine.low %v2154_v28, %v2161_v36  ;;  %v2178_v56 = vrot.slane %v9694_v40, %v11706_v29  ;;  %v11902_v57 = vrot.slane %v11726_v35, %v11706_v29  ;;  %v68_v35 = vld [vmem:[%s15055_s0 + $0x120] sm:$0xff] }
  0x1a   :  { %15264 = vst [vmem:[#allocation30_spill] sm:$0xff] %v11881_v33  ;;  %15265 = vst [vmem:[#allocation31_spill] sm:$0xff] %v11888_v51  ;;  %v11908_v34 = vrot.slane %v636_v39, %v11706_v29  ;;  %10665 = vmatprep.mubr.msk.f32.mxu0 %vm1503_vm1, %v11803_v7  ;;  %v9696_v58 = vcombine.high %v11876_v49, %v11888_v51  ;;  %v653_v60 = vcombine.high %v61_v50, %v61_v50 }
  0x1b   :  { %15266 = vst [vmem:[#allocation32_spill] sm:$0xff] %v11897_v54  ;;  %15267 = vst [vmem:[#allocation33_spill] sm:$0xff] %v11902_v57  ;;  %v2188_v59 = vrot.slane %v9695_v52, %v11706_v29  ;;  %v15064_v39 = vrot.slane %v11663_v6, 4  ;;  %v11925_v61 = vcombine.low %v2171_v37, %v2178_v56  ;;  %v11928_v62 = vrot.slane %v61_v50, %v11706_v29  ;;  %v71_v37 = vld [vmem:[%s15055_s0 + $0x138] sm:$0xff] }
  0x1c   :  { %15268 = vst [vmem:[#allocation34_spill] sm:$0xff] %v11908_v34  ;;  %v9697_v18 = vcombine.high %v11902_v57, %v11908_v34  ;;  %v670_v63 = vcombine.high %v62_v53, %v62_v53  ;;  %v2195_v0 = vrot.slane %v9696_v58, %v11706_v29  ;;  %v11934_v1 = vrot.slane %v653_v60, %v11706_v29 }
  0x1d   :  { %15269 = vst [vmem:[#allocation35_spill] sm:$0xff] %v11925_v61  ;;  %15270 = vst [vmem:[#allocation36_spill] sm:$0xff] %v11928_v62  ;;  %v11937_v8 = vrot.slane %v62_v53, %v11706_v29  ;;  %v687_v12 = vcombine.high %v63_v38, %v63_v38  ;;  %10712 = vmatprep.subr.msk.mxu0 %vm1534_vm0, %v15064_v39  ;;  %10666 = vmatmul.mubr.msk.f32.gmra.mrb[2].mxu0 %vm1503_vm1, %v11822_v14 }
  0x1e   :  { %15271 = vst [vmem:[#allocation37_spill] sm:$0xff] %v11934_v1  ;;  %v2205_v20 = vrot.slane %v9697_v18, %v11706_v29  ;;  %v11949_v23 = vrot.slane %v670_v63, %v11706_v29  ;;  %v11952_v24 = vrot.slane %v63_v38, %v11706_v29  ;;  %v772_v27 = vcombine.high %v68_v35, %v68_v35  ;;  %v76_v18 = vld [vmem:[%s15055_s0 + $0x160] sm:$0xff] }
  0x1f   :  { %15272 = vst [vmem:[#allocation38_spill] sm:$0xff] %v11937_v8  ;;  %10668 = vmatprep.mubr.msk.f32.mxu0 %vm1503_vm1, %v11881_v33  ;;  %v11959_v28 = vcombine.low %v2188_v59, %v2195_v0  ;;  %v9698_v36 = vcombine.high %v11928_v62, %v11934_v1  ;;  %v11964_v40 = vrot.slane %v687_v12, %v11706_v29 }
  0x20   :  { %15273 = vst [vmem:[#allocation39_spill] sm:$0xff] %v11949_v23  ;;  %15274 = vst [vmem:[#allocation40_spill] sm:$0xff] %v11952_v24  ;;  %v11967_v50 = vrot.slane %v68_v35, %v11706_v29  ;;  %v9699_v52 = vcombine.high %v11937_v8, %v11949_v23  ;;  %v11975_v53 = vrot.slane %v772_v27, %v11706_v29  ;;  %v77_v27 = vld [vmem:[%s15055_s0 + $0x168] sm:$0xff] }
  0x21   :  { %15275 = vst [vmem:[#allocation41_spill] sm:$0xff] %v11959_v28  ;;  %15276 = vst [vmem:[#allocation42_spill] sm:$0xff] %v11964_v40  ;;  %v789_v56 = vcombine.high %v69_v19, %v69_v19  ;;  %v11978_v38 = vrot.slane %v69_v19, %v11706_v29  ;;  %v2212_v58 = vrot.slane %v9698_v36, %v11706_v29  ;;  %10669 = vmatmul.mubr.msk.f32.gmra.mrb[4].mxu0 %vm1503_vm1, %v11897_v54 }
  0x22   :  { %15277 = vst [vmem:[#allocation43_spill] sm:$0xff] %v11967_v50  ;;  %15278 = vst [vmem:[#allocation44_spill] sm:$0xff] %v11975_v53  ;;  %v9700_v59 = vcombine.high %v11952_v24, %v11964_v40  ;;  %v806_v60 = vcombine.high %v70_v30, %v70_v30  ;;  %v11984_v35 = vrot.slane %v70_v30, %v11706_v29  ;;  %10671 = vmatprep.mubr.msk.f32.mxu0 %vm1503_vm1, %v11925_v61 }
  0x23   :  { %15279 = vst [vmem:[#allocation45_spill] sm:$0xff] %v11978_v38  ;;  %v2222_v63 = vrot.slane %v9699_v52, %v11706_v29  ;;  %v11993_v0 = vrot.slane %v789_v56, %v11706_v29  ;;  %v9701_v12 = vcombine.high %v11967_v50, %v11975_v53  ;;  %v823_v19 = vcombine.high %v71_v37, %v71_v37 }
  0x24   :  { %15280 = vst [vmem:[#allocation46_spill] sm:$0xff] %v11984_v35  ;;  %v12002_v30 = vcombine.low %v2205_v20, %v2212_v58  ;;  %v2229_v36 = vrot.slane %v9700_v59, %v11706_v29  ;;  %v12006_v52 = vrot.slane %v806_v60, %v11706_v29  ;;  %v12009_v56 = vrot.slane %v71_v37, %v11706_v29  ;;  %v78_v20 = vld [vmem:[%s15055_s0 + $0x170] sm:$0xff] }
  0x25   :  { %15281 = vst [vmem:[#allocation47_spill] sm:$0xff] %v11993_v0  ;;  %v9702_v39 = vcombine.high %v11978_v38, %v11993_v0  ;;  %v2239_v4 = vrot.slane %v9701_v12, %v11706_v29  ;;  %v12015_v54 = vrot.slane %v823_v19, %v11706_v29  ;;  %v908_v33 = vcombine.high %v76_v18, %v76_v18  ;;  %v79_v12 = vld [vmem:[%s15055_s0 + $0x178] sm:$0xff] }
  0x26   :  { %15282 = vst [vmem:[#allocation48_spill] sm:$0xff] %v12002_v30  ;;  %15283 = vst [vmem:[#allocation49_spill] sm:$0xff] %v12006_v52  ;;  %v12020_v58 = vcombine.low %v2222_v63, %v2229_v36  ;;  %v9703_v59 = vcombine.high %v11984_v35, %v12006_v52  ;;  %v12025_v37 = vrot.slane %v76_v18, %v11706_v29  ;;  %10672 = vmatmul.mubr.msk.f32.gmra.mrb[6].mxu0 %vm1503_vm1, %v11959_v28  ;;  %v84_v18 = vld [vmem:[%s15055_s0 + $0x1a0] sm:$0xff] }
  0x27   :  { %15284 = vst [vmem:[#allocation50_spill] sm:$0xff] %v12009_v56  ;;  %15285 = vst [vmem:[#allocation51_spill] sm:$0xff] %v12015_v54  ;;  %v925_v60 = vcombine.high %v77_v27, %v77_v27  ;;  %v2246_v19 = vrot.slane %v9702_v39, %v11706_v29  ;;  %v9704_v63 = vcombine.high %v12009_v56, %v12015_v54  ;;  %10674 = vmatprep.mubr.msk.f32.mxu0 %vm1503_vm1, %v12002_v30  ;;  %v85_v30 = vld [vmem:[%s15055_s0 + $0x1a8] sm:$0xff] }
  0x28   :  { %15286 = vst [vmem:[#allocation52_spill] sm:$0xff] %v12020_v58  ;;  %15287 = vst [vmem:[#allocation53_spill] sm:$0xff] %v12025_v37  ;;  %v12036_v36 = vrot.slane %v908_v33, %v11706_v29  ;;  %v12039_v61 = vrot.slane %v77_v27, %v11706_v29  ;;  %v2256_v28 = vrot.slane %v9703_v59, %v11706_v29 }
  0x29   :  { %v12048_v39 = vrot.slane %v925_v60, %v11706_v29  ;;  %v942_v14 = vcombine.high %v78_v20, %v78_v20  ;;  %v12051_v7 = vrot.slane %v78_v20, %v11706_v29  ;;  %v12053_v33 = vcombine.low %v2239_v4, %v2246_v19  ;;  %v86_v19 = vld [vmem:[%s15055_s0 + $0x1b0] sm:$0xff] }
  0x2a   :  { %15288 = vst [vmem:[#allocation54_spill] sm:$0xff] %v12036_v36  ;;  %15289 = vst [vmem:[#allocation55_spill] sm:$0xff] %v12039_v61  ;;  %v2263_v27 = vrot.slane %v9704_v63, %v11706_v29  ;;  %v9705_v54 = vcombine.high %v12025_v37, %v12036_v36  ;;  %v959_v40 = vcombine.high %v79_v12, %v79_v12  ;;  %10675 = vmatmul.mubr.msk.f32.gmra.mrb[8].mxu0 %vm1503_vm1, %v12020_v58 }
  0x2b   :  { %15290 = vst [vmem:[#allocation56_spill] sm:$0xff] %v12048_v39  ;;  %15291 = vst [vmem:[#allocation57_spill] sm:$0xff] %v12051_v7  ;;  %v9706_v59 = vcombine.high %v12039_v61, %v12048_v39  ;;  %v12064_v60 = vrot.slane %v942_v14, %v11706_v29  ;;  %v12067_v20 = vrot.slane %v79_v12, %v11706_v29  ;;  %10677 = vmatprep.mubr.msk.f32.mxu0 %vm1503_vm1, %v12053_v33 }
  0x2c   :  { %15292 = vst [vmem:[#allocation58_spill] sm:$0xff] %v12053_v33  ;;  %v1044_v4 = vcombine.high %v84_v18, %v84_v18  ;;  %v12074_v63 = vcombine.low %v2256_v28, %v2263_v27  ;;  %v2273_v5 = vrot.slane %v9705_v54, %v11706_v29  ;;  %v12078_v10 = vrot.slane %v959_v40, %v11706_v29  ;;  %v87_v54 = vld [vmem:[%s15055_s0 + $0x1b8] sm:$0xff] }
  0x2d   :  { %15293 = vst [vmem:[#allocation59_spill] sm:$0xff] %v12064_v60  ;;  %15294 = vst [vmem:[#allocation60_spill] sm:$0xff] %v12067_v20  ;;  %v12081_v14 = vrot.slane %v84_v18, %v11706_v29  ;;  %v2280_v12 = vrot.slane %v9706_v59, %v11706_v29  ;;  %v9707_v51 = vcombine.high %v12051_v7, %v12064_v60 }
  0x2e   :  { %15295 = vst [vmem:[#allocation61_spill] sm:$0xff] %v12074_v63  ;;  %15296 = vst [vmem:[#allocation62_spill] sm:$0xff] %v12078_v10  ;;  %v12089_v58 = vrot.slane %v1044_v4, %v11706_v29  ;;  %v1061_v28 = vcombine.high %v85_v30, %v85_v30  ;;  %v9708_v40 = vcombine.high %v12067_v20, %v12078_v10  ;;  %v32_v4 = vld [vmem:[%s15055_s0] sm:$0xff]  ;;  %10678 = vmatmul.mubr.msk.f32.gmra.mrb[10].mxu0 %vm1503_vm1, %v12074_v63 }
  0x2f   :  { %15297 = vst [vmem:[#allocation63_spill] sm:$0xff] %v12081_v14  ;;  %v12097_v18 = vrot.slane %v85_v30, %v11706_v29  ;;  %v1078_v27 = vcombine.high %v86_v19, %v86_v19  ;;  %v12100_v59 = vrot.slane %v86_v19, %v11706_v29  ;;  %v12105_v33 = vcombine.low %v2273_v5, %v2280_v12  ;;  %v33_v30 = vld [vmem:[%s15055_s0 + $0x8] sm:$0xff] }
  0x30   :  { %15298 = vst [vmem:[#allocation64_spill] sm:$0xff] %v12089_v58  ;;  %v2290_v60 = vrot.slane %v9707_v51, %v11706_v29  ;;  %v12109_v17 = vrot.slane %v1061_v28, %v11706_v29  ;;  %v9709_v10 = vcombine.high %v12081_v14, %v12089_v58  ;;  %v2297_v19 = vrot.slane %v9708_v40, %v11706_v29  ;;  %v34_v40 = vld [vmem:[%s15055_s0 + $0x10] sm:$0xff] }
  0x31   :  { %15299 = vst [vmem:[#allocation65_spill] sm:$0xff] %v12097_v18  ;;  %15300 = vst [vmem:[#allocation66_spill] sm:$0xff] %v12100_v59  ;;  %v12120_v5 = vrot.slane %v1078_v27, %v11706_v29  ;;  %v1095_v12 = vcombine.high %v87_v54, %v87_v54  ;;  %v12123_v51 = vrot.slane %v87_v54, %v11706_v29  ;;  %10680 = vmatprep.mubr.msk.f32.mxu0 %vm1503_vm1, %v12105_v33 }
  0x32   :  { %15301 = vst [vmem:[#allocation67_spill] sm:$0xff] %v12105_v33  ;;  %15302 = vst [vmem:[#allocation68_spill] sm:$0xff] %v12109_v17  ;;  %v9710_v28 = vcombine.high %v12097_v18, %v12109_v17  ;;  %v2307_v58 = vrot.slane %v9709_v10, %v11706_v29  ;;  %v160_v14 = vcombine.high %v32_v4, %v32_v4 }
  0x33   :  { %15303 = vst [vmem:[#allocation69_spill] sm:$0xff] %v12120_v5  ;;  %15304 = vst [vmem:[#allocation70_spill] sm:$0xff] %v12123_v51  ;;  %v12131_v63 = vrot.slane %v32_v4, %v11706_v29  ;;  %v12136_v27 = vcombine.low %v2290_v60, %v2297_v19  ;;  %v12139_v54 = vrot.slane %v1095_v12, %v11706_v29  ;;  %v12155_v60 = vld [vmem:[%s15055_s0 + $0x18] sm:$0xff]  ;;  %v40_v19 = vld [vmem:[%s15055_s0 + $0x40] sm:$0xff] }
  0x34   :  { %v9711_v33 = vcombine.high %v12100_v59, %v12120_v5  ;;  %v177_v20 = vcombine.high %v33_v30, %v33_v30  ;;  %v2314_v17 = vrot.slane %v9710_v28, %v11706_v29  ;;  %v12145_v10 = vrot.slane %v160_v14, %v11706_v29 }
  0x35   :  { %15305 = vst [vmem:[#allocation71_spill] sm:$0xff] %v12131_v63  ;;  %15306 = vst [vmem:[#allocation72_spill] sm:$0xff] %v12136_v27  ;;  %v175_v4 = vcombine.high %v12131_v63, %v12131_v63  ;;  %v12150_v18 = vrot.slane %v33_v30, %v11706_v29  ;;  %10681 = vmatmul.mubr.msk.f32.gmra.mrb[12].mxu0 %vm1503_vm1, %v12136_v27  ;;  %v9712_v14 = vcombine.high %v12123_v51, %v12139_v54  ;;  %v15311_v59 = vmov 0.0   ;;  %v41_v27 = vld [vmem:[%s15055_s0 + $0x48] sm:$0xff] }
  0x36   :  { %15307 = vst [vmem:[#allocation73_spill] sm:$0xff] %v12139_v54  ;;  %v2324_v12 = vrot.slane %v9711_v33, %v11706_v29  ;;  %v12166_v30 = vrot.slane %v177_v20, %v11706_v29  ;;  %v194_v28 = vcombine.high %v34_v40, %v34_v40  ;;  %v12168_v5 = vcombine.low %v2307_v58, %v2314_v17 }
  0x37   :  { %15308 = vst [vmem:[#allocation74_spill] sm:$0xff] %v12150_v18  ;;  %v2529_v39 = vcombine.low %v15311_v59, %v175_v4  ;;  %v9730_v7 = vcombine.high %v12145_v10, %v12150_v18  ;;  %v12174_v36 = vrot.slane %v34_v40, %v11706_v29  ;;  %v2331_v33 = vrot.slane %v9712_v14, %v11706_v29 }
  0x38   :  { %15309 = vst [vmem:[#allocation75_spill] sm:$0xff] %v12166_v30  ;;  %15310 = vst [vmem:[#allocation76_spill] sm:$0xff] %v12168_v5  ;;  %v12181_v20 = vrot.slane %v194_v28, %v11706_v29  ;;  %v12185_v17 = vrot.slane %v12155_v60, %v11706_v29  ;;  %v296_v58 = vcombine.high %v40_v19, %v40_v19  ;;  %10683 = vmatprep.mubr.msk.f32.mxu0 %vm1503_vm1, %v12168_v5  ;;  %v42_v28 = vld [vmem:[%s15055_s0 + $0x50] sm:$0xff] }
  0x39   :  { %v2537_v40 = vrot.slane %v2529_v39, %v11706_v29  ;;  %v2544_v4 = vrot.slane %v9730_v7, %v11706_v29  ;;  %v9731_v54 = vcombine.high %v12166_v30, %v12174_v36  ;;  %v12194_v14 = vrot.slane %v40_v19, %v11706_v29  ;;  %v12212_v39 = vld [vmem:[%s15055_s0 + $0x58] sm:$0xff]  ;;  %v48_v19 = vld [vmem:[%s15055_s0 + $0x80] sm:$0xff] }
  0x3a   :  { %v12199_v51 = vcombine.low %v2324_v12, %v2331_v33  ;;  %v9732_v61 = vcombine.high %v12181_v20, %v12185_v17  ;;  %v12204_v5 = vrot.slane %v296_v58, %v11706_v29  ;;  %v12207_v7 = vrot.slane %v41_v27, %v11706_v29 }
  0x3b   :  { %v2545_v12 = vcombine.low %v2537_v40, %v2544_v4  ;;  %v2554_v33 = vrot.slane %v9731_v54, %v11706_v29  ;;  %v311_v52 = vcombine.high %v12194_v14, %v12194_v14  ;;  %v313_v58 = vcombine.high %v41_v27, %v41_v27  ;;  %v49_v54 = vld [vmem:[%s15055_s0 + $0x88] sm:$0xff] }
  0x3c   :  { %15312 = vst [vmem:[#allocation77_spill] sm:$0xff] %v12199_v51  ;;  %10684 = vmatmul.mubr.msk.f32.gmra.mrb[14].mxu0 %vm1503_vm1, %v12199_v51  ;;  %v2561_v56 = vrot.slane %v9732_v61, %v11706_v29  ;;  %v9733_v37 = vcombine.high %v12204_v5, %v12207_v7  ;;  %v330_v0 = vcombine.high %v42_v28, %v42_v28 }
  0x3d   :  { %v12226_v35 = vrot.slane %v42_v28, %v11706_v29  ;;  %10688 = vmatprep.mubr.msk.f32.mxu0 %vm1503_vm1, %v2545_v12  ;;  %v2563_v27 = vcombine.low %v15311_v59, %v311_v52  ;;  %v12234_v40 = vrot.slane %v313_v58, %v11706_v29  ;;  %v12238_v61 = vrot.slane %v12212_v39, %v11706_v29  ;;  %v50_v28 = vld [vmem:[%s15055_s0 + $0x90] sm:$0xff] }
  0x3e   :  { %v432_v4 = vcombine.high %v48_v19, %v48_v19  ;;  %v2562_v51 = vcombine.low %v2554_v33, %v2561_v56  ;;  %v2578_v53 = vrot.slane %v9733_v37, %v11706_v29  ;;  %v12245_v38 = vrot.slane %v330_v0, %v11706_v29  ;;  %v12267_v37 = vld [vmem:[%s15055_s0 + $0x98] sm:$0xff] }
  0x3f   :  { %v12248_v52 = vrot.slane %v48_v19, %v11706_v29  ;;  %v2571_v12 = vrot.slane %v2563_v27, %v11706_v29  ;;  %v9734_v58 = vcombine.high %v12234_v40, %v12226_v35  ;;  %v12257_v55 = vrot.slane %v49_v54, %v11706_v29  ;;  %v56_v27 = vld [vmem:[%s15055_s0 + $0xc0] sm:$0xff] }
  0x40   :  { %v12254_v47 = vrot.slane %v432_v4, %v11706_v29  ;;  %10689 = vmatmul.mubr.msk.f32.vlgmr.msra.gmra.mrb[0].mxu0 %vm1503_vm1, %v2562_v51  ;;  %v9735_v0 = vcombine.high %v12245_v38, %v12238_v61  ;;  %v449_v19 = vcombine.high %v49_v54, %v49_v54  ;;  %v466_v33 = vcombine.high %v50_v28, %v50_v28  ;;  %v57_v54 = vld [vmem:[%s15055_s0 + $0xc8] sm:$0xff] }
  0x41   :  { %v447_v56 = vcombine.high %v12248_v52, %v12248_v52  ;;  %v15313_v4 = vrot.slane %v11663_v6, 4  ;;  %v2579_v51 = vcombine.low %v2571_v12, %v2578_v53  ;;  %v2588_v45 = vrot.slane %v9734_v58, %v11706_v29 }
  0x42   :  { %v9736_v46 = vcombine.high %v12254_v47, %v12257_v55  ;;  %v12279_v50 = vrot.slane %v50_v28, %v11706_v29  ;;  %v2595_v43 = vrot.slane %v9735_v0, %v11706_v29  ;;  %v12287_v41 = vrot.slane %v449_v19, %v11706_v29  ;;  %v58_v0 = vld [vmem:[%s15055_s0 + $0xd0] sm:$0xff] }
  0x43   :  { %10713 = vmatpush3.msk.msra.mxu0 %vm1534_vm0, %v15313_v4  ;;  %v2597_v44 = vcombine.low %v15311_v59, %v447_v56  ;;  %v12290_v53 = vrot.slane %v466_v33, %v11706_v29  ;;  %10691 = vmatprep.mubr.msk.f32.mxu0 %vm1503_vm1, %v2579_v51  ;;  %v12296_v28 = vrot.slane %v12267_v37, %v11706_v29 }
  0x44   :  { %15314 = vst [vmem:[#allocation78_spill] sm:$0xff] %v12279_v50  ;;  %v2612_v12 = vrot.slane %v9736_v46, %v11706_v29  ;;  %v568_v58 = vcombine.high %v56_v27, %v56_v27  ;;  %v12299_v4 = vrot.slane %v56_v27, %v11706_v29  ;;  %v2596_v56 = vcombine.low %v2588_v45, %v2595_v43  ;;  %v12320_v43 = vld [vmem:[%s15055_s0 + $0xd8] sm:$0xff]  ;;  %v64_v45 = vld [vmem:[%s15055_s0 + $0x100] sm:$0xff] }
  0x45   :  { %15315 = vst [vmem:[#allocation79_spill] sm:$0xff] %v12290_v53  ;;  %v2605_v19 = vrot.slane %v2597_v44, %v11706_v29  ;;  %v9737_v33 = vcombine.high %v12287_v41, %v12279_v50  ;;  %v12308_v46 = vrot.slane %v57_v54, %v11706_v29  ;;  %v9738_v51 = vcombine.high %v12290_v53, %v12296_v28 }
  0x46   :  { %15316 = vst [vmem:[#allocation80_spill] sm:$0xff] %v12299_v4  ;;  %v12313_v42 = vrot.slane %v568_v58, %v11706_v29  ;;  %v583_v27 = vcombine.high %v12299_v4, %v12299_v4  ;;  %v585_v44 = vcombine.high %v57_v54, %v57_v54  ;;  %10692 = vmatmul.mubr.msk.f32.gmra.mrb[2].mxu0 %vm1503_vm1, %v2596_v56 }
  0x47   :  { %v2613_v23 = vcombine.low %v2605_v19, %v2612_v12  ;;  %v2622_v24 = vrot.slane %v9737_v33, %v11706_v29  ;;  %v602_v58 = vcombine.high %v58_v0, %v58_v0  ;;  %v12328_v1 = vrot.slane %v58_v0, %v11706_v29  ;;  %v65_v12 = vld [vmem:[%s15055_s0 + $0x108] sm:$0xff] }
  0x48   :  { %v2629_v8 = vrot.slane %v9738_v51, %v11706_v29  ;;  %v2631_v34 = vcombine.low %v15311_v59, %v583_v27  ;;  %v9739_v54 = vcombine.high %v12313_v42, %v12308_v46  ;;  %v12335_v62 = vrot.slane %v585_v44, %v11706_v29  ;;  %v66_v51 = vld [vmem:[%s15055_s0 + $0x110] sm:$0xff] }
  0x49   :  { %10694 = vmatprep.mubr.msk.f32.mxu0 %vm1503_vm1, %v2613_v23  ;;  %v12342_v56 = vrot.slane %v602_v58, %v11706_v29  ;;  %v12346_v0 = vrot.slane %v12320_v43, %v11706_v29  ;;  %v704_v19 = vcombine.high %v64_v45, %v64_v45  ;;  %v12349_v33 = vrot.slane %v64_v45, %v11706_v29 }
  0x4a   :  { %v2630_v27 = vcombine.low %v2622_v24, %v2629_v8  ;;  %v2639_v44 = vrot.slane %v2631_v34, %v11706_v29  ;;  %v2646_v23 = vrot.slane %v9739_v54, %v11706_v29  ;;  %v9740_v58 = vcombine.high %v12335_v62, %v12328_v1  ;;  %v12371_v34 = vld [vmem:[%s15055_s0 + $0x118] sm:$0xff]  ;;  %v72_v8 = vld [vmem:[%s15055_s0 + $0x140] sm:$0xff] }
  0x4b   :  { %v9741_v48 = vcombine.high %v12342_v56, %v12346_v0  ;;  %v12361_v57 = vrot.slane %v704_v19, %v11706_v29  ;;  %v719_v45 = vcombine.high %v12349_v33, %v12349_v33  ;;  %v12366_v32 = vrot.slane %v65_v12, %v11706_v29 }
  0x4c   :  { %10695 = vmatmul.mubr.msk.f32.gmra.mrb[4].mxu0 %vm1503_vm1, %v2630_v27  ;;  %v2647_v24 = vcombine.low %v2639_v44, %v2646_v23  ;;  %v2656_v54 = vrot.slane %v9740_v58, %v11706_v29  ;;  %v721_v19 = vcombine.high %v65_v12, %v65_v12  ;;  %v738_v49 = vcombine.high %v66_v51, %v66_v51 }
  0x4d   :  { %v2663_v26 = vrot.slane %v9741_v48, %v11706_v29  ;;  %v2665_v31 = vcombine.low %v15311_v59, %v719_v45  ;;  %v9742_v22 = vcombine.high %v12361_v57, %v12366_v32  ;;  %v12383_v25 = vrot.slane %v66_v51, %v11706_v29  ;;  %v74_v51 = vld [vmem:[%s15055_s0 + $0x150] sm:$0xff] }
  0x4e   :  { %10697 = vmatprep.mubr.msk.f32.mxu0 %vm1503_vm1, %v2647_v24  ;;  %v12390_v27 = vrot.slane %v721_v19, %v11706_v29  ;;  %v12393_v12 = vrot.slane %v738_v49, %v11706_v29  ;;  %v12397_v48 = vrot.slane %v12371_v34, %v11706_v29  ;;  %v840_v44 = vcombine.high %v72_v8, %v72_v8 }
  0x4f   :  { %15317 = vst [vmem:[#allocation81_spill] sm:$0xff] %v12383_v25  ;;  %v2664_v23 = vcombine.low %v2656_v54, %v2663_v26  ;;  %v2673_v58 = vrot.slane %v2665_v31, %v11706_v29  ;;  %v2680_v45 = vrot.slane %v9742_v22, %v11706_v29  ;;  %v12405_v24 = vrot.slane %v72_v8, %v11706_v29  ;;  %v12420_v26 = vld [vmem:[%s15055_s0 + $0x158] sm:$0xff] }
  0x50   :  { %15318 = vst [vmem:[#allocation82_spill] sm:$0xff] %v12393_v12  ;;  %15319 = vst [vmem:[#allocation83_spill] sm:$0xff] %v12397_v48  ;;  %v9743_v49 = vcombine.high %v12390_v27, %v12383_v25  ;;  %v9744_v19 = vcombine.high %v12393_v12, %v12397_v48  ;;  %v12412_v16 = vrot.slane %v840_v44, %v11706_v29  ;;  %v80_v44 = vld [vmem:[%s15055_s0 + $0x180] sm:$0xff] }
  0x51   :  { %15320 = vst [vmem:[#allocation84_spill] sm:$0xff] %v12405_v24  ;;  %v12415_v11 = vrot.slane %v73_v15, %v11706_v29  ;;  %15323 = vst [vmem:[#allocation87_spill] sm:$0xff] %v12420_v26  ;;  %10698 = vmatmul.mubr.msk.f32.gmra.mrb[6].mxu0 %vm1503_vm1, %v2664_v23  ;;  %v2681_v22 = vcombine.low %v2673_v58, %v2680_v45  ;;  %v855_v31 = vcombine.high %v12405_v24, %v12405_v24  ;;  %v81_v23 = vld [vmem:[%s15055_s0 + $0x188] sm:$0xff] }
  0x52   :  { %15321 = vst [vmem:[#allocation85_spill] sm:$0xff] %v12412_v16  ;;  %v857_v8 = vcombine.high %v73_v15, %v73_v15  ;;  %v874_v54 = vcombine.high %v74_v51, %v74_v51  ;;  %v2690_v13 = vrot.slane %v9743_v49, %v11706_v29  ;;  %v2697_v21 = vrot.slane %v9744_v19, %v11706_v29 }
  0x53   :  { %15322 = vst [vmem:[#allocation86_spill] sm:$0xff] %v12415_v11  ;;  %v9745_v3 = vcombine.high %v12412_v16, %v12415_v11  ;;  %v12433_v9 = vrot.slane %v74_v51, %v11706_v29  ;;  %10700 = vmatprep.mubr.msk.f32.mxu0 %vm1503_vm1, %v2681_v22  ;;  %v2699_v15 = vcombine.low %v15311_v59, %v855_v31  ;;  %v82_v51 = vld [vmem:[%s15055_s0 + $0x190] sm:$0xff] }
  0x54   :  { %v12441_v58 = vrot.slane %v857_v8, %v11706_v29  ;;  %v12444_v45 = vrot.slane %v874_v54, %v11706_v29  ;;  %v12448_v49 = vrot.slane %v12420_v26, %v11706_v29  ;;  %v2698_v19 = vcombine.low %v2690_v13, %v2697_v21  ;;  %v12474_v21 = vld [vmem:[%s15055_s0 + $0x198] sm:$0xff] }
  0x55   :  { %15324 = vst [vmem:[#allocation88_spill] sm:$0xff] %v12433_v9  ;;  %v2714_v2 = vrot.slane %v9745_v3, %v11706_v29  ;;  %v976_v22 = vcombine.high %v80_v44, %v80_v44  ;;  %v12455_v31 = vrot.slane %v80_v44, %v11706_v29  ;;  %v2707_v8 = vrot.slane %v2699_v15, %v11706_v29 }
  0x56   :  { %15325 = vst [vmem:[#allocation89_spill] sm:$0xff] %v12441_v58  ;;  %15326 = vst [vmem:[#allocation90_spill] sm:$0xff] %v12444_v45  ;;  %v9746_v54 = vcombine.high %v12441_v58, %v12433_v9  ;;  %v9747_v26 = vcombine.high %v12444_v45, %v12448_v49  ;;  %v12463_v48 = vrot.slane %v81_v23, %v11706_v29  ;;  %10701 = vmatmul.mubr.msk.f32.gmra.mrb[8].mxu0 %vm1503_vm1, %v2698_v19 }
  0x57   :  { %15327 = vst [vmem:[#allocation91_spill] sm:$0xff] %v12448_v49  ;;  %15328 = vst [vmem:[#allocation92_spill] sm:$0xff] %v12455_v31  ;;  %v12467_v13 = vrot.slane %v976_v22, %v11706_v29  ;;  %v991_v3 = vcombine.high %v12455_v31, %v12455_v31  ;;  %v993_v44 = vcombine.high %v81_v23, %v81_v23  ;;  %v88_v49 = vld [vmem:[%s15055_s0 + $0x1c0] sm:$0xff]  ;;  %v89_v31 = vld [vmem:[%s15055_s0 + $0x1c8] sm:$0xff] }
  0x58   :  { %15329 = vst [vmem:[#allocation93_spill] sm:$0xff] %v12463_v48  ;;  %15330 = vst [vmem:[#allocation94_spill] sm:$0xff] %v12474_v21  ;;  %v1010_v15 = vcombine.high %v82_v51, %v82_v51  ;;  %v2715_v9 = vcombine.low %v2707_v8, %v2714_v2  ;;  %v2724_v19 = vrot.slane %v9746_v54, %v11706_v29 }
  0x59   :  { %v2731_v22 = vrot.slane %v9747_v26, %v11706_v29  ;;  %v12482_v45 = vrot.slane %v82_v51, %v11706_v29  ;;  %v2733_v11 = vcombine.low %v15311_v59, %v991_v3  ;;  %v9748_v23 = vcombine.high %v12467_v13, %v12463_v48  ;;  %v90_v3 = vld [vmem:[%s15055_s0 + $0x1d0] sm:$0xff] }
  0x5a   :  { %v12491_v58 = vrot.slane %v993_v44, %v11706_v29  ;;  %v12494_v2 = vrot.slane %v1010_v15, %v11706_v29  ;;  %10703 = vmatprep.mubr.msk.f32.mxu0 %vm1503_vm1, %v2715_v9  ;;  %v12499_v51 = vrot.slane %v12474_v21, %v11706_v29  ;;  %v1112_v8 = vcombine.high %v88_v49, %v88_v49 }
  0x5b   :  { %15331 = vst [vmem:[#allocation95_spill] sm:$0xff] %v12482_v45  ;;  %v2732_v26 = vcombine.low %v2724_v19, %v2731_v22  ;;  %v12502_v54 = vrot.slane %v88_v49, %v11706_v29  ;;  %v2741_v44 = vrot.slane %v2733_v11, %v11706_v29  ;;  %v2748_v15 = vrot.slane %v9748_v23, %v11706_v29  ;;  %v12525_v11 = vld [vmem:[%s15055_s0 + $0x1d8] sm:$0xff] }
  0x5c   :  { %15332 = vst [vmem:[#allocation96_spill] sm:$0xff] %v12491_v58  ;;  %15333 = vst [vmem:[#allocation97_spill] sm:$0xff] %v12494_v2  ;;  %v9749_v9 = vcombine.high %v12491_v58, %v12482_v45  ;;  %v12512_v19 = vrot.slane %v89_v31, %v11706_v29  ;;  %v9750_v49 = vcombine.high %v12494_v2, %v12499_v51 }
  0x5d   :  { %15334 = vst [vmem:[#allocation98_spill] sm:$0xff] %v12499_v51  ;;  %15335 = vst [vmem:[#allocation99_spill] sm:$0xff] %v12502_v54  ;;  %10704 = vmatmul.mubr.msk.f32.gmra.mrb[10].mxu0 %vm1503_vm1, %v2732_v26  ;;  %v12518_v22 = vrot.slane %v1112_v8, %v11706_v29  ;;  %v1127_v21 = vcombine.high %v12502_v54, %v12502_v54  ;;  %v1129_v23 = vcombine.high %v89_v31, %v89_v31 }
  0x5e   :  { %15336 = vst [vmem:[#allocation100_spill] sm:$0xff] %v12512_v19  ;;  %v2749_v45 = vcombine.low %v2741_v44, %v2748_v15  ;;  %v2758_v48 = vrot.slane %v9749_v9, %v11706_v29  ;;  %v1146_v58 = vcombine.high %v90_v3, %v90_v3  ;;  %v12529_v26 = vrot.slane %v90_v3, %v11706_v29  ;;  %v12553_v15 = vld [vmem:[%s15054_s1 + $0x10] sm:$0xff] }
  0x5f   :  { %15337 = vst [vmem:[#allocation101_spill] sm:$0xff] %v12518_v22  ;;  %v2765_v51 = vrot.slane %v9750_v49, %v11706_v29  ;;  %v2767_v8 = vcombine.low %v15311_v59, %v1127_v21  ;;  %v9751_v54 = vcombine.high %v12518_v22, %v12512_v19  ;;  %v12536_v2 = vrot.slane %v1129_v23, %v11706_v29 }
  0x60   :  { %15338 = vst [vmem:[#allocation102_spill] sm:$0xff] %v12529_v26  ;;  %10706 = vmatprep.mubr.msk.f32.mxu0 %vm1503_vm1, %v2749_v45  ;;  %v12540_v31 = vrot.slane %v1146_v58, %v11706_v29  ;;  %v12544_v44 = vrot.slane %v12525_v11, %v11706_v29  ;;  %v2997_v3 = vcombine.low %v12131_v63, %v12145_v10  ;;  %15341 = vst [vmem:[#allocation105_spill] sm:$0xff] %v12553_v15 }
  0x61   :  { %15339 = vst [vmem:[#allocation103_spill] sm:$0xff] %v12536_v2  ;;  %v2998_v21 = vcombine.low %v12150_v18, %v12166_v30  ;;  %v2766_v9 = vcombine.low %v2758_v48, %v2765_v51  ;;  %v2775_v45 = vrot.slane %v2767_v8, %v11706_v29  ;;  %v2782_v58 = vrot.slane %v9751_v54, %v11706_v29 }
  0x62   :  { %15340 = vst [vmem:[#allocation104_spill] sm:$0xff] %v12544_v44  ;;  %v9752_v49 = vcombine.high %v12536_v2, %v12529_v26  ;;  %v9753_v23 = vcombine.high %v12540_v31, %v12544_v44  ;;  %v3005_v59 = vrot.slane %v2997_v3, %v11706_v29  ;;  %v3739_v51 = vrot.slane %v11663_v6, 7 }
  0x63   :  { %v3012_v18 = vrot.slane %v2998_v21, %v11706_v29  ;;  %10707 = vmatmul.mubr.msk.f32.gmra.mrb[12].mxu0 %vm1503_vm1, %v2766_v9  ;;  %v2783_v30 = vcombine.low %v2775_v45, %v2782_v58  ;;  %v3740_v54 = vrot.slane %v12553_v15, 7  ;;  %v211_v44 = vcombine.high %v12155_v60, %v12155_v60 }
  0x64   :  { %v2792_v48 = vrot.slane %v9752_v49, %v11706_v29  ;;  %v2799_v8 = vrot.slane %v9753_v23, %v11706_v29  ;;  %v3014_v3 = vcombine.low %v12174_v36, %v12181_v20  ;;  %v3031_v9 = vcombine.low %v12194_v14, %v12204_v5 }
  0x65   :  { %v3013_v63 = vcombine.low %v3005_v59, %v3012_v18  ;;  %10709 = vmatprep.mubr.msk.f32.mxu0 %vm1503_vm1, %v2783_v30  ;;  %v3741_v21 = vsel %vm3738_vm3, %v3739_v51, %v3740_v54  ;;  %v3032_v6 = vcombine.low %v12207_v7, %v12234_v40  ;;  %v347_v45 = vcombine.high %v12212_v39, %v12212_v39 }
  0x66   :  { %v2800_v58 = vcombine.low %v2792_v48, %v2799_v8  ;;  %10738 = vmatprep.subr.msk.mxu0 %vm1534_vm0, %v3741_v21  ;;  %v12581_v18 = vrot.slane %v211_v44, %v11706_v29  ;;  %v3022_v59 = vrot.slane %v3014_v3, %v11706_v29  ;;  %v3048_v60 = vcombine.low %v12226_v35, %v12245_v38 }
  0x67   :  { %v3039_v30 = vrot.slane %v3031_v9, %v11706_v29  ;;  %v3046_v49 = vrot.slane %v3032_v6, %v11706_v29  ;;  %v12589_v23 = vrot.slane %v347_v45, %v11706_v29  ;;  %v3065_v39 = vcombine.low %v12248_v52, %v12254_v47 }
  0x68   :  { %10710 = vmatmul.mubr.msk.f32.gmra.mrb[14].mxu0 %vm1503_vm1, %v2800_v58  ;;  %v3015_v44 = vcombine.low %v12185_v17, %v12581_v18  ;;  %v3056_v48 = vrot.slane %v3048_v60, %v11706_v29  ;;  %v3066_v51 = vcombine.low %v12257_v55, %v12287_v41  ;;  %v483_v54 = vcombine.high %v12267_v37, %v12267_v37 }
  0x69   :  { %10714 = vmatprep.mubr.msk.f32.mxu0 %vm1503_vm1, %v3013_v63  ;;  %v3047_v8 = vcombine.low %v3039_v30, %v3046_v49  ;;  %v3049_v3 = vcombine.low %v12238_v61, %v12589_v23  ;;  %v3073_v9 = vrot.slane %v3065_v39, %v11706_v29  ;;  %v3082_v6 = vcombine.low %v12279_v50, %v12290_v53 }
  0x6a   :  { %v3029_v45 = vrot.slane %v3015_v44, %v11706_v29  ;;  %v3080_v58 = vrot.slane %v3066_v51, %v11706_v29  ;;  %v12610_v60 = vrot.slane %v483_v54, %v11706_v29  ;;  %v3099_v37 = vcombine.low %v12299_v4, %v12313_v42 }
  0x6b   :  { %v3063_v63 = vrot.slane %v3049_v3, %v11706_v29  ;;  %v3090_v30 = vrot.slane %v3082_v6, %v11706_v29  ;;  %v3100_v49 = vcombine.low %v12308_v46, %v12335_v62  ;;  %v619_v39 = vcombine.high %v12320_v43, %v12320_v43 }
  0x6c   :  { %v3030_v50 = vcombine.low %v3022_v59, %v3029_v45  ;;  %v3081_v44 = vcombine.low %v3073_v9, %v3080_v58  ;;  %v3083_v51 = vcombine.low %v12296_v28, %v12610_v60  ;;  %v3107_v54 = vrot.slane %v3099_v37, %v11706_v29 }
  0x6d   :  { %v3064_v53 = vcombine.low %v3056_v48, %v3063_v63  ;;  %v3114_v4 = vrot.slane %v3100_v49, %v11706_v29  ;;  %v12625_v3 = vrot.slane %v619_v39, %v11706_v29  ;;  %v3116_v6 = vcombine.low %v12328_v1, %v12342_v56 }
  0x6e   :  { %10715 = vmatmul.mubr.msk.f32.vlgmr.msra.gmra.mrb[0].mxu0 %vm1503_vm1, %v3030_v50  ;;  %v3097_v43 = vrot.slane %v3083_v51, %v11706_v29  ;;  %v3133_v59 = vcombine.low %v12349_v33, %v12361_v57  ;;  %v3134_v9 = vcombine.low %v12366_v32, %v12390_v27  ;;  %v755_v48 = vcombine.high %v12371_v34, %v12371_v34 }
  0x6f   :  { %10739 = vmatpush3.msk.msra.mxu0 %vm1534_vm0, %v3741_v21  ;;  %10717 = vmatprep.mubr.msk.f32.mxu0 %vm1503_vm1, %v3047_v8  ;;  %v3115_v45 = vcombine.low %v3107_v54, %v3114_v4  ;;  %v3117_v58 = vcombine.low %v12346_v0, %v12625_v3  ;;  %v3124_v50 = vrot.slane %v3116_v6, %v11706_v29  ;;  %v15225_v37 = vrot.slane %v12553_v15, 2  ;;  %v15342_v8 = vld [vmem:[#allocation89_spill] sm:$0xff]  ;;  %v15343_v54 = vld [vmem:[#allocation86_spill] sm:$0xff] }
  0x70   :  { %v3098_v63 = vcombine.low %v3090_v30, %v3097_v43  ;;  %v3141_v49 = vrot.slane %v3133_v59, %v11706_v29  ;;  %v3148_v39 = vrot.slane %v3134_v9, %v11706_v29  ;;  %v12646_v51 = vrot.slane %v755_v48, %v11706_v29  ;;  %v15344_v43 = vld [vmem:[#allocation83_spill] sm:$0xff] }
  0x71   :  { %v3131_v34 = vrot.slane %v3117_v58, %v11706_v29  ;;  %v3150_v4 = vcombine.low %v12383_v25, %v12393_v12  ;;  %v3167_v21 = vcombine.low %v12405_v24, %v12412_v16  ;;  %v3168_v6 = vcombine.low %v15343_v54, %v15342_v8  ;;  %10764 = vmatprep.subr.msk.mxu0 %vm1534_vm0, %v15225_v37  ;;  %v15345_v9 = vld [vmem:[#allocation87_spill] sm:$0xff]  ;;  %v15346_v58 = vld [vmem:[#allocation90_spill] sm:$0xff]  ;;  %v15347_v25 = vld [vmem:[#allocation88_spill] sm:$0xff] }
  0x72   :  { %10718 = vmatmul.mubr.msk.f32.gmra.mrb[2].mxu0 %vm1503_vm1, %v3064_v53  ;;  %v3149_v30 = vcombine.low %v3141_v49, %v3148_v39  ;;  %v3151_v59 = vcombine.low %v15344_v43, %v12646_v51  ;;  %v891_v48 = vcombine.high %v15345_v9, %v15345_v9  ;;  %v3184_v12 = vcombine.low %v15347_v25, %v15346_v58  ;;  %v15348_v9 = vld [vmem:[#allocation92_spill] sm:$0xff]  ;;  %v15353_v16 = vld [vmem:[#allocation95_spill] sm:$0xff] }
  0x73   :  { %10720 = vmatprep.mubr.msk.f32.mxu0 %vm1503_vm1, %v3081_v44  ;;  %v3132_v24 = vcombine.low %v3124_v50, %v3131_v34  ;;  %v3158_v54 = vrot.slane %v3150_v4, %v11706_v29  ;;  %v3175_v15 = vrot.slane %v3167_v21, %v11706_v29  ;;  %v3182_v37 = vrot.slane %v3168_v6, %v11706_v29  ;;  %v15349_v58 = vld [vmem:[#allocation96_spill] sm:$0xff]  ;;  %v15350_v44 = vld [vmem:[#allocation93_spill] sm:$0xff]  ;;  %v15351_v34 = vld [vmem:[#allocation94_spill] sm:$0xff] }
  0x74   :  { %v3165_v53 = vrot.slane %v3151_v59, %v11706_v29  ;;  %v12671_v49 = vrot.slane %v891_v48, %v11706_v29  ;;  %v3192_v39 = vrot.slane %v3184_v12, %v11706_v29  ;;  %v3201_v8 = vcombine.low %v15348_v9, %v12467_v13  ;;  %v15352_v21 = vld [vmem:[#allocation97_spill] sm:$0xff]  ;;  %v15354_v48 = vld [vmem:[#allocation91_spill] sm:$0xff] }
  0x75   :  { %v3183_v25 = vcombine.low %v3175_v15, %v3182_v37  ;;  %v3202_v50 = vcombine.low %v15350_v44, %v15349_v58  ;;  %v1027_v4 = vcombine.high %v15351_v34, %v15351_v34  ;;  %v3218_v6 = vcombine.low %v15353_v16, %v15352_v21  ;;  %v15355_v9 = vld [vmem:[#allocation99_spill] sm:$0xff] }
  0x76   :  { %10721 = vmatmul.mubr.msk.f32.gmra.mrb[4].mxu0 %vm1503_vm1, %v3098_v63  ;;  %v3166_v59 = vcombine.low %v3158_v54, %v3165_v53  ;;  %v3185_v43 = vcombine.low %v15354_v48, %v12671_v49  ;;  %v3209_v12 = vrot.slane %v3201_v8, %v11706_v29  ;;  %v3235_v15 = vcombine.low %v15355_v9, %v12518_v22  ;;  %v15357_v22 = vld [vmem:[#allocation71_spill] sm:$0xff] }
  0x77   :  { %10723 = vmatprep.mubr.msk.f32.mxu0 %vm1503_vm1, %v3115_v45  ;;  %v3216_v37 = vrot.slane %v3202_v50, %v11706_v29  ;;  %v12691_v34 = vrot.slane %v1027_v4, %v11706_v29  ;;  %v12694_v16 = vrot.slane %v3218_v6, %v11706_v29  ;;  %v3236_v63 = vcombine.low %v12512_v19, %v12536_v2  ;;  %v15356_v4 = vld [vmem:[#allocation98_spill] sm:$0xff]  ;;  %v15358_v2 = vld [vmem:[#allocation75_spill] sm:$0xff] }
  0x78   :  { %v3199_v54 = vrot.slane %v3185_v43, %v11706_v29  ;;  %v12700_v8 = vrot.slane %v3235_v15, %v11706_v29  ;;  %v1163_v53 = vcombine.high %v12525_v11, %v12525_v11  ;;  %v3252_v45 = vcombine.low %v12529_v26, %v12540_v31  ;;  %v15359_v26 = vld [vmem:[#allocation74_spill] sm:$0xff] }
  0x79   :  { %v3217_v50 = vcombine.low %v3209_v12, %v3216_v37  ;;  %v3219_v9 = vcombine.low %v15356_v4, %v12691_v34  ;;  %v3250_v6 = vrot.slane %v3236_v63, %v11706_v29  ;;  %v9788_v19 = vcombine.high %v15357_v22, %v12145_v10  ;;  %v15360_v22 = vld [vmem:[#allocation104_spill] sm:$0xff] }
  0x7a   :  { %10724 = vmatmul.mubr.msk.f32.gmra.mrb[6].mxu0 %vm1503_vm1, %v3132_v24  ;;  %v3200_v43 = vcombine.low %v3192_v39, %v3199_v54  ;;  %v12713_v15 = vrot.slane %v1163_v53, %v11706_v29  ;;  %v12716_v11 = vrot.slane %v3252_v45, %v11706_v29  ;;  %v9789_v12 = vcombine.high %v15359_v26, %v15358_v2 }
  0x7b   :  { %10726 = vmatprep.mubr.msk.f32.mxu0 %vm1503_vm1, %v3149_v30  ;;  %v3233_v37 = vrot.slane %v3219_v9, %v11706_v29  ;;  %v3251_v63 = vcombine.low %v12700_v8, %v3250_v6  ;;  %v12724_v10 = vrot.slane %v9788_v19, %v11706_v29  ;;  %v9790_v24 = vcombine.high %v12174_v36, %v12181_v20  ;;  %v15362_v8 = vld [vmem:[#allocation78_spill] sm:$0xff] }
  0x7c   :  { %v3253_v39 = vcombine.low %v15360_v22, %v12713_v15  ;;  %v12731_v54 = vrot.slane %v9789_v12, %v11706_v29  ;;  %v9791_v2 = vcombine.high %v12185_v17, %v12581_v18  ;;  %v9792_v26 = vcombine.high %v12194_v14, %v12204_v5 }
  0x7d   :  { %v3234_v30 = vcombine.low %v12694_v16, %v3233_v37  ;;  %v12739_v19 = vrot.slane %v9790_v24, %v11706_v29  ;;  %v9793_v36 = vcombine.high %v12207_v7, %v12234_v40  ;;  %v9794_v20 = vcombine.high %v12226_v35, %v12245_v38 }
  0x7e   :  { %10727 = vmatmul.mubr.msk.f32.gmra.mrb[8].mxu0 %vm1503_vm1, %v3166_v59  ;;  %v3267_v9 = vrot.slane %v3253_v39, %v11706_v29  ;;  %v3481_v17 = vcombine.low %v12724_v10, %v12731_v54  ;;  %v12750_v5 = vrot.slane %v9791_v2, %v11706_v29  ;;  %v12753_v16 = vrot.slane %v9792_v26, %v11706_v29  ;;  %v15361_v59 = vld [vmem:[#allocation79_spill] sm:$0xff]  ;;  %v15368_v26 = vld [vmem:[#allocation84_spill] sm:$0xff] }
  0x7f   :  { %10729 = vmatprep.mubr.msk.f32.mxu0 %vm1503_vm1, %v3183_v25  ;;  %v12757_v14 = vrot.slane %v9793_v36, %v11706_v29  ;;  %v9795_v38 = vcombine.high %v12238_v61, %v12589_v23  ;;  %v12762_v35 = vrot.slane %v9794_v20, %v11706_v29  ;;  %v9796_v7 = vcombine.high %v12248_v52, %v12254_v47  ;;  %v15366_v39 = vld [vmem:[#allocation83_spill] sm:$0xff]  ;;  %v15370_v36 = vld [vmem:[#allocation86_spill] sm:$0xff] }
  0x80   :  { %v3268_v40 = vcombine.low %v12716_v11, %v3267_v9  ;;  %v3498_v18 = vcombine.low %v12739_v19, %v12750_v5  ;;  %v9797_v25 = vcombine.high %v12257_v55, %v12287_v41  ;;  %v9798_v53 = vcombine.high %v15362_v8, %v15361_v59  ;;  %v15363_v55 = vld [vmem:[#allocation80_spill] sm:$0xff]  ;;  %v15369_v19 = vld [vmem:[#allocation89_spill] sm:$0xff] }
  0x81   :  { %v3515_v61 = vcombine.low %v12753_v16, %v12757_v14  ;;  %v12776_v23 = vrot.slane %v9795_v38, %v11706_v29  ;;  %v12779_v45 = vrot.slane %v9796_v7, %v11706_v29  ;;  %v9799_v47 = vcombine.high %v12296_v28, %v12610_v60  ;;  %v15382_v16 = vld [vmem:[#allocation11_spill] sm:$0xff] }
  0x82   :  { %10730 = vmatmul.mubr.msk.f32.gmra.mrb[10].mxu0 %vm1503_vm1, %v3200_v43  ;;  %v12785_v52 = vrot.slane %v9797_v25, %v11706_v29  ;;  %v12788_v41 = vrot.slane %v9798_v53, %v11706_v29  ;;  %v9800_v6 = vcombine.high %v15363_v55, %v12313_v42  ;;  %v9801_v11 = vcombine.high %v12308_v46, %v12335_v62  ;;  %v15373_v53 = vld [vmem:[#allocation92_spill] sm:$0xff]  ;;  %v15404_v25 = vld [vmem:[#allocation39_spill] sm:$0xff] }
  0x83   :  { %10732 = vmatprep.mubr.msk.f32.mxu0 %vm1503_vm1, %v3217_v50  ;;  %v3532_v12 = vcombine.low %v12762_v35, %v12776_v23  ;;  %v12798_v28 = vrot.slane %v9799_v47, %v11706_v29  ;;  %v9802_v60 = vcombine.high %v12328_v1, %v12342_v56  ;;  %v9803_v43 = vcombine.high %v12346_v0, %v12625_v3  ;;  %v15393_v23 = vld [vmem:[#allocation27_spill] sm:$0xff]  ;;  %v15403_v55 = vld [vmem:[#allocation40_spill] sm:$0xff] }
  0x84   :  { %v3549_v42 = vcombine.low %v12779_v45, %v12785_v52  ;;  %v12807_v37 = vrot.slane %v9800_v6, %v11706_v29  ;;  %v12810_v62 = vrot.slane %v9801_v11, %v11706_v29  ;;  %v9804_v46 = vcombine.high %v12349_v33, %v12361_v57  ;;  %v15364_v57 = vld [vmem:[#allocation82_spill] sm:$0xff]  ;;  %v15365_v33 = vld [vmem:[#allocation81_spill] sm:$0xff] }
  0x85   :  { %v3566_v50 = vcombine.low %v12788_v41, %v12798_v28  ;;  %v12817_v1 = vrot.slane %v9802_v60, %v11706_v29  ;;  %v12820_v56 = vrot.slane %v9803_v43, %v11706_v29  ;;  %v9805_v0 = vcombine.high %v12366_v32, %v12390_v27  ;;  %v15367_v27 = vld [vmem:[#allocation85_spill] sm:$0xff] }
  0x86   :  { %10733 = vmatmul.mubr.msk.f32.gmra.mrb[12].mxu0 %vm1503_vm1, %v3234_v30  ;;  %v3583_v3 = vcombine.low %v12807_v37, %v12810_v62  ;;  %v12828_v10 = vrot.slane %v9804_v46, %v11706_v29  ;;  %v9806_v24 = vcombine.high %v15365_v33, %v15364_v57  ;;  %v9807_v54 = vcombine.high %v15366_v39, %v12646_v51  ;;  %v15371_v51 = vld [vmem:[#allocation90_spill] sm:$0xff]  ;;  %v15377_v57 = vld [vmem:[#allocation103_spill] sm:$0xff]  ;;  %v15378_v33 = vld [vmem:[#allocation100_spill] sm:$0xff] }
  0x87   :  { %10735 = vmatprep.mubr.msk.f32.mxu0 %vm1503_vm1, %v3251_v63  ;;  %v12838_v32 = vrot.slane %v9805_v0, %v11706_v29  ;;  %v9808_v30 = vcombine.high %v15368_v26, %v15367_v27  ;;  %v9809_v20 = vcombine.high %v15370_v36, %v15369_v19  ;;  %v15372_v63 = vld [vmem:[#allocation88_spill] sm:$0xff]  ;;  %v9811_v7 = vcombine.high %v15354_v48, %v12671_v49  ;;  %v15380_v19 = vld [vmem:[#allocation105_spill] sm:$0xff]  ;;  %v15400_v46 = vld [vmem:[#allocation34_spill] sm:$0xff] }
  0x88   :  { %v12845_v9 = vrot.slane %v9806_v24, %v11706_v29  ;;  %v12848_v5 = vrot.slane %v9807_v54, %v11706_v29  ;;  %v9810_v38 = vcombine.high %v15372_v63, %v15371_v51  ;;  %v9812_v47 = vcombine.high %v15373_v53, %v12467_v13  ;;  %v15398_v52 = vld [vmem:[#allocation9_spill] sm:$0xff]  ;;  %v15399_v27 = vld [vmem:[#allocation36_spill] sm:$0xff]  ;;  %v15405_v62 = vld [vmem:[#allocation3_spill] sm:$0xff] }
  0x89   :  { %v12857_v59 = vrot.slane %v9808_v30, %v11706_v29  ;;  %v12860_v8 = vrot.slane %v9809_v20, %v11706_v29  ;;  %v12871_v49 = vrot.slane %v9811_v7, %v11706_v29  ;;  %v9813_v48 = vcombine.high %v15350_v44, %v15349_v58  ;;  %v15375_v58 = vld [vmem:[#allocation101_spill] sm:$0xff]  ;;  %v15376_v44 = vld [vmem:[#allocation99_spill] sm:$0xff]  ;;  %v15384_v7 = vld [vmem:[#allocation12_spill] sm:$0xff] }
  0x8a   :  { %10736 = vmatmul.mubr.msk.f32.gmra.mrb[14].mxu0 %vm1503_vm1, %v3268_v40  ;;  %v12868_v6 = vrot.slane %v9810_v38, %v11706_v29  ;;  %v12879_v13 = vrot.slane %v9812_v47, %v11706_v29  ;;  %v15374_v40 = vld [vmem:[#allocation95_spill] sm:$0xff]  ;;  %v9815_v43 = vcombine.high %v15356_v4, %v12691_v34  ;;  %v9817_v24 = vcombine.high %v15378_v33, %v15377_v57  ;;  %v15379_v34 = vld [vmem:[#allocation102_spill] sm:$0xff]  ;;  %v15390_v57 = vld [vmem:[#allocation20_spill] sm:$0xff] }
  0x8b   :  { %10740 = vmatprep.mubr.msk.f32.mxu0 %vm1503_vm1, %v3481_v17  ;;  %v9814_v60 = vcombine.high %v15374_v40, %v15352_v21  ;;  %v12888_v0 = vrot.slane %v9813_v48, %v11706_v29  ;;  %v9816_v17 = vcombine.high %v15376_v44, %v15375_v58  ;;  %v9818_v4 = vcombine.high %v15379_v34, %v12540_v31  ;;  %v15383_v38 = vld [vmem:[#allocation15_spill] sm:$0xff]  ;;  %v15388_v58 = vld [vmem:[#allocation17_spill] sm:$0xff] }
  0x8c   :  { %v12898_v21 = vrot.slane %v9815_v43, %v11706_v29  ;;  %v9819_v54 = vcombine.high %v15360_v22, %v12713_v15  ;;  %v12911_v30 = vrot.slane %v9817_v24, %v11706_v29  ;;  %v15231_v36 = vrot.slane %v15380_v19, 5  ;;  %v15385_v47 = vld [vmem:[#allocation23_spill] sm:$0xff]  ;;  %v15387_v43 = vld [vmem:[#allocation18_spill] sm:$0xff]  ;;  %v15391_v34 = vld [vmem:[#allocation25_spill] sm:$0xff] }
  0x8d   :  { %v12895_v39 = vrot.slane %v9814_v60, %v11706_v29  ;;  %v12908_v26 = vrot.slane %v9816_v17, %v11706_v29  ;;  %v15381_v20 = vrot.slane %v15380_v19, 2  ;;  %v12924_v15 = vrot.slane %v9818_v4, %v11706_v29  ;;  %v15389_v17 = vld [vmem:[#allocation21_spill] sm:$0xff]  ;;  %v15392_v4 = vld [vmem:[#allocation24_spill] sm:$0xff] }
  0x8e   :  { %10741 = vmatmul.mubr.msk.f32.vlgmr.msra.gmra.mrb[0].mxu0 %vm1503_vm1, %v3498_v18  ;;  %v12927_v22 = vrot.slane %v9819_v54, %v11706_v29  ;;  %v11602_v18 = vld [vmem:[%s15054_s1] sm:$0xff]  ;;  %v379_v14 = vcombine.high %v15382_v16, %v15382_v16  ;;  %v9650_v53 = vcombine.high %v15384_v7, %v15383_v38  ;;  %v515_v48 = vcombine.high %v15385_v47, %v15385_v47 }
  0x8f   :  { %10765 = vmatpush3.msk.msra.mxu0 %vm1534_vm0, %v15381_v20  ;;  %10743 = vmatprep.mubr.msk.f32.mxu0 %vm1503_vm1, %v3515_v61  ;;  %v1502_v51 = vrot.slane %v11602_v18, 3  ;;  %v15386_v40 = vmov 0.0   ;;  %v9651_v44 = vcombine.high %v15388_v58, %v15387_v43  ;;  %v9652_v33 = vcombine.high %v15390_v57, %v15389_v17  ;;  %v15395_v20 = vld [vmem:[#allocation29_spill] sm:$0xff] }
  0x90   :  { %10790 = vmatprep.subr.msk.mxu0 %vm1534_vm0, %v15231_v36  ;;  %v1716_v60 = vcombine.low %v15386_v40, %v379_v14  ;;  %v1750_v24 = vcombine.low %v15386_v40, %v515_v48  ;;  %v9653_v35 = vcombine.high %v15392_v4, %v15391_v34  ;;  %v15396_v14 = vld [vmem:[#allocation28_spill] sm:$0xff]  ;;  %v15397_v61 = vld [vmem:[#allocation33_spill] sm:$0xff]  ;;  %v1731_v45 = vrot.slane %v9650_v53, %v11706_v29 }
  0x91   :  { %10608 = vmatprep.subr.msk.mxu1 %vm1534_vm0, %v1502_v51  ;;  %v9655_v36 = vcombine.high %v15396_v14, %v15395_v20  ;;  %v651_v63 = vcombine.high %v15397_v61, %v15397_v61  ;;  %v1741_v48 = vrot.slane %v9651_v44, %v11706_v29  ;;  %v1748_v31 = vrot.slane %v9652_v33, %v11706_v29  ;;  %v15402_v44 = vld [vmem:[#allocation37_spill] sm:$0xff] }
  0x92   :  { %10744 = vmatmul.mubr.msk.f32.gmra.mrb[2].mxu0 %vm1503_vm1, %v3532_v12  ;;  %v15394_v12 = vld [vmem:[#allocation26_spill] sm:$0xff]  ;;  %10609 = vmatpush3.msk.msra.mxu1 %vm1534_vm0, %v1502_v51  ;;  %v9656_v11 = vcombine.high %v15400_v46, %v15399_v27  ;;  %v1758_v51 = vrot.slane %v1750_v24, %v11706_v29  ;;  %v1765_v41 = vrot.slane %v9653_v35, %v11706_v29  ;;  %v15407_v24 = vld [vmem:[#allocation5_spill] sm:$0xff] }
  0x93   :  { %10746 = vmatprep.mubr.msk.f32.mxu0 %vm1503_vm1, %v3549_v42  ;;  %v9654_v54 = vcombine.high %v15394_v12, %v15393_v23  ;;  %10611 = vmatmul.mubr.msk.f32.vlgmr.msra.gmra.mrb[0].mxu1 %vm1503_vm1, %v15398_v52  ;;  %v1724_v42 = vrot.slane %v1716_v60, %v11706_v29  ;;  %v1784_v53 = vcombine.low %v15386_v40, %v651_v63  ;;  %v15401_v60 = vld [vmem:[#allocation38_spill] sm:$0xff]  ;;  %v15408_v52 = vld [vmem:[#allocation4_spill] sm:$0xff] }
  0x94   :  { %11274 = vmatprep.subr.msk.mxu1 %vm1534_vm0, %v11602_v18  ;;  %v9657_v33 = vcombine.high %v15402_v44, %v15401_v60  ;;  %v9658_v37 = vcombine.high %v15404_v25, %v15403_v55  ;;  %v1264_v35 = vcombine.low %v15408_v52, %v15407_v24  ;;  %v1799_v19 = vrot.slane %v9656_v11, %v11706_v29  ;;  %v15412_v52 = vld [vmem:[#allocation43_spill] sm:$0xff]  ;;  %v15415_v11 = vld [vmem:[#allocation6_spill] sm:$0xff]  ;;  %v15419_v24 = vld [vmem:[#allocation44_spill] sm:$0xff] }
  0x95   :  { %v1775_v28 = vrot.slane %v9654_v54, %v11706_v29  ;;  %11275 = vmatpush3.msk.msra.mxu1 %vm1534_vm0, %v11602_v18  ;;  %v13004_v63 = vcombine.low %v1724_v42, %v1731_v45  ;;  %v13006_v54 = vcombine.low %v1741_v48, %v1748_v31  ;;  %v15410_v55 = vcombine.low %v12828_v10, %v12838_v32  ;;  %v15414_v42 = vld [vmem:[#allocation7_spill] sm:$0xff]  ;;  %v15417_v10 = vld [vmem:[#allocation8_spill] sm:$0xff] }
  0x96   :  { %10747 = vmatmul.mubr.msk.f32.gmra.mrb[4].mxu0 %vm1503_vm1, %v3566_v50  ;;  %v1782_v50 = vrot.slane %v9655_v36, %v11706_v29  ;;  %v15409_v36 = vcombine.low %v12817_v1, %v12820_v56  ;;  %v787_v18 = vcombine.high %v15412_v52, %v15412_v52  ;;  %v1278_v56 = vrot.slane %v1264_v35, %v11706_v29 }
  0x97   :  { %10749 = vmatprep.mubr.msk.f32.mxu0 %vm1503_vm1, %v3583_v3  ;;  %v15406_v3 = vld [vmem:[#allocation2_spill] sm:$0xff]  ;;  %v1792_v31 = vrot.slane %v1784_v53, %v11706_v29  ;;  %v1280_v48 = vcombine.low %v15415_v11, %v15414_v42  ;;  %v15423_v53 = vld [vmem:[#allocation47_spill] sm:$0xff] }
  0x98   :  { %v1263_v2 = vcombine.low %v15406_v3, %v15405_v62  ;;  %v13013_v62 = vcombine.low %v1758_v51, %v1765_v41  ;;  %v13019_v45 = vcombine.low %v1775_v28, %v1782_v50  ;;  %v15416_v3 = vld [vmem:[#allocation10_spill] sm:$0xff]  ;;  %v1816_v51 = vrot.slane %v9658_v37, %v11706_v29  ;;  %v15418_v41 = vld [vmem:[#allocation45_spill] sm:$0xff] }
  0x99   :  { %v1281_v32 = vcombine.low %v15417_v10, %v15416_v3  ;;  %v15421_v28 = vcombine.low %v12845_v9, %v12848_v5  ;;  %v15422_v50 = vld [vmem:[#allocation46_spill] sm:$0xff]  ;;  %v1288_v42 = vrot.slane %v1280_v48, %v11706_v29  ;;  %v15425_v3 = vcombine.low %v12857_v59, %v12860_v8  ;;  %v15427_v5 = vld [vmem:[#allocation49_spill] sm:$0xff] }
  0x9a   :  { %10750 = vmatmul.mubr.msk.f32.gmra.mrb[6].mxu0 %vm1503_vm1, %v15409_v36  ;;  %15411 = vst [vmem:[#allocation87_spill] sm:$0xff] %v13013_v62  ;;  %v1271_v1 = vrot.slane %v1263_v2, %v11706_v29  ;;  %15413 = vst [vmem:[#allocation96_spill] sm:$0xff] %v13019_v45  ;;  %v9659_v36 = vcombine.high %v15419_v24, %v15418_v41  ;;  %v9660_v35 = vcombine.high %v15423_v53, %v15422_v50  ;;  %v15426_v9 = vld [vmem:[#allocation50_spill] sm:$0xff]  ;;  %v15430_v45 = vld [vmem:[#allocation57_spill] sm:$0xff] }
  0x9b   :  { %10752 = vmatprep.mubr.msk.f32.mxu0 %vm1503_vm1, %v15410_v55  ;;  %v1809_v55 = vrot.slane %v9657_v33, %v11706_v29  ;;  %v1295_v11 = vrot.slane %v1281_v32, %v11706_v29  ;;  %v15424_v33 = vld [vmem:[#allocation53_spill] sm:$0xff]  ;;  %v1297_v48 = vcombine.low %v15382_v16, %v15384_v7  ;;  %v13053_v10 = vcombine.low %v1792_v31, %v1799_v19  ;;  %v15431_v62 = vld [vmem:[#allocation56_spill] sm:$0xff] }
  0x9c   :  { %v13030_v2 = vcombine.low %v1271_v1, %v1278_v56  ;;  %v923_v37 = vcombine.high %v15424_v33, %v15424_v33  ;;  %v1818_v1 = vcombine.low %v15386_v40, %v787_v18  ;;  %v9661_v56 = vcombine.high %v15427_v5, %v15426_v9  ;;  %v15428_v18 = vld [vmem:[#allocation55_spill] sm:$0xff]  ;;  %v15432_v9 = vld [vmem:[#allocation22_spill] sm:$0xff] }
  0x9d   :  { %v13055_v32 = vcombine.low %v1288_v42, %v1295_v11  ;;  %v1298_v59 = vcombine.low %v15383_v38, %v15388_v58  ;;  %v1314_v8 = vcombine.low %v15387_v43, %v15390_v57  ;;  %v9663_v33 = vcombine.high %v15431_v62, %v15430_v45  ;;  %v15436_v57 = vld [vmem:[#allocation59_spill] sm:$0xff] }
  0x9e   :  { %15420 = vst [vmem:[#allocation93_spill] sm:$0xff] %v13030_v2  ;;  %10753 = vmatmul.mubr.msk.f32.gmra.mrb[8].mxu0 %vm1503_vm1, %v15421_v28  ;;  %10613 = vmatprep.mubr.msk.f32.mxu1 %vm1503_vm1, %v13030_v2  ;;  %v15429_v28 = vld [vmem:[#allocation54_spill] sm:$0xff]  ;;  %v1305_v2 = vrot.slane %v1297_v48, %v11706_v29  ;;  %v1315_v19 = vcombine.low %v15389_v17, %v15432_v9  ;;  %v15437_v9 = vld [vmem:[#allocation63_spill] sm:$0xff] }
  0x9f   :  { %10755 = vmatprep.mubr.msk.f32.mxu0 %vm1503_vm1, %v15425_v3  ;;  %v9662_v3 = vcombine.high %v15429_v28, %v15428_v18  ;;  %v15433_v16 = vcombine.low %v12868_v6, %v12871_v49  ;;  %10614 = vmatmul.mubr.msk.f32.gmra.mrb[2].mxu1 %vm1503_vm1, %v13055_v32  ;;  %v1852_v38 = vcombine.low %v15386_v40, %v923_v37  ;;  %v15435_v49 = vld [vmem:[#allocation60_spill] sm:$0xff] }
  0xa0   :  { %v1312_v7 = vrot.slane %v1298_v59, %v11706_v29  ;;  %v1322_v43 = vrot.slane %v1314_v8, %v11706_v29  ;;  %v15434_v58 = vcombine.low %v12879_v13, %v12888_v0  ;;  %v1833_v17 = vrot.slane %v9659_v36, %v11706_v29 }
  0xa1   :  { %v1843_v6 = vrot.slane %v9660_v35, %v11706_v29  ;;  %v9664_v31 = vcombine.high %v15436_v57, %v15435_v49  ;;  %v1329_v42 = vrot.slane %v1315_v19, %v11706_v29  ;;  %v1826_v11 = vrot.slane %v1818_v1, %v11706_v29  ;;  %v15442_v19 = vld [vmem:[#allocation31_spill] sm:$0xff] }
  0xa2   :  { %10756 = vmatmul.mubr.msk.f32.gmra.mrb[10].mxu0 %vm1503_vm1, %v15433_v16  ;;  %v13087_v37 = vcombine.low %v1305_v2, %v1312_v7  ;;  %v1059_v48 = vcombine.high %v15437_v9, %v15437_v9  ;;  %v1331_v13 = vcombine.low %v15385_v47, %v15392_v4  ;;  %v1850_v0 = vrot.slane %v9661_v56, %v11706_v29  ;;  %v15441_v56 = vld [vmem:[#allocation64_spill] sm:$0xff]  ;;  %v15443_v7 = vld [vmem:[#allocation66_spill] sm:$0xff] }
  0xa3   :  { %10758 = vmatprep.mubr.msk.f32.mxu0 %vm1503_vm1, %v15434_v58  ;;  %v1867_v36 = vrot.slane %v9662_v3, %v11706_v29  ;;  %v13095_v35 = vcombine.low %v1322_v43, %v1329_v42  ;;  %v1332_v59 = vcombine.low %v15391_v34, %v15394_v12  ;;  %v15438_v1 = vcombine.low %v12895_v39, %v12898_v21  ;;  %v92_v12 = vld [vmem:[%s15055_s0 + $0x1e0] sm:$0xff]  ;;  %v15444_v43 = vld [vmem:[#allocation68_spill] sm:$0xff] }
  0xa4   :  { %v1860_v2 = vrot.slane %v1852_v38, %v11706_v29  ;;  %v1877_v8 = vrot.slane %v9663_v33, %v11706_v29  ;;  %10616 = vmatprep.mubr.msk.f32.mxu1 %vm1503_vm1, %v13087_v37  ;;  %v1339_v47 = vrot.slane %v1331_v13, %v11706_v29  ;;  %v15439_v4 = vcombine.low %v12908_v26, %v12911_v30  ;;  %v15440_v30 = vld [vmem:[#allocation65_spill] sm:$0xff]  ;;  %v15448_v13 = vld [vmem:[#allocation16_spill] sm:$0xff] }
  0xa5   :  { %v1884_v34 = vrot.slane %v9664_v31, %v11706_v29  ;;  %10617 = vmatmul.mubr.msk.f32.gmra.mrb[4].mxu1 %vm1503_vm1, %v13095_v35  ;;  %v1346_v39 = vrot.slane %v1332_v59, %v11706_v29  ;;  %v1348_v21 = vcombine.low %v15393_v23, %v15396_v14  ;;  %v13121_v33 = vcombine.low %v1809_v55, %v1816_v51  ;;  %v93_v55 = vld [vmem:[%s15055_s0 + $0x1e8] sm:$0xff] }
  0xa6   :  { %10759 = vmatmul.mubr.msk.f32.gmra.mrb[12].mxu0 %vm1503_vm1, %v15438_v1  ;;  %v13124_v26 = vcombine.low %v15386_v40, %v1059_v48  ;;  %v9665_v3 = vcombine.high %v15441_v56, %v15440_v30  ;;  %v1349_v16 = vcombine.low %v15395_v20, %v15442_v19  ;;  %v13130_v38 = vcombine.low %v1826_v11, %v1833_v17  ;;  %v15446_v20 = vld [vmem:[#allocation70_spill] sm:$0xff]  ;;  %v15447_v17 = vld [vmem:[#allocation69_spill] sm:$0xff] }
  0xa7   :  { %10761 = vmatprep.mubr.msk.f32.mxu0 %vm1503_vm1, %v15439_v4  ;;  %v9666_v23 = vcombine.high %v15444_v43, %v15443_v7  ;;  %v13134_v14 = vcombine.low %v1339_v47, %v1346_v39  ;;  %v1356_v58 = vrot.slane %v1348_v21, %v11706_v29  ;;  %v15445_v51 = vcombine.low %v12924_v15, %v12927_v22  ;;  %v13182_v39 = vld [vmem:[%s15054_s1 + $0x18] sm:$0x7] }
  0xa8   :  { %v13144_v31 = vcombine.low %v1843_v6, %v1850_v0  ;;  %v9667_v42 = vcombine.high %v15447_v17, %v15446_v20  ;;  %v1363_v11 = vrot.slane %v1349_v16, %v11706_v29  ;;  %v1180_v48 = vcombine.high %v92_v12, %v92_v12  ;;  %v15449_v21 = vld [vmem:[#allocation13_spill] sm:$0xff] }
  0xa9   :  { %v13151_v59 = vcombine.low %v1860_v2, %v1867_v36  ;;  %v13153_v1 = vcombine.low %v1877_v8, %v1884_v34  ;;  %10619 = vmatprep.mubr.msk.f32.mxu1 %vm1503_vm1, %v13134_v14  ;;  %v13158_v15 = vrot.slane %v92_v12, %v11706_v29  ;;  %v1894_v22 = vrot.slane %v13124_v26, %v11706_v29  ;;  %v94_v2 = vld [vmem:[%s15055_s0 + $0x1f0] sm:$0xff] }
  0xaa   :  { %10762 = vmatmul.mubr.msk.f32.gmra.mrb[14].mxu0 %vm1503_vm1, %v15445_v51  ;;  %v13163_v6 = vrot.slane %v9665_v3, %v11706_v29  ;;  %v13165_v0 = vcombine.low %v1356_v58, %v1363_v11  ;;  %v1197_v47 = vcombine.high %v93_v55, %v93_v55  ;;  %v13168_v36 = vrot.slane %v9666_v23, %v11706_v29  ;;  %v15452_v23 = vld [vmem:[#allocation42_spill] sm:$0xff]  ;;  %v15453_v58 = vld [vmem:[#allocation40_spill] sm:$0xff] }
  0xab   :  { %10766 = vmatprep.mubr.msk.f32.mxu0 %vm1503_vm1, %v15448_v13  ;;  %v1365_v8 = vcombine.low %v15397_v61, %v15400_v46  ;;  %v1366_v4 = vcombine.low %v15399_v27, %v15402_v44  ;;  %v1382_v34 = vcombine.low %v15401_v60, %v15404_v25  ;;  %v13187_v12 = vrot.slane %v9667_v42, %v11706_v29  ;;  %v15450_v25 = vld [vmem:[#allocation105_spill] sm:$0xff] }
  0xac   :  { %10620 = vmatmul.mubr.msk.f32.gmra.mrb[6].mxu1 %vm1503_vm1, %v13165_v0  ;;  %v13192_v46 = vrot.slane %v1180_v48, %v11706_v29  ;;  %v13195_v27 = vrot.slane %v93_v55, %v11706_v29  ;;  %v15451_v61 = vrot.slane %v15450_v25, 5  ;;  %v1195_v60 = vcombine.high %v13158_v15, %v13158_v15  ;;  %v15456_v25 = vld [vmem:[#allocation53_spill] sm:$0xff] }
  0xad   :  { %v1373_v44 = vrot.slane %v1365_v8, %v11706_v29  ;;  %v1380_v3 = vrot.slane %v1366_v4, %v11706_v29  ;;  %v13207_v19 = vrot.slane %v1197_v47, %v11706_v29  ;;  %v1214_v16 = vcombine.high %v94_v2, %v94_v2  ;;  %v15454_v4 = vld [vmem:[#allocation51_spill] sm:$0xff] }
  0xae   :  { %10767 = vmatmul.mubr.msk.f32.vlgmr.msra.gmra.mrb[0].mxu0 %vm1503_vm1, %v15449_v21  ;;  %v1383_v55 = vcombine.low %v15453_v58, %v15452_v23  ;;  %v1390_v51 = vrot.slane %v1382_v34, %v11706_v29  ;;  %v1399_v11 = vcombine.low %v15412_v52, %v15419_v24  ;;  %v1400_v48 = vcombine.low %v15418_v41, %v15423_v53  ;;  %v15455_v34 = vld [vmem:[#allocation50_spill] sm:$0xff]  ;;  %v15457_v24 = vld [vmem:[#allocation87_spill] sm:$0xff] }
  0xaf   :  { %10791 = vmatpush3.msk.msra.mxu0 %vm1534_vm0, %v15451_v61  ;;  %10769 = vmatprep.mubr.msk.f32.mxu0 %vm1503_vm1, %v13004_v63  ;;  %v13214_v42 = vcombine.low %v1373_v44, %v1380_v3  ;;  %v1416_v13 = vcombine.low %v15422_v50, %v15427_v5  ;;  %v13225_v47 = vrot.slane %v94_v2, %v11706_v29  ;;  %v15458_v23 = vld [vmem:[#allocation62_spill] sm:$0xff] }
  0xb0   :  { %10816 = vmatprep.subr.msk.mxu0 %vm1534_vm0, %v13182_v39  ;;  %v1397_v8 = vrot.slane %v1383_v55, %v11706_v29  ;;  %v1417_v21 = vcombine.low %v15455_v34, %v15454_v4  ;;  %v1433_v52 = vcombine.low %v15456_v25, %v15429_v28  ;;  %v1407_v41 = vrot.slane %v1399_v11, %v11706_v29 }
  0xb1   :  { %10622 = vmatprep.mubr.msk.f32.mxu1 %vm1503_vm1, %v13214_v42  ;;  %v1414_v50 = vrot.slane %v1400_v48, %v11706_v29  ;;  %v1424_v53 = vrot.slane %v1416_v13, %v11706_v29  ;;  %v1434_v61 = vcombine.low %v15428_v18, %v15431_v62  ;;  %v1450_v3 = vcombine.low %v15430_v45, %v15436_v57  ;;  %v95_v62 = vld [vmem:[%s15055_s0 + $0x1f8] sm:$0xff] }
  0xb2   :  { %10770 = vmatmul.mubr.msk.f32.gmra.mrb[2].mxu0 %vm1503_vm1, %v13006_v54  ;;  %v13239_v5 = vcombine.low %v1390_v51, %v1397_v8  ;;  %v1431_v2 = vrot.slane %v1417_v21, %v11706_v29  ;;  %v1441_v28 = vrot.slane %v1433_v52, %v11706_v29  ;;  %v1451_v58 = vcombine.low %v15435_v49, %v15458_v23  ;;  %v15459_v51 = vld [vmem:[#allocation96_spill] sm:$0xff] }
  0xb3   :  { %10772 = vmatprep.mubr.msk.f32.mxu0 %vm1503_vm1, %v15457_v24  ;;  %v13245_v44 = vcombine.low %v1407_v41, %v1414_v50  ;;  %v1467_v55 = vcombine.low %v15437_v9, %v15441_v56  ;;  %v1448_v45 = vrot.slane %v1434_v61, %v11706_v29  ;;  %v1468_v49 = vcombine.low %v15440_v30, %v15444_v43  ;;  %v15460_v30 = vld [vmem:[#allocation73_spill] sm:$0xff] }
  0xb4   :  { %10623 = vmatmul.mubr.msk.f32.gmra.mrb[8].mxu1 %vm1503_vm1, %v13239_v5  ;;  %v13260_v18 = vcombine.low %v1424_v53, %v1431_v2  ;;  %v1458_v57 = vrot.slane %v1450_v3, %v11706_v29  ;;  %v1465_v9 = vrot.slane %v1451_v58, %v11706_v29  ;;  %v1484_v13 = vcombine.low %v15443_v7, %v15447_v17 }
  0xb5   :  { %10625 = vmatprep.mubr.msk.f32.mxu1 %vm1503_vm1, %v13245_v44  ;;  %v1475_v56 = vrot.slane %v1467_v55, %v11706_v29  ;;  %v13272_v11 = vcombine.low %v1441_v28, %v1448_v45  ;;  %v1482_v48 = vrot.slane %v1468_v49, %v11706_v29  ;;  %v1485_v43 = vcombine.low %v15446_v20, %v15460_v30  ;;  %v13467_v30 = vld [vmem:[%s15056_s3] sm:$0xff] }
  0xb6   :  { %10773 = vmatmul.mubr.msk.f32.gmra.mrb[4].mxu0 %vm1503_vm1, %v15459_v51  ;;  %v3937_v8 = vcombine.low %v15386_v40, %v1195_v60  ;;  %v13281_v4 = vrot.slane %v1214_v16, %v11706_v29  ;;  %v13284_v34 = vrot.slane %v95_v62, %v11706_v29  ;;  %v1231_v21 = vcombine.high %v95_v62, %v95_v62 }
  0xb7   :  { %10775 = vmatprep.mubr.msk.f32.mxu0 %vm1503_vm1, %v13053_v10  ;;  %v13290_v25 = vcombine.low %v1458_v57, %v1465_v9  ;;  %v1492_v7 = vrot.slane %v1484_v13, %v11706_v29  ;;  %v1499_v20 = vrot.slane %v1485_v43, %v11706_v29  ;;  %v9837_v17 = vcombine.high %v13192_v46, %v13195_v27 }
  0xb8   :  { %10626 = vmatmul.mubr.msk.f32.gmra.mrb[10].mxu1 %vm1503_vm1, %v13260_v18  ;;  %v13300_v60 = vcombine.low %v1475_v56, %v1482_v48  ;;  %v13303_v16 = vrot.slane %v1231_v21, %v11706_v29  ;;  %v1902_v52 = vcombine.low %v1894_v22, %v13163_v6  ;;  %v9838_v41 = vcombine.high %v13207_v19, %v13225_v47 }
  0xb9   :  { %10628 = vmatprep.mubr.msk.f32.mxu1 %vm1503_vm1, %v13272_v11  ;;  %v9874_v50 = vcombine.high %v13158_v15, %v13192_v46  ;;  %v9875_v53 = vcombine.high %v13195_v27, %v13207_v19  ;;  %v3945_v2 = vrot.slane %v3937_v8, %v11706_v29  ;;  %v9839_v61 = vcombine.high %v13281_v4, %v13284_v34 }
  0xba   :  { %10776 = vmatmul.mubr.msk.f32.gmra.mrb[6].mxu0 %vm1503_vm1, %v13121_v33  ;;  %v9876_v28 = vcombine.high %v13225_v47, %v13281_v4  ;;  %v9877_v26 = vcombine.high %v13284_v34, %v13303_v16  ;;  %v1500_v22 = vcombine.low %v1492_v7, %v1499_v20  ;;  %v3952_v23 = vrot.slane %v9837_v17, %v11706_v29 }
  0xbb   :  { %10778 = vmatprep.mubr.msk.f32.mxu0 %vm1503_vm1, %v13130_v38  ;;  %v13327_v6 = vrot.slane %v9874_v50, %v11706_v29  ;;  %v13330_v3 = vrot.slane %v9875_v53, %v11706_v29  ;;  %v1919_v49 = vcombine.low %v13168_v36, %v13187_v12  ;;  %v3962_v57 = vrot.slane %v9838_v41, %v11706_v29  ;;  %v15461_v36 = vld [vmem:[#allocation93_spill] sm:$0xff]  ;;  %v13489_v53 = vld [vmem:[%s15057_s2] ss:$0 sm:$0xff] }
  0xbc   :  { %10629 = vmatmul.mubr.msk.f32.gmra.mrb[12].mxu1 %vm1503_vm1, %v13290_v25  ;;  %v13338_v58 = vrot.slane %v9876_v28, %v11706_v29  ;;  %v13341_v55 = vrot.slane %v9877_v26, %v11706_v29  ;;  %v3969_v9 = vrot.slane %v9839_v61, %v11706_v29  ;;  %v3953_v56 = vcombine.low %v3945_v2, %v3952_v23  ;;  %v15467_v12 = vld [vmem:[#allocation41_spill] sm:$0xff] }
  0xbd   :  { %10631 = vmatprep.mubr.msk.f32.mxu1 %vm1503_vm1, %v13300_v60  ;;  %v4357_v62 = vcombine.low %v13327_v6, %v13330_v3 }
  0xbe   :  { %10779 = vmatmul.mubr.msk.f32.gmra.mrb[8].mxu0 %vm1503_vm1, %v13144_v31  ;;  %v4374_v45 = vcombine.low %v13338_v58, %v13341_v55  ;;  %v3970_v48 = vcombine.low %v3962_v57, %v3969_v9 }
  0xbf   :  { %10781 = vmatprep.mubr.msk.f32.mxu0 %vm1503_vm1, %v13151_v59 }
  0xc0   :  { %10632 = vmatmul.mubr.msk.f32.gmra.mrb[14].mxu1 %vm1503_vm1, %v1500_v22 }
  0xc1   :  { %10642 = vmatprep.mubr.msk.f32.mxu1 %vm1503_vm1, %v13004_v63  ;;  %v4139_v63 = vcombine.low %v13158_v15, %v13192_v46  ;;  %v15464_v15 = vld [vmem:[#allocation30_spill] sm:$0xff]  ;;  %v15468_v46 = vld [vmem:[#allocation48_spill] sm:$0xff] }
  0xc2   :  { %10782 = vmatmul.mubr.msk.f32.gmra.mrb[10].mxu0 %vm1503_vm1, %v13153_v1 }
  0xc3   :  { %10784 = vmatprep.mubr.msk.f32.mxu0 %vm1503_vm1, %v1902_v52 }
  0xc4   :  { %10643 = vmatmul.mubr.msk.f32.vlgmr.msra.gmra.mrb[4].mxu1 %vm1503_vm1, %v13006_v54  ;;  %v4140_v54 = vcombine.low %v13195_v27, %v13207_v19  ;;  %v15469_v27 = vld [vmem:[#allocation52_spill] sm:$0xff]  ;;  %v15470_v19 = vld [vmem:[#allocation58_spill] sm:$0xff] }
  0xc5   :  { %10645 = vmatprep.mubr.msk.f32.mxu1 %vm1503_vm1, %v15457_v24  ;;  %v15473_v24 = vld [vmem:[#allocation72_spill] sm:$0xff] }
  0xc6   :  { %10785 = vmatmul.mubr.msk.f32.gmra.mrb[12].mxu0 %vm1503_vm1, %v1919_v49 }
  0xc7   :  { %10787 = vmatprep.mubr.msk.f32.mxu0 %vm1503_vm1, %v3953_v56 }
  0xc8   :  { %10646 = vmatmul.mubr.msk.f32.gmra.mrb[6].mxu1 %vm1503_vm1, %v15459_v51  ;;  %v4870_v51 = vld [vmem:[%s15056_s3 + $0x8] sm:$0xff] }
  0xc9   :  { %10648 = vmatprep.mubr.msk.f32.mxu1 %vm1503_vm1, %v13053_v10  ;;  %v4156_v10 = vcombine.low %v13225_v47, %v13281_v4  ;;  %v15472_v47 = vld [vmem:[#allocation67_spill] sm:$0xff]  ;;  %10842 = vmatprep.subr.mxu1 %v4870_v51 }
  0xca   :  { %10788 = vmatmul.mubr.msk.f32.gmra.mrb[14].mxu0 %vm1503_vm1, %v3970_v48  ;;  %10843 = vmatpush3.msra.mxu1 %v4870_v51 }
  0xcb   :  { %10792 = vmatprep.mubr.msk.f32.mxu0 %vm1503_vm1, %v15461_v36  ;;  %10850 = vmatprep.subr.mxu1 %v13467_v30 }
  0xcc   :  { %10649 = vmatmul.mubr.msk.f32.gmra.mrb[8].mxu1 %vm1503_vm1, %v13121_v33  ;;  %v4164_v33 = vrot.slane %v4156_v10, %v11706_v29 }
  0xcd   :  { %10651 = vmatprep.mubr.msk.f32.mxu1 %vm1503_vm1, %v13130_v38 }
  0xce   :  { %10793 = vmatmul.mubr.msk.f32.vlgmr.msra.gmra.mrb[0].mxu0 %vm1503_vm1, %v13055_v32  ;;  %v4157_v32 = vcombine.low %v13284_v34, %v13303_v16 }
  0xcf   :  { %10817 = vmatpush3.msk.msra.mxu0 %vm1534_vm0, %v13182_v39  ;;  %10795 = vmatprep.mubr.msk.f32.mxu0 %vm1503_vm1, %v13087_v37  ;;  %v4147_v37 = vrot.slane %v4139_v63, %v11706_v29  ;;  %v15466_v39 = vld [vmem:[#allocation35_spill] sm:$0xff] }
  0xd0   :  { %10652 = vmatmul.mubr.msk.f32.gmra.mrb[10].mxu1 %vm1503_vm1, %v13144_v31  ;;  %v4171_v38 = vrot.slane %v4157_v32, %v11706_v29 }
  0xd1   :  { %10654 = vmatprep.mubr.msk.f32.mxu1 %vm1503_vm1, %v13151_v59  ;;  %v15462_v59 = vld [vmem:[#allocation14_spill] sm:$0xff] }
  0xd2   :  { %10796 = vmatmul.mubr.msk.f32.gmra.mrb[2].mxu0 %vm1503_vm1, %v13095_v35  ;;  %v4154_v35 = vrot.slane %v4140_v54, %v11706_v29  ;;  %v4172_v31 = vcombine.low %v4164_v33, %v4171_v38 }
  0xd3   :  { %10798 = vmatprep.mubr.msk.f32.mxu0 %vm1503_vm1, %v13134_v14 }
  0xd4   :  { %10655 = vmatmul.mubr.msk.f32.gmra.mrb[12].mxu1 %vm1503_vm1, %v13153_v1  ;;  %v4155_v14 = vcombine.low %v4147_v37, %v4154_v35  ;;  %v15463_v1 = vld [vmem:[#allocation19_spill] sm:$0xff] }
  0xd5   :  { %10657 = vmatprep.mubr.msk.f32.mxu1 %vm1503_vm1, %v1902_v52 }
  0xd6   :  { %10799 = vmatmul.mubr.msk.f32.gmra.mrb[4].mxu0 %vm1503_vm1, %v13165_v0  ;;  %v15465_v0 = vld [vmem:[#allocation32_spill] sm:$0xff] }
  0xd7   :  { %10801 = vmatprep.mubr.msk.f32.mxu0 %vm1503_vm1, %v13214_v42  ;;  %v15471_v42 = vld [vmem:[#allocation61_spill] sm:$0xff] }
  0xd8   :  { %10658 = vmatmul.mubr.msk.f32.gmra.mrb[14].mxu1 %vm1503_vm1, %v1919_v49 }
  0xda   :  { %10802 = vmatmul.mubr.msk.f32.gmra.mrb[6].mxu0 %vm1503_vm1, %v13239_v5  ;;  %v15474_v5 = vld [vmem:[#allocation76_spill] sm:$0xff] }
  0xdb   :  { %10804 = vmatprep.mubr.msk.f32.mxu0 %vm1503_vm1, %v13245_v44  ;;  %v15475_v44 = vld [vmem:[#allocation77_spill] sm:$0xff] }
  0xde   :  { %10805 = vmatmul.mubr.msk.f32.gmra.mrb[8].mxu0 %vm1503_vm1, %v13260_v18  ;;  %v15476_v18 = vld [vmem:[#allocation9_spill] sm:$0xff] }
  0xdf   :  { %10807 = vmatprep.mubr.msk.f32.mxu0 %vm1503_vm1, %v13272_v11  ;;  %10844 = vmatprep.mubr.msk.f32.mxu1 %vm4930_vm4, %v15476_v18 }
  0xe2   :  { %10808 = vmatmul.mubr.msk.f32.gmra.mrb[10].mxu0 %vm1503_vm1, %v13290_v25 }
  0xe3   :  { %10810 = vmatprep.mubr.msk.f32.mxu0 %vm1503_vm1, %v13300_v60 }
  0xe6   :  { %10811 = vmatmul.mubr.msk.f32.gmra.mrb[12].mxu0 %vm1503_vm1, %v1500_v22 }
  0xe7   :  { %10813 = vmatprep.mubr.msk.f32.mxu0 %vm1503_vm1, %v4155_v14 }
  0xea   :  { %10814 = vmatmul.mubr.msk.f32.gmra.mrb[14].mxu0 %vm1503_vm1, %v4172_v31 }
  0xeb   :  { %10818 = vmatprep.mubr.msk.f32.mxu0 %vm1503_vm1, %v15462_v59 }
  0xee   :  { %10819 = vmatmul.mubr.msk.f32.vlgmr.msra.gmra.mrb[0].mxu0 %vm1503_vm1, %v15463_v1 }
  0xef   :  { %10821 = vmatprep.mubr.msk.f32.mxu0 %vm1503_vm1, %v15464_v15 }
  0xf2   :  { %10822 = vmatmul.mubr.msk.f32.gmra.mrb[2].mxu0 %vm1503_vm1, %v15465_v0 }
  0xf3   :  { %10824 = vmatprep.mubr.msk.f32.mxu0 %vm1503_vm1, %v15466_v39 }
  0xf6   :  { %10825 = vmatmul.mubr.msk.f32.gmra.mrb[4].mxu0 %vm1503_vm1, %v15467_v12 }
  0xf7   :  { %10827 = vmatprep.mubr.msk.f32.mxu0 %vm1503_vm1, %v15468_v46 }
  0xfa   :  { %10828 = vmatmul.mubr.msk.f32.gmra.mrb[6].mxu0 %vm1503_vm1, %v15469_v27 }
  0xfb   :  { %10830 = vmatprep.mubr.msk.f32.mxu0 %vm1503_vm1, %v15470_v19 }
  0xfe   :  { %10831 = vmatmul.mubr.msk.f32.gmra.mrb[8].mxu0 %vm1503_vm1, %v15471_v42 }
  0xff   :  { %10833 = vmatprep.mubr.msk.f32.mxu0 %vm1503_vm1, %v15472_v47 }
 0x102   :  { %10834 = vmatmul.mubr.msk.f32.gmra.mrb[10].mxu0 %vm1503_vm1, %v15473_v24 }
 0x103   :  { %10836 = vmatprep.mubr.msk.f32.mxu0 %vm1503_vm1, %v15474_v5 }
 0x106   :  { %10837 = vmatmul.mubr.msk.f32.gmra.mrb[12].mxu0 %vm1503_vm1, %v15475_v44 }
 0x107   :  { %10839 = vmatprep.mubr.msk.f32.mxu0 %vm1503_vm1, %v4357_v62 }
 0x10a   :  { %10840 = vmatmul.mubr.msk.f32.gmra.mrb[14].mxu0 %vm1503_vm1, %v4374_v45 }
 0x166   :  { %v10612_v11 = vpop.f32.mrb[0].mxu1 }
 0x167   :  { %v1603_v13 = vpop.f32.mrb[1].mxu1 }
 0x172   :  { %v10615_v43 = vpop.f32.mrb[2].mxu1 }
 0x173   :  { %v1613_v8 = vpop.f32.mrb[3].mxu1 }
 0x197   :  { %v10644_v4 = vpop.f32.mrb[4].mxu1 }
 0x198   :  { %v2036_v34 = vpop.f32.mrb[5].mxu1 }
 0x19b   :  { %v10647_v21 = vpop.f32.mrb[6].mxu1 }
 0x19c   :  { %v2046_v25 = vpop.f32.mrb[7].mxu1 }
 0x19f   :  { %v13470_v7 = vpop.f32.mrb[8].mxu1 }
 0x1a0   :  { %v13472_v20 = vpop.f32.mrb[9].mxu1 }
 0x1a3   :  { %v13474_v17 = vpop.f32.mrb[10].mxu1 }
 0x1a4   :  { %v13476_v60 = vpop.f32.mrb[11].mxu1 }
 0x1a7   :  { %v13478_v16 = vpop.f32.mrb[12].mxu1 }
 0x1a8   :  { %v13480_v52 = vpop.f32.mrb[13].mxu1 }
 0x1ab   :  { %v13482_v41 = vpop.f32.mrb[14].mxu1 }
 0x1ac   :  { %v13484_v50 = vpop.f32.mrb[15].mxu1 }
 0x1c1   :  { %v10820_v2 = vpop.f32.mrb[0].mxu0 }
 0x1c2   :  { %v11276_v61 = vadd.f32 %v10820_v2, %v10612_v11  ;;  %v4448_v28 = vpop.f32.mrb[1].mxu0 }
 0x1c3   :  { %v11277_v26 = vadd.f32 %v4448_v28, %v1603_v13 }
 0x1c4   :  { %v4550_v22 = vadd.f32 %v11276_v61, %v13489_v53 }
 0x1c5   :  { %v4549_v6 = vadd.f32 %v11277_v26, %v13489_v53  ;;  %v10823_v3 = vpop.f32.mrb[2].mxu0 }
 0x1c6   :  { %v4566_v23 = vmax.f32 %v4550_v22, 0.0  ;;  %v11278_v58 = vadd.f32 %v10823_v3, %v10615_v43  ;;  %v4458_v55 = vpop.f32.mrb[3].mxu0 }
 0x1c7   :  { %v4565_v62 = vmax.f32 %v4549_v6, 0.0  ;;  %v11279_v45 = vadd.f32 %v4458_v55, %v1613_v8 }
 0x1c8   :  { %v4614_v49 = vcombine.high %v4566_v23, %v4566_v23  ;;  %v4552_v57 = vadd.f32 %v11278_v58, %v13489_v53  ;;  %v13499_v63 = vrot.slane %v4566_v23, %v11706_v29 }
 0x1c9   :  { %v4597_v9 = vcombine.high %v4565_v62, %v4565_v62  ;;  %v13495_v56 = vrot.slane %v4565_v62, %v11706_v29  ;;  %v4551_v48 = vadd.f32 %v11279_v45, %v13489_v53  ;;  %v10826_v36 = vpop.f32.mrb[4].mxu0 }
 0x1ca   :  { %v13502_v54 = vrot.slane %v4614_v49, %v11706_v29  ;;  %v4568_v10 = vmax.f32 %v4552_v57, 0.0  ;;  %v11280_v32 = vadd.f32 %v10826_v36, %v10644_v4  ;;  %v4468_v37 = vpop.f32.mrb[5].mxu0 }
 0x1cb   :  { %v13505_v35 = vrot.slane %v4597_v9, %v11706_v29  ;;  %v4612_v33 = vcombine.high %v13495_v56, %v13495_v56  ;;  %v4567_v38 = vmax.f32 %v4551_v48, 0.0  ;;  %v11281_v14 = vadd.f32 %v4468_v37, %v2036_v34 }
 0x1cc   :  { %v5478_v31 = vcombine.low %v13499_v63, %v13502_v54  ;;  %v4648_v1 = vcombine.high %v4568_v10, %v4568_v10  ;;  %v4655_v15 = vrot.slane %v4568_v10, %v11706_v29  ;;  %v4554_v42 = vadd.f32 %v11280_v32, %v13489_v53 }
 0x1cd   :  { %v5477_v0 = vcombine.low %v13495_v56, %v13505_v35  ;;  %v9929_v39 = vcombine.high %v13495_v56, %v13505_v35  ;;  %v4631_v12 = vcombine.high %v4567_v38, %v4567_v38  ;;  %v4638_v46 = vrot.slane %v4567_v38, %v11706_v29  ;;  %v10829_v27 = vpop.f32.mrb[6].mxu0 }
 0x1ce   :  { %v4662_v19 = vrot.slane %v4648_v1, %v11706_v29  ;;  %v4553_v47 = vadd.f32 %v11281_v14, %v13489_v53  ;;  %v11282_v24 = vadd.f32 %v10829_v27, %v10647_v21  ;;  %v4478_v5 = vpop.f32.mrb[7].mxu0  ;;  %v13524_v13 = vcombine.low %v15386_v40, %v4612_v33 }
 0x1cf   :  { %v4645_v44 = vrot.slane %v4631_v12, %v11706_v29  ;;  %v4646_v51 = vcombine.high %v4638_v46, %v4638_v46  ;;  %v11283_v11 = vadd.f32 %v4478_v5, %v2046_v25  ;;  %v4570_v4 = vmax.f32 %v4554_v42, 0.0 }
 0x1d0   :  { %v4880_v43 = vcombine.low %v4655_v15, %v4662_v19  ;;  %v9908_v8 = vcombine.high %v4655_v15, %v4662_v19  ;;  %v4569_v34 = vmax.f32 %v4553_v47, 0.0  ;;  %v4556_v48 = vadd.f32 %v11282_v24, %v13489_v53 }
 0x1d1   :  { %v4879_v2 = vcombine.low %v4638_v46, %v4645_v44  ;;  %v5024_v61 = vcombine.low %v15386_v40, %v4646_v51  ;;  %v9900_v28 = vcombine.high %v4645_v44, %v4655_v15  ;;  %v9907_v26 = vcombine.high %v4638_v46, %v4645_v44  ;;  %v10832_v22 = vpop.f32.mrb[8].mxu0  ;;  %v13548_v46 = vld [vmem:[%s15056_s3 + $0x10] sm:$0xff] }
 0x1d2   :  { %v4894_v21 = vrot.slane %v4880_v43, %v11706_v29  ;;  %v5181_v6 = vrot.slane %v9908_v8, %v11706_v29  ;;  %v4682_v3 = vcombine.high %v4570_v4, %v4570_v4  ;;  %v4689_v25 = vrot.slane %v4570_v4, %v11706_v29  ;;  %v4488_v23 = vpop.f32.mrb[9].mxu0 }
 0x1d3   :  { %v4887_v58 = vrot.slane %v4879_v2, %v11706_v29  ;;  %v5032_v55 = vrot.slane %v5024_v61, %v11706_v29  ;;  %v5039_v62 = vrot.slane %v9900_v28, %v11706_v29  ;;  %v5174_v45 = vrot.slane %v9907_v26, %v11706_v29 }
 0x1d4   :  { %v4696_v49 = vrot.slane %v4682_v3, %v11706_v29  ;;  %v4665_v57 = vcombine.high %v4569_v34, %v4569_v34  ;;  %v4672_v9 = vrot.slane %v4569_v34, %v11706_v29  ;;  %v4555_v37 = vadd.f32 %v11283_v11, %v13489_v53 }
 0x1d5   :  { %v13537_v36 = vcombine.low %v4887_v58, %v4894_v21  ;;  %v13539_v10 = vcombine.low %v5032_v55, %v5039_v62  ;;  %v13541_v32 = vcombine.low %v5174_v45, %v5181_v6  ;;  %v10835_v33 = vpop.f32.mrb[10].mxu0  ;;  %v4572_v27 = vmax.f32 %v4556_v48, 0.0 }
 0x1d6   :  { %v5495_v38 = vcombine.low %v4689_v25, %v4696_v49  ;;  %v9932_v14 = vcombine.high %v4689_v25, %v4696_v49  ;;  %v4679_v1 = vrot.slane %v4665_v57, %v11706_v29  ;;  %v4680_v15 = vcombine.high %v4672_v9, %v4672_v9  ;;  %v4498_v12 = vpop.f32.mrb[11].mxu0 }
 0x1d7   :  { %v4571_v19 = vmax.f32 %v4555_v37, 0.0  ;;  %v11284_v42 = vadd.f32 %v10832_v22, %v13470_v7  ;;  %v11285_v47 = vadd.f32 %v4488_v23, %v13472_v20  ;;  %10845 = vmatmul.mubr.msk.f32.vlgmr.msra.gmra.mrb[16].mxu1 %vm4930_vm4, %v13537_v36  ;;  %v4716_v8 = vcombine.high %v4572_v27, %v4572_v27 }
 0x1d8   :  { %v13555_v24 = vrot.slane %v5495_v38, %v11706_v29  ;;  %v13558_v5 = vrot.slane %v9932_v14, %v11706_v29  ;;  %v5329_v44 = vcombine.low %v15386_v40, %v4680_v15  ;;  %v9918_v51 = vcombine.high %v4679_v1, %v4689_v25  ;;  %10851 = vmatpush3.msra.mxu1 %v13467_v30 }
 0x1d9   :  { %v5494_v11 = vcombine.low %v4672_v9, %v4679_v1  ;;  %v9931_v43 = vcombine.high %v4672_v9, %v4679_v1  ;;  %v13563_v7 = vrot.slane %v4572_v27, %v11706_v29  ;;  %v10838_v20 = vpop.f32.mrb[12].mxu0  ;;  %10858 = vmatprep.subr.mxu1 %v13548_v46  ;;  %v4699_v2 = vcombine.high %v4571_v19, %v4571_v19 }
 0x1da   :  { %v5337_v4 = vrot.slane %v5329_v44, %v11706_v29  ;;  %v5344_v34 = vrot.slane %v9918_v51, %v11706_v29  ;;  %v13569_v61 = vrot.slane %v4571_v19, %v11706_v29  ;;  %v4508_v28 = vpop.f32.mrb[13].mxu0  ;;  %v13578_v22 = vrot.slane %v4716_v8, %v11706_v29 }
 0x1db   :  { %v13572_v30 = vrot.slane %v5494_v11, %v11706_v29  ;;  %v13575_v26 = vrot.slane %v9931_v43, %v11706_v29  ;;  %v4558_v21 = vadd.f32 %v11284_v42, %v13489_v53  ;;  %v13584_v3 = vrot.slane %v4699_v2, %v11706_v29 }
 0x1dc   :  { %v13581_v6 = vcombine.low %v5337_v4, %v5344_v34  ;;  %v4714_v25 = vcombine.high %v13569_v61, %v13569_v61  ;;  %v4557_v23 = vadd.f32 %v11285_v47, %v13489_v53  ;;  %v4897_v62 = vcombine.low %v13563_v7, %v13578_v22 }
 0x1dd   :  { %v9910_v45 = vcombine.high %v13563_v7, %v13578_v22  ;;  %v10841_v49 = vpop.f32.mrb[14].mxu0  ;;  %v4896_v57 = vcombine.low %v13569_v61, %v13584_v3  ;;  %v9909_v9 = vcombine.high %v13569_v61, %v13584_v3  ;;  %v4574_v48 = vmax.f32 %v4558_v21, 0.0 }
 0x1de   :  { %v4573_v37 = vmax.f32 %v4557_v23, 0.0  ;;  %v4518_v38 = vpop.f32.mrb[15].mxu0  ;;  %v11286_v14 = vadd.f32 %v10835_v33, %v13474_v17  ;;  %v11287_v1 = vadd.f32 %v4498_v12, %v13476_v60  ;;  %v11288_v15 = vadd.f32 %v10838_v20, %v13478_v16 }
 0x1df   :  { %v11289_v27 = vadd.f32 %v4508_v28, %v13480_v52  ;;  %v4750_v19 = vcombine.high %v4574_v48, %v4574_v48  ;;  %v13606_v42 = vrot.slane %v4574_v48, %v11706_v29  ;;  %v11290_v12 = vadd.f32 %v10841_v49, %v13482_v41 }
 0x1e0   :  { %v4733_v47 = vcombine.high %v4573_v37, %v4573_v37  ;;  %v13609_v44 = vrot.slane %v4573_v37, %v11706_v29  ;;  %v4560_v51 = vadd.f32 %v11286_v14, %v13489_v53  ;;  %v4559_v11 = vadd.f32 %v11287_v1, %v13489_v53 }
 0x1e1   :  { %v4562_v17 = vadd.f32 %v11288_v15, %v13489_v53  ;;  %v4561_v60 = vadd.f32 %v11289_v27, %v13489_v53  ;;  %v13616_v16 = vrot.slane %v4750_v19, %v11706_v29  ;;  %v9901_v2 = vcombine.high %v13584_v3, %v13563_v7 }
 0x1e2   :  { %v13619_v52 = vrot.slane %v4733_v47, %v11706_v29  ;;  %v4748_v33 = vcombine.high %v13609_v44, %v13609_v44  ;;  %v4576_v43 = vmax.f32 %v4560_v51, 0.0  ;;  %v4575_v8 = vmax.f32 %v4559_v11, 0.0 }
 0x1e3   :  { %v4578_v20 = vmax.f32 %v4562_v17, 0.0  ;;  %v4577_v4 = vmax.f32 %v4561_v60, 0.0  ;;  %v5512_v34 = vcombine.low %v13606_v42, %v13616_v16  ;;  %v4564_v51 = vadd.f32 %v11290_v12, %v13489_v53 }
 0x1e4   :  { %v5511_v28 = vcombine.low %v13609_v44, %v13619_v52  ;;  %v4784_v23 = vcombine.high %v4576_v43, %v4576_v43  ;;  %v4791_v48 = vrot.slane %v4576_v43, %v11706_v29  ;;  %v4767_v41 = vcombine.high %v4575_v8, %v4575_v8 }
 0x1e5   :  { %v4774_v49 = vrot.slane %v4575_v8, %v11706_v29  ;;  %v4818_v37 = vcombine.high %v4578_v20, %v4578_v20  ;;  %v13635_v14 = vrot.slane %v4578_v20, %v11706_v29  ;;  %v4801_v1 = vcombine.high %v4577_v4, %v4577_v4 }
 0x1e6   :  { %v13638_v15 = vrot.slane %v4577_v4, %v11706_v29  ;;  %v4798_v27 = vrot.slane %v4784_v23, %v11706_v29  ;;  %v4781_v19 = vrot.slane %v4767_v41, %v11706_v29  ;;  %v11291_v43 = vadd.f32 %v4518_v38, %v13484_v50 }
 0x1e7   :  { %v4782_v47 = vcombine.high %v4774_v49, %v4774_v49  ;;  %v13644_v11 = vrot.slane %v4818_v37, %v11706_v29  ;;  %v13647_v17 = vrot.slane %v4801_v1, %v11706_v29  ;;  %v4580_v55 = vmax.f32 %v4564_v51, 0.0 }
 0x1e8   :  { %v4816_v60 = vcombine.high %v13638_v15, %v13638_v15  ;;  %v4914_v8 = vcombine.low %v4791_v48, %v4798_v27  ;;  %v9912_v20 = vcombine.high %v4791_v48, %v4798_v27  ;;  %v4913_v4 = vcombine.low %v4774_v49, %v4781_v19 }
 0x1e9   :  { %v9911_v23 = vcombine.high %v4774_v49, %v4781_v19  ;;  %v5529_v41 = vcombine.low %v13635_v14, %v13644_v11  ;;  %v5528_v37 = vcombine.low %v13638_v15, %v13647_v17  ;;  %v4563_v58 = vadd.f32 %v11291_v43, %v13489_v53 }
 0x1ea   :  { %v4904_v50 = vrot.slane %v4896_v57, %v11706_v29  ;;  %v4911_v38 = vrot.slane %v4897_v62, %v11706_v29  ;;  %v4921_v49 = vrot.slane %v4913_v4, %v11706_v29  ;;  %v4928_v27 = vrot.slane %v4914_v8, %v11706_v29 }
 0x1eb   :  { %v5041_v12 = vcombine.low %v15386_v40, %v4714_v25  ;;  %v4852_v1 = vcombine.high %v4580_v55, %v4580_v55  ;;  %v13672_v51 = vrot.slane %v4580_v55, %v11706_v29  ;;  %v4579_v53 = vmax.f32 %v4563_v58, 0.0 }
 0x1ec   :  { %v13674_v57 = vcombine.low %v4904_v50, %v4911_v38  ;;  %v13676_v62 = vcombine.low %v4921_v49, %v4928_v27  ;;  %v5056_v8 = vrot.slane %v9901_v2, %v11706_v29  ;;  %v5058_v4 = vcombine.low %v15386_v40, %v4782_v47 }
 0x1ed   :  { %v5049_v43 = vrot.slane %v5041_v12, %v11706_v29  ;;  %v13682_v25 = vrot.slane %v4852_v1, %v11706_v29  ;;  %v4835_v21 = vcombine.high %v4579_v53, %v4579_v53  ;;  %v13685_v59 = vrot.slane %v4579_v53, %v11706_v29 }
 0x1ee   :  { %10847 = vmatprep.mubr.msk.f32.mxu1 %vm4930_vm4, %v13674_v57  ;;  %v9902_v58 = vcombine.high %v4781_v19, %v4791_v48  ;;  %v5066_v2 = vrot.slane %v5058_v4, %v11706_v29  ;;  %v5191_v47 = vrot.slane %v9909_v9, %v11706_v29  ;;  %v5198_v12 = vrot.slane %v9910_v45, %v11706_v29 }
 0x1ef   :  { %10848 = vmatmul.mubr.msk.f32.gmra.mrb[18].mxu1 %vm4930_vm4, %v13676_v62  ;;  %v13691_v55 = vcombine.low %v5049_v43, %v5056_v8  ;;  %v5916_v48 = vcombine.low %v13672_v51, %v13682_v25  ;;  %v9951_v19 = vcombine.high %v13672_v51, %v13682_v25  ;;  %v4849_v1 = vrot.slane %v4835_v21, %v11706_v29  ;;  %v4872_v21 = vld [vmem:[%s15056_s3 + $0x18] sm:$0xff] }
 0x1f0   :  { %v4850_v50 = vcombine.high %v13685_v59, %v13685_v59  ;;  %10852 = vmatprep.mubr.msk.f32.mxu1 %vm4930_vm4, %v15476_v18  ;;  %v5073_v61 = vrot.slane %v9902_v58, %v11706_v29  ;;  %v13712_v3 = vcombine.low %v5191_v47, %v5198_v12  ;;  %v5208_v7 = vrot.slane %v9911_v23, %v11706_v29 }
 0x1f1   :  { %v5215_v22 = vrot.slane %v9912_v20, %v11706_v29  ;;  %v5915_v45 = vcombine.low %v13685_v59, %v4849_v1  ;;  %v9950_v9 = vcombine.high %v13685_v59, %v4849_v1  ;;  %v9917_v38 = vcombine.high %v13505_v35, %v13499_v63 }
 0x1f2   :  { %v5320_v49 = vrot.slane %v13524_v13, %v11706_v29  ;;  %v13727_v23 = vcombine.low %v5066_v2, %v5073_v61  ;;  %v5346_v59 = vcombine.low %v15386_v40, %v4748_v33  ;;  %v9919_v27 = vcombine.high %v13619_v52, %v13606_v42 }
 0x1f3   :  { %10853 = vmatmul.mubr.msk.f32.vlgmr.msra.gmra.mrb[16].mxu1 %vm4930_vm4, %v13539_v10  ;;  %v13729_v20 = vcombine.low %v5208_v7, %v5215_v22  ;;  %v5327_v13 = vrot.slane %v9917_v38, %v11706_v29  ;;  %v5363_v53 = vcombine.low %v15386_v40, %v4816_v60  ;;  %v9920_v43 = vcombine.high %v13647_v17, %v13635_v14 }
 0x1f4   :  { %10859 = vmatpush3.msra.mxu1 %v13548_v46  ;;  %10855 = vmatprep.mubr.msk.f32.mxu1 %vm4930_vm4, %v13691_v55  ;;  %v5354_v8 = vrot.slane %v5346_v59, %v11706_v29  ;;  %v5361_v33 = vrot.slane %v9919_v27, %v11706_v29  ;;  %v5485_v46 = vrot.slane %v5477_v0, %v11706_v29 }
 0x1f5   :  { %10866 = vmatprep.subr.mxu1 %v4872_v21  ;;  %v5492_v4 = vrot.slane %v5478_v31, %v11706_v29  ;;  %v5328_v58 = vcombine.low %v5320_v49, %v5327_v13  ;;  %v5371_v60 = vrot.slane %v5363_v53, %v11706_v29  ;;  %v5378_v2 = vrot.slane %v9920_v43, %v11706_v29 }
 0x1f6   :  { %v5519_v47 = vrot.slane %v5511_v28, %v11706_v29  ;;  %v5362_v12 = vcombine.low %v5354_v8, %v5361_v33  ;;  %v5526_v31 = vrot.slane %v5512_v34, %v11706_v29  ;;  %v5536_v61 = vrot.slane %v5528_v37, %v11706_v29 }
 0x1f7   :  { %10856 = vmatmul.mubr.msk.f32.gmra.mrb[18].mxu1 %vm4930_vm4, %v13727_v23  ;;  %v5493_v0 = vcombine.low %v5485_v46, %v5492_v4  ;;  %v5379_v7 = vcombine.low %v5371_v60, %v5378_v2  ;;  %v5543_v28 = vrot.slane %v5529_v41, %v11706_v29  ;;  %v5650_v22 = vrot.slane %v9929_v39, %v11706_v29 }
 0x1f8   :  { %10860 = vmatprep.mubr.msk.f32.mxu1 %vm4930_vm4, %v15476_v18  ;;  %v15477_v34 = vcombine.high %v13499_v63, %v13502_v54  ;;  %v5527_v37 = vcombine.low %v5519_v47, %v5526_v31  ;;  %v15478_v49 = vcombine.high %v13609_v44, %v13619_v52  ;;  %v15479_v41 = vcombine.high %v13606_v42, %v13616_v16  ;;  %v4873_v63 = vld [vmem:[%s15056_s3 + $0x20] sm:$0xff] }
 0x1f9   :  { %v15480_v56 = vcombine.high %v13638_v15, %v13647_v17  ;;  %v5544_v54 = vcombine.low %v5536_v61, %v5543_v28  ;;  %v15481_v44 = vcombine.high %v13635_v14, %v13644_v11  ;;  %v5807_v13 = vcombine.low %v15386_v40, %v4850_v50 }
 0x1fa   :  { %v5657_v38 = vrot.slane %v15477_v34, %v11706_v29  ;;  %v5684_v59 = vrot.slane %v15478_v49, %v11706_v29  ;;  %v5691_v27 = vrot.slane %v15479_v41, %v11706_v29  ;;  %v9941_v16 = vcombine.high %v4849_v1, %v13672_v51  ;;  %v4875_v51 = vld [vmem:[%s15056_s3 + $0x30] sm:$0xff] }
 0x1fb   :  { %v5701_v35 = vrot.slane %v15480_v56, %v11706_v29  ;;  %v5708_v52 = vrot.slane %v15481_v44, %v11706_v29  ;;  %10861 = vmatmul.mubr.msk.f32.vlgmr.msra.gmra.mrb[16].mxu1 %vm4930_vm4, %v13541_v32  ;;  %v5923_v15 = vrot.slane %v5915_v45, %v11706_v29  ;;  %v5930_v17 = vrot.slane %v5916_v48, %v11706_v29 }
 0x1fc   :  { %v5658_v39 = vcombine.low %v5650_v22, %v5657_v38  ;;  %v5692_v42 = vcombine.low %v5684_v59, %v5691_v27  ;;  %10867 = vmatpush3.msra.mxu1 %v4872_v21  ;;  %10863 = vmatprep.mubr.msk.f32.mxu1 %vm4930_vm4, %v13712_v3  ;;  %v5815_v14 = vrot.slane %v5807_v13, %v11706_v29  ;;  %v6223_v13 = vld [vmem:[%s15058_s5 + $0x30] sm:$0xff] }
 0x1fd   :  { %v5709_v53 = vcombine.low %v5701_v35, %v5708_v52  ;;  %v6031_v11 = vrot.slane %v9950_v9, %v11706_v29  ;;  %10874 = vmatprep.subr.mxu1 %v4873_v63  ;;  %v5822_v50 = vrot.slane %v9941_v16, %v11706_v29  ;;  %v5931_v43 = vcombine.low %v5923_v15, %v5930_v17  ;;  %v4874_v9 = vld [vmem:[%s15056_s3 + $0x28] sm:$0xff] }
 0x1fe   :  { %v6038_v1 = vrot.slane %v9951_v19, %v11706_v29  ;;  %v15482_v25 = vcombine.low %v13572_v30, %v13555_v24  ;;  %v15483_v19 = vcombine.low %v13575_v26, %v13558_v5  ;;  %v4877_v24 = vld [vmem:[%s15056_s3 + $0x40] sm:$0xff]  ;;  %v6228_v30 = vld [vmem:[%s15058_s5 + $0x58] sm:$0xff] }
 0x1ff   :  { %10864 = vmatmul.mubr.msk.f32.gmra.mrb[18].mxu1 %vm4930_vm4, %v13729_v20  ;;  %v5823_v48 = vcombine.low %v5815_v14, %v5822_v50 }
 0x200   :  { %v6039_v45 = vcombine.low %v6031_v11, %v6038_v1  ;;  %10868 = vmatprep.mubr.msk.f32.mxu1 %vm4930_vm4, %v5328_v58 }
 0x203   :  { %10869 = vmatmul.mubr.msk.f32.vlgmr.msra.gmra.mrb[16].mxu1 %vm4930_vm4, %v13581_v6  ;;  %v4876_v6 = vld [vmem:[%s15056_s3 + $0x38] sm:$0xff] }
 0x204   :  { %10875 = vmatpush3.msra.mxu1 %v4873_v63  ;;  %10871 = vmatprep.mubr.msk.f32.mxu1 %vm4930_vm4, %v5362_v12 }
 0x205   :  { %10882 = vmatprep.subr.mxu1 %v4874_v9 }
 0x207   :  { %10872 = vmatmul.mubr.msk.f32.gmra.mrb[18].mxu1 %vm4930_vm4, %v5379_v7 }
 0x208   :  { %10876 = vmatprep.mubr.msk.f32.mxu1 %vm4930_vm4, %v5493_v0 }
 0x20b   :  { %10877 = vmatmul.mubr.msk.f32.vlgmr.msra.gmra.mrb[16].mxu1 %vm4930_vm4, %v15482_v25 }
 0x20c   :  { %10883 = vmatpush3.msra.mxu1 %v4874_v9  ;;  %10879 = vmatprep.mubr.msk.f32.mxu1 %vm4930_vm4, %v5527_v37 }
 0x20d   :  { %10890 = vmatprep.subr.mxu1 %v4875_v51 }
 0x20f   :  { %10880 = vmatmul.mubr.msk.f32.gmra.mrb[18].mxu1 %vm4930_vm4, %v5544_v54 }
 0x210   :  { %10884 = vmatprep.mubr.msk.f32.mxu1 %vm4930_vm4, %v5658_v39 }
 0x213   :  { %10885 = vmatmul.mubr.msk.f32.vlgmr.msra.gmra.mrb[16].mxu1 %vm4930_vm4, %v15483_v19 }
 0x214   :  { %10891 = vmatpush3.msra.mxu1 %v4875_v51  ;;  %10887 = vmatprep.mubr.msk.f32.mxu1 %vm4930_vm4, %v5692_v42  ;;  %v6224_v42 = vld [vmem:[%s15058_s5 + $0x38] sm:$0xff] }
 0x215   :  { %10898 = vmatprep.subr.mxu1 %v4876_v6 }
 0x217   :  { %10888 = vmatmul.mubr.msk.f32.gmra.mrb[18].mxu1 %vm4930_vm4, %v5709_v53 }
 0x218   :  { %10892 = vmatprep.mubr.msk.f32.mxu1 %vm4930_vm4, %v13539_v10  ;;  %v6226_v10 = vld [vmem:[%s15058_s5 + $0x48] sm:$0xff] }
 0x21b   :  { %10893 = vmatmul.mubr.msk.f32.vlgmr.msra.gmra.mrb[16].mxu1 %vm4930_vm4, %v13691_v55 }
 0x21c   :  { %10899 = vmatpush3.msra.mxu1 %v4876_v6  ;;  %10895 = vmatprep.mubr.msk.f32.mxu1 %vm4930_vm4, %v13727_v23 }
 0x21d   :  { %10906 = vmatprep.subr.mxu1 %v4877_v24 }
 0x21f   :  { %10896 = vmatmul.mubr.msk.f32.gmra.mrb[18].mxu1 %vm4930_vm4, %v5823_v48 }
 0x220   :  { %10900 = vmatprep.mubr.msk.f32.mxu1 %vm4930_vm4, %v13537_v36  ;;  %v6225_v36 = vld [vmem:[%s15058_s5 + $0x40] sm:$0xff] }
 0x221   :  { %v11238_v5 = vpack.c.bf16 %v6226_v10, %v6225_v36 }
 0x223   :  { %10901 = vmatmul.mubr.msk.f32.vlgmr.msra.gmra.mrb[16].mxu1 %vm4930_vm4, %v13674_v57  ;;  %v9956_v57 = vld [vmem:[%s15059_s4] ss:$0 sm:$0xff] }
 0x224   :  { %10907 = vmatpush3.msra.mxu1 %v4877_v24  ;;  %10903 = vmatprep.mubr.msk.f32.mxu1 %vm4930_vm4, %v13676_v62 }
 0x225   :  { %11239 = vmatprep.subr.bf16.mxu1 %v11238_v5 }
 0x227   :  { %10904 = vmatmul.mubr.msk.f32.gmra.mrb[18].mxu1 %vm4930_vm4, %v5931_v43  ;;  %v11246_v43 = vpack.c.bf16 %v6224_v42, %v6223_v13  ;;  %v14057_v13 = vld [vmem:[%s15060_s7] sm:$0xff] }
 0x228   :  { %10908 = vmatprep.mubr.msk.f32.mxu1 %vm4930_vm4, %v13541_v32  ;;  %v6227_v32 = vld [vmem:[%s15058_s5 + $0x50] sm:$0xff] }
 0x229   :  { %v11242_v26 = vpack.c.bf16 %v6228_v30, %v6227_v32  ;;  %v6231_v32 = vld [vmem:[%s15058_s5 + $0x70] sm:$0xff] }
 0x22b   :  { %10909 = vmatmul.mubr.msk.f32.vlgmr.msra.gmra.mrb[16].mxu1 %vm4930_vm4, %v13712_v3 }
 0x22c   :  { %10911 = vmatprep.mubr.msk.f32.mxu1 %vm4930_vm4, %v13729_v20  ;;  %11241 = vmatpush3.bf16.msra.mxu1 %v11238_v5  ;;  %v6232_v5 = vld [vmem:[%s15058_s5 + $0x78] sm:$0xff] }
 0x22d   :  { %11243 = vmatprep.subr.bf16.mxu1 %v11242_v26 }
 0x22f   :  { %10912 = vmatmul.mubr.msk.f32.gmra.mrb[18].mxu1 %vm4930_vm4, %v6039_v45 }
 0x2fe   :  { %v10910_v62 = vpop.f32.mrb[16].mxu1 }
 0x2ff   :  { %v6138_v55 = vadd.f32 %v10910_v62, %v9956_v57  ;;  %v6108_v3 = vpop.f32.mrb[17].mxu1 }
 0x300   :  { %v6137_v21 = vadd.f32 %v9956_v57, %v6108_v3 }
 0x301   :  { %v6142_v23 = vmax.f32 %v6138_v55, 0.0 }
 0x302   :  { %v6141_v20 = vmax.f32 %v6137_v21, 0.0  ;;  %v10913_v8 = vpop.f32.mrb[18].mxu1 }
 0x303   :  { %v6166_v33 = vcombine.high %v6142_v23, %v6142_v23  ;;  %v6173_v46 = vrot.slane %v6142_v23, %v11706_v29  ;;  %v6140_v4 = vadd.f32 %v10913_v8, %v9956_v57  ;;  %v6118_v58 = vpop.f32.mrb[19].mxu1 }
 0x304   :  { %v6149_v60 = vcombine.high %v6141_v20, %v6141_v20  ;;  %v6156_v2 = vrot.slane %v6141_v20, %v11706_v29  ;;  %v6139_v47 = vadd.f32 %v9956_v57, %v6118_v58  ;;  %v11250_v57 = vpack.c.bf16 %v6232_v5, %v6231_v32  ;;  %v6220_v58 = vld [vmem:[%s15058_s5 + $0x18] sm:$0xff] }
 0x305   :  { %v13890_v12 = vrot.slane %v6166_v33, %v11706_v29  ;;  %v13892_v0 = vcombine.high %v6173_v46, %v6173_v46  ;;  %v6144_v31 = vmax.f32 %v6140_v4, 0.0  ;;  %v6219_v4 = vld [vmem:[%s15058_s5 + $0x10] sm:$0xff] }
 0x306   :  { %v6163_v61 = vrot.slane %v6149_v60, %v11706_v29  ;;  %v6164_v7 = vcombine.high %v6156_v2, %v6156_v2  ;;  %v6143_v34 = vmax.f32 %v6139_v47, 0.0 }
 0x307   :  { %v6182_v28 = vcombine.high %v13890_v12, %v13890_v12  ;;  %v6200_v22 = vcombine.high %v6144_v31, %v6144_v31  ;;  %v6259_v49 = vcombine.low %v6173_v46, %v13892_v0  ;;  %v6207_v41 = vrot.slane %v6144_v31, %v11706_v29 }
 0x308   :  { %v6165_v38 = vcombine.high %v6163_v61, %v6163_v61  ;;  %v6242_v37 = vcombine.low %v6156_v2, %v6164_v7  ;;  %v6183_v63 = vcombine.high %v6143_v34, %v6143_v34  ;;  %v6190_v44 = vrot.slane %v6143_v34, %v11706_v29  ;;  %v6222_v34 = vld [vmem:[%s15058_s5 + $0x28] sm:$0xff] }
 0x309   :  { %v6260_v59 = vcombine.low %v13890_v12, %v6182_v28  ;;  %v13901_v56 = vrot.slane %v6200_v22, %v11706_v29  ;;  %v6267_v16 = vrot.slane %v6259_v49, %v11706_v29  ;;  %v6215_v15 = vcombine.high %v6207_v41, %v6207_v41  ;;  %v6221_v22 = vld [vmem:[%s15058_s5 + $0x20] sm:$0xff]  ;;  %v6218_v49 = vld [vmem:[%s15058_s5 + $0x8] sm:$0xff] }
 0x30a   :  { %v6243_v27 = vcombine.low %v6163_v61, %v6165_v38  ;;  %v6250_v54 = vrot.slane %v6242_v37, %v11706_v29  ;;  %v6197_v17 = vrot.slane %v6183_v63, %v11706_v29  ;;  %v6198_v53 = vcombine.high %v6190_v44, %v6190_v44  ;;  %v6217_v37 = vld [vmem:[%s15058_s5] sm:$0xff]  ;;  %v6234_v63 = vld [vmem:[%s15058_s5 + $0x88] sm:$0xff] }
 0x30b   :  { %v6274_v35 = vrot.slane %v6260_v59, %v11706_v29  ;;  %v6216_v39 = vcombine.high %v13901_v56, %v13901_v56  ;;  %v6293_v45 = vcombine.low %v6207_v41, %v6215_v15  ;;  %v6494_v10 = vcombine.low %v6165_v38, %v15386_v40  ;;  %v6229_v41 = vld [vmem:[%s15058_s5 + $0x60] sm:$0xff] }
 0x30c   :  { %v6257_v52 = vrot.slane %v6243_v27, %v11706_v29  ;;  %v6199_v1 = vcombine.high %v6197_v17, %v6197_v17  ;;  %v6276_v48 = vcombine.low %v6190_v44, %v6198_v53  ;;  %v6493_v30 = vcombine.low %v6164_v7, %v6163_v61  ;;  %v6230_v27 = vld [vmem:[%s15058_s5 + $0x68] sm:$0xff] }
 0x30d   :  { %v13919_v11 = vcombine.low %v6267_v16, %v6274_v35  ;;  %v6294_v50 = vcombine.low %v13901_v56, %v6216_v39  ;;  %v6301_v19 = vrot.slane %v6293_v45, %v11706_v29  ;;  %v6508_v62 = vrot.slane %v6494_v10, %v11706_v29  ;;  %v6233_v35 = vld [vmem:[%s15058_s5 + $0x80] sm:$0xff]  ;;  %v14048_v44 = vld [vmem:[%s15060_s7 + $0x28] sm:$0xff] }
 0x30e   :  { %v13917_v14 = vcombine.low %v6250_v54, %v6257_v52  ;;  %v6277_v9 = vcombine.low %v6197_v17, %v6199_v1  ;;  %v6284_v25 = vrot.slane %v6276_v48, %v11706_v29  ;;  %v6528_v55 = vcombine.low %v6199_v1, %v15386_v40  ;;  %v7488_v52 = vld [vmem:[%s15060_s7 + $0x10] sm:$0xff] }
 0x30f   :  { %v6308_v51 = vrot.slane %v6294_v50, %v11706_v29  ;;  %v6510_v3 = vcombine.low %v13892_v0, %v13890_v12  ;;  %v6501_v21 = vrot.slane %v6493_v30, %v11706_v29  ;;  %v6527_v23 = vcombine.low %v6198_v53, %v6197_v17  ;;  %11134 = vmatprep.subr.mxu0 %v7488_v52 }
 0x310   :  { %10918 = vmatprep.mubr.msk.f32.mxu1 %vm6310_vm5, %v13917_v14  ;;  %v6291_v6 = vrot.slane %v6277_v9, %v11706_v29  ;;  %v6545_v8 = vcombine.low %v6216_v39, %v15386_v40  ;;  %v6542_v46 = vrot.slane %v6528_v55, %v11706_v29  ;;  %v6544_v2 = vcombine.low %v6215_v15, %v13901_v56  ;;  %v7490_v39 = vld [vmem:[%s15060_s7 + $0x20] sm:$0xff] }
 0x311   :  { %10919 = vmatmul.mubr.msk.f32.vlgmr.msra.gmra.mrb[20].mxu1 %vm6310_vm5, %v13919_v11  ;;  %v13932_v36 = vcombine.low %v6301_v19, %v6308_v51  ;;  %v6509_v33 = vcombine.low %v6501_v21, %v6508_v62  ;;  %v6518_v60 = vrot.slane %v6510_v3, %v11706_v29  ;;  %v6535_v47 = vrot.slane %v6527_v23, %v11706_v29  ;;  %v14063_v15 = vld [vmem:[%s15061_s6] ss:$0 sm:$0xff] }
 0x312   :  { %11245 = vmatpush3.bf16.msra.mxu1 %v11242_v26  ;;  %v13930_v24 = vcombine.low %v6284_v25, %v6291_v6  ;;  %v6511_v26 = vcombine.low %v6182_v28, %v15386_v40  ;;  %v6559_v0 = vrot.slane %v6545_v8, %v11706_v29  ;;  %v11254_v31 = vpack.c.bf16 %v6220_v58, %v6219_v4 }
 0x313   :  { %11247 = vmatprep.subr.bf16.mxu1 %v11246_v43  ;;  %v6543_v61 = vcombine.low %v6535_v47, %v6542_v46  ;;  %v6552_v7 = vrot.slane %v6544_v2, %v11706_v29  ;;  %v11258_v38 = vpack.c.bf16 %v6222_v34, %v6221_v22  ;;  %v11262_v59 = vpack.c.bf16 %v6218_v49, %v6217_v37 }
 0x314   :  { %10921 = vmatprep.mubr.msk.f32.mxu1 %vm6310_vm5, %v13930_v24  ;;  %v6525_v20 = vrot.slane %v6511_v26, %v11706_v29  ;;  %v11266_v56 = vpack.c.bf16 %v6230_v27, %v6229_v41  ;;  %v11270_v54 = vpack.c.bf16 %v6234_v63, %v6233_v35  ;;  %11135 = vmatpush3.msra.mxu0 %v7488_v52 }
 0x315   :  { %10922 = vmatmul.mubr.msk.f32.gmra.mrb[22].mxu1 %vm6310_vm5, %v13932_v36  ;;  %v6560_v28 = vcombine.low %v6552_v7, %v6559_v0  ;;  %11160 = vmatprep.subr.mxu0 %v14057_v13 }
 0x316   :  { %10928 = vmatprep.mubr.msk.f32.mxu1 %vm6310_vm5, %v13917_v14  ;;  %v6526_v12 = vcombine.low %v6518_v60, %v6525_v20 }
 0x319   :  { %10929 = vmatmul.mubr.msk.f32.vlgmr.msra.gmra.mrb[24].mxu1 %vm6310_vm5, %v13919_v11 }
 0x31a   :  { %11249 = vmatpush3.bf16.msra.mxu1 %v11246_v43  ;;  %10931 = vmatprep.mubr.msk.f32.mxu1 %vm6310_vm5, %v13930_v24 }
 0x31b   :  { %11251 = vmatprep.subr.bf16.mxu1 %v11250_v57 }
 0x31d   :  { %10932 = vmatmul.mubr.msk.f32.gmra.mrb[26].mxu1 %vm6310_vm5, %v13932_v36 }
 0x31e   :  { %10938 = vmatprep.mubr.msk.f32.mxu1 %vm6310_vm5, %v6509_v33 }
 0x321   :  { %10939 = vmatmul.mubr.msk.f32.vlgmr.msra.gmra.mrb[24].mxu1 %vm6310_vm5, %v6526_v12 }
 0x322   :  { %11253 = vmatpush3.bf16.msra.mxu1 %v11250_v57  ;;  %10941 = vmatprep.mubr.msk.f32.mxu1 %vm6310_vm5, %v6543_v61 }
 0x323   :  { %11255 = vmatprep.subr.bf16.mxu1 %v11254_v31 }
 0x325   :  { %10942 = vmatmul.mubr.msk.f32.gmra.mrb[26].mxu1 %vm6310_vm5, %v6560_v28 }
 0x326   :  { %10948 = vmatprep.mubr.msk.f32.mxu1 %vm6310_vm5, %v13917_v14 }
 0x329   :  { %10949 = vmatmul.mubr.msk.f32.vlgmr.msra.gmra.mrb[28].mxu1 %vm6310_vm5, %v13919_v11 }
 0x32a   :  { %11257 = vmatpush3.bf16.msra.mxu1 %v11254_v31  ;;  %10951 = vmatprep.mubr.msk.f32.mxu1 %vm6310_vm5, %v13930_v24 }
 0x32b   :  { %11259 = vmatprep.subr.bf16.mxu1 %v11258_v38 }
 0x32d   :  { %10952 = vmatmul.mubr.msk.f32.gmra.mrb[30].mxu1 %vm6310_vm5, %v13932_v36 }
 0x32e   :  { %10958 = vmatprep.mubr.msk.f32.mxu1 %vm6310_vm5, %v13919_v11 }
 0x331   :  { %10959 = vmatmul.mubr.msk.f32.vlgmr.msra.gmra.mrb[28].mxu1 %vm6310_vm5, %v13930_v24 }
 0x332   :  { %11261 = vmatpush3.bf16.msra.mxu1 %v11258_v38  ;;  %10961 = vmatprep.mubr.msk.f32.mxu1 %vm6310_vm5, %v13932_v36 }
 0x333   :  { %11263 = vmatprep.subr.bf16.mxu1 %v11262_v59 }
 0x335   :  { %10962 = vmatmul.mubr.msk.f32.gmra.mrb[30].mxu1 %vm6310_vm5, %v15476_v18 }
 0x336   :  { %10968 = vmatprep.mubr.msk.f32.mxu1 %vm6310_vm5, %v13919_v11 }
 0x339   :  { %10969 = vmatmul.mubr.msk.f32.vlgmr.msra.gmra.mrb[32].mxu1 %vm6310_vm5, %v13930_v24 }
 0x33a   :  { %11265 = vmatpush3.bf16.msra.mxu1 %v11262_v59  ;;  %10971 = vmatprep.mubr.msk.f32.mxu1 %vm6310_vm5, %v13932_v36 }
 0x33b   :  { %11267 = vmatprep.subr.bf16.mxu1 %v11266_v56 }
 0x33d   :  { %10972 = vmatmul.mubr.msk.f32.gmra.mrb[34].mxu1 %vm6310_vm5, %v15476_v18 }
 0x33e   :  { %10978 = vmatprep.mubr.msk.f32.mxu1 %vm6310_vm5, %v6526_v12 }
 0x341   :  { %10979 = vmatmul.mubr.msk.f32.vlgmr.msra.gmra.mrb[32].mxu1 %vm6310_vm5, %v6543_v61 }
 0x342   :  { %11269 = vmatpush3.bf16.msra.mxu1 %v11266_v56  ;;  %10981 = vmatprep.mubr.msk.f32.mxu1 %vm6310_vm5, %v6560_v28 }
 0x343   :  { %11271 = vmatprep.subr.bf16.mxu1 %v11270_v54 }
 0x345   :  { %10982 = vmatmul.mubr.msk.f32.gmra.mrb[34].mxu1 %vm6310_vm5, %v15476_v18 }
 0x346   :  { %10988 = vmatprep.mubr.msk.f32.mxu1 %vm6310_vm5, %v6509_v33 }
 0x349   :  { %10989 = vmatmul.mubr.msk.f32.vlgmr.msra.gmra.mrb[32].mxu1 %vm6310_vm5, %v6526_v12 }
 0x34a   :  { %11273 = vmatpush3.bf16.msra.mxu1 %v11270_v54  ;;  %10991 = vmatprep.mubr.msk.f32.mxu1 %vm6310_vm5, %v6543_v61 }
 0x34b   :  { %11004 = vmatprep.subr.mxu1 %v7490_v39 }
 0x34d   :  { %10992 = vmatmul.mubr.msk.f32.gmra.mrb[34].mxu1 %vm6310_vm5, %v6560_v28 }
 0x34e   :  { %10998 = vmatprep.mubr.msk.f32.mxu1 %vm6310_vm5, %v13917_v14 }
 0x351   :  { %10999 = vmatmul.mubr.msk.f32.vlgmr.msra.gmra.mrb[32].mxu1 %vm6310_vm5, %v13919_v11 }
 0x352   :  { %11001 = vmatprep.mubr.msk.f32.mxu1 %vm6310_vm5, %v13930_v24  ;;  %11005 = vmatpush3.msra.mxu1 %v7490_v39 }
 0x353   :  { %11030 = vmatprep.subr.mxu1 %v14048_v44 }
 0x355   :  { %11002 = vmatmul.mubr.msk.f32.gmra.mrb[34].mxu1 %vm6310_vm5, %v13932_v36 }
 0x3e4   :  { %v10920_v42 = vpop.f32.mrb[20].mxu1 }
 0x3e5   :  { %v6385_v16 = vpop.f32.mrb[21].mxu1  ;;  %v6391_v11 = vadd.f32 %v10920_v42, %v14063_v15 }
 0x3e6   :  { %v6386_v17 = vadd.f32 %v14063_v15, %v6385_v16 }
 0x3e7   :  { %v6405_v1 = vmax.f32 %v6391_v11, 0.0 }
 0x3e8   :  { %v10923_v53 = vpop.f32.mrb[22].mxu1  ;;  %v6404_v50 = vmax.f32 %v6386_v17, 0.0 }
 0x3e9   :  { %v6395_v14 = vpop.f32.mrb[23].mxu1  ;;  %v6401_v43 = vadd.f32 %v10923_v53, %v14063_v15  ;;  %v7219_v51 = vcombine.high %v6405_v1, %v6405_v1  ;;  %v7226_v25 = vrot.slane %v6405_v1, %v11706_v29 }
 0x3ea   :  { %v7202_v48 = vcombine.high %v6404_v50, %v6404_v50  ;;  %v6396_v45 = vadd.f32 %v14063_v15, %v6395_v14  ;;  %v7209_v6 = vrot.slane %v6404_v50, %v11706_v29 }
 0x3eb   :  { %v14069_v9 = vmax.f32 %v6401_v43, 0.0  ;;  %v14085_v26 = vrot.slane %v7219_v51, %v11706_v29  ;;  %v7234_v62 = vcombine.high %v7226_v25, %v7226_v25 }
 0x3ec   :  { %v14074_v19 = vrot.slane %v7202_v48, %v11706_v29  ;;  %v14076_v36 = vmax.f32 %v6396_v45, 0.0  ;;  %v7217_v55 = vcombine.high %v7209_v6, %v7209_v6 }
 0x3ed   :  { %v14081_v5 = vrot.slane %v14069_v9, %v11706_v29  ;;  %v7253_v20 = vcombine.high %v14069_v9, %v14069_v9 }
 0x3ee   :  { %v7218_v3 = vcombine.high %v14074_v19, %v14074_v19  ;;  %v7236_v8 = vcombine.high %v14076_v36, %v14076_v36  ;;  %v14098_v60 = vrot.slane %v14076_v36, %v11706_v29 }
 0x3ef   :  { %v7268_v58 = vcombine.high %v14081_v5, %v14081_v5 }
 0x3f4   :  { %v10940_v24 = vpop.f32.mrb[24].mxu1 }
 0x3f5   :  { %v6655_v10 = vadd.f32 %v10940_v24, %v14063_v15  ;;  %v6635_v32 = vpop.f32.mrb[25].mxu1 }
 0x3f6   :  { %v6654_v30 = vadd.f32 %v14063_v15, %v6635_v32 }
 0x3f7   :  { %v6659_v57 = vmax.f32 %v6655_v10, 0.0 }
 0x3f8   :  { %v6658_v21 = vmax.f32 %v6654_v30, 0.0  ;;  %v10943_v23 = vpop.f32.mrb[26].mxu1 }
 0x3f9   :  { %v7363_v33 = vcombine.high %v6659_v57, %v6659_v57  ;;  %v7370_v46 = vrot.slane %v6659_v57, %v11706_v29  ;;  %v6645_v4 = vpop.f32.mrb[27].mxu1  ;;  %v6657_v61 = vadd.f32 %v10943_v23, %v14063_v15 }
 0x3fa   :  { %v7346_v2 = vcombine.high %v6658_v21, %v6658_v21  ;;  %v14101_v47 = vrot.slane %v6658_v21, %v11706_v29  ;;  %v6656_v34 = vadd.f32 %v14063_v15, %v6645_v4 }
 0x3fb   :  { %v14104_v12 = vrot.slane %v7363_v33, %v11706_v29  ;;  %v7570_v0 = vcombine.low %v7226_v25, %v7370_v46  ;;  %v9999_v31 = vcombine.high %v7226_v25, %v7370_v46  ;;  %v14107_v7 = vcombine.low %v7370_v46, %v7234_v62 }
 0x3fc   :  { %v7360_v28 = vrot.slane %v7346_v2, %v11706_v29  ;;  %v7502_v22 = vcombine.low %v7209_v6, %v14101_v47  ;;  %v7378_v38 = vcombine.high %v7370_v46, %v7370_v46  ;;  %v9995_v56 = vcombine.high %v7209_v6, %v14101_v47 }
 0x3fd   :  { %v7578_v37 = vrot.slane %v7570_v0, %v11706_v29  ;;  %v7585_v49 = vrot.slane %v9999_v31, %v11706_v29  ;;  %v7587_v59 = vcombine.low %v14085_v26, %v14104_v12  ;;  %v10000_v41 = vcombine.high %v14085_v26, %v14104_v12 }
 0x3fe   :  { %v7362_v27 = vcombine.high %v7360_v28, %v7360_v28  ;;  %v7519_v35 = vcombine.low %v14074_v19, %v7360_v28  ;;  %v9996_v39 = vcombine.high %v14074_v19, %v7360_v28  ;;  %v14125_v52 = vcombine.low %v14101_v47, %v7217_v55 }
 0x3ff   :  { %v14120_v63 = vcombine.low %v7578_v37, %v7585_v49  ;;  %v7595_v54 = vrot.slane %v7587_v59, %v11706_v29  ;;  %v7602_v42 = vrot.slane %v10000_v41, %v11706_v29  ;;  %v8129_v17 = vcombine.low %v7360_v28, %v7218_v3 }
 0x400   :  { %v7527_v16 = vrot.slane %v7519_v35, %v11706_v29  ;;  %v8130_v53 = vcombine.low %v7362_v27, %v15386_v40  ;;  %v7534_v14 = vrot.slane %v9996_v39, %v11706_v29  ;;  %v6661_v11 = vmax.f32 %v6657_v61, 0.0 }
 0x401   :  { %v6660_v50 = vmax.f32 %v6656_v34, 0.0  ;;  %v7510_v43 = vrot.slane %v7502_v22, %v11706_v29  ;;  %v14132_v1 = vcombine.low %v7595_v54, %v7602_v42  ;;  %v8137_v48 = vrot.slane %v8129_v17, %v11706_v29 }
 0x402   :  { %v8144_v45 = vrot.slane %v8130_v53, %v11706_v29  ;;  %v7517_v9 = vrot.slane %v9995_v56, %v11706_v29  ;;  %v14137_v51 = vcombine.low %v7527_v16, %v7534_v14  ;;  %v7397_v25 = vcombine.high %v6661_v11, %v6661_v11 }
 0x403   :  { %v14140_v6 = vrot.slane %v6661_v11, %v11706_v29  ;;  %v7380_v24 = vcombine.high %v6660_v50, %v6660_v50  ;;  %v7387_v10 = vrot.slane %v6660_v50, %v11706_v29  ;;  %v8181_v57 = vcombine.low %v7378_v38, %v14085_v26 }
 0x404   :  { %v14142_v36 = vcombine.low %v8137_v48, %v8144_v45  ;;  %v14145_v32 = vcombine.low %v7510_v43, %v7517_v9  ;;  %v10960_v30 = vpop.f32.mrb[28].mxu1  ;;  %v7267_v62 = vrot.slane %v7253_v20, %v11706_v29  ;;  %v14150_v55 = vrot.slane %v7397_v25, %v11706_v29  ;;  %v14166_v20 = vld [vmem:[%s15060_s7 + $0x18] sm:$0xff] }
 0x405   :  { %v7706_v3 = vcombine.low %v14081_v5, %v14140_v6  ;;  %v10007_v21 = vcombine.high %v14081_v5, %v14140_v6  ;;  %v6815_v23 = vpop.f32.mrb[29].mxu1  ;;  %v14157_v33 = vcombine.low %v14140_v6, %v7268_v58  ;;  %v7394_v46 = vrot.slane %v7380_v24, %v11706_v29 }
 0x406   :  { %v7638_v4 = vcombine.low %v14098_v60, %v7387_v10  ;;  %11006 = vmatprep.mubr.msk.f32.mxu1 %vm4930_vm4, %v14145_v32  ;;  %v7250_v2 = vrot.slane %v7236_v8, %v11706_v29  ;;  %v7723_v58 = vcombine.low %v7267_v62, %v14150_v55  ;;  %v7251_v31 = vcombine.high %v14098_v60, %v14098_v60 }
 0x407   :  { %v7714_v5 = vrot.slane %v7706_v3, %v11706_v29  ;;  %v7721_v0 = vrot.slane %v10007_v21, %v11706_v29  ;;  %11007 = vmatmul.mubr.msk.f32.vlgmr.msra.gmra.mrb[36].mxu1 %vm4930_vm4, %v14137_v51  ;;  %v10008_v61 = vcombine.high %v7267_v62, %v14150_v55  ;;  %v10003_v28 = vcombine.high %v14098_v60, %v7387_v10 }
 0x408   :  { %v7646_v22 = vrot.slane %v7638_v4, %v11706_v29  ;;  %v10963_v34 = vpop.f32.mrb[30].mxu1  ;;  %11031 = vmatpush3.msra.mxu1 %v14048_v44  ;;  %v7731_v38 = vrot.slane %v7723_v58, %v11706_v29  ;;  %v7655_v37 = vcombine.low %v7250_v2, %v7394_v46  ;;  %v10004_v49 = vcombine.high %v7250_v2, %v7394_v46 }
 0x409   :  { %v14180_v8 = vcombine.low %v7714_v5, %v7721_v0  ;;  %v6825_v59 = vpop.f32.mrb[31].mxu1  ;;  %11056 = vmatprep.subr.mxu1 %v14166_v20  ;;  %v7738_v41 = vrot.slane %v10008_v61, %v11706_v29  ;;  %v7653_v27 = vrot.slane %v10003_v28, %v11706_v29  ;;  %v8248_v56 = vcombine.low %v7387_v10, %v7251_v31 }
 0x40a   :  { %v7663_v60 = vrot.slane %v7655_v37, %v11706_v29  ;;  %v7670_v35 = vrot.slane %v10004_v49, %v11706_v29  ;;  %v8195_v42 = vrot.slane %v8181_v57, %v11706_v29  ;;  %v7379_v16 = vcombine.high %v14104_v12, %v14104_v12 }
 0x40b   :  { %v14188_v54 = vcombine.low %v7731_v38, %v7738_v41  ;;  %v14190_v44 = vcombine.low %v7646_v22, %v7653_v27  ;;  %v7395_v17 = vcombine.high %v7387_v10, %v7387_v10  ;;  %v8188_v53 = vrot.slane %v14107_v7, %v11706_v29 }
 0x40c   :  { %v14192_v39 = vcombine.low %v7663_v60, %v7670_v35  ;;  %v7235_v14 = vcombine.high %v14085_v26, %v14085_v26  ;;  %v7412_v11 = vcombine.high %v14140_v6, %v14140_v6  ;;  %v7396_v50 = vcombine.high %v7394_v46, %v7394_v46 }
 0x40d   :  { %v7269_v43 = vcombine.high %v7267_v62, %v7267_v62  ;;  %v7252_v48 = vcombine.high %v7250_v2, %v7250_v2  ;;  %v7361_v45 = vcombine.high %v14101_v47, %v14101_v47  ;;  %v14205_v9 = vcombine.low %v8188_v53, %v8195_v42 }
 0x40e   :  { %v7413_v25 = vcombine.high %v14150_v55, %v14150_v55  ;;  %v6835_v24 = vadd.f32 %v10960_v30, %v14063_v15  ;;  %v8197_v7 = vcombine.low %v14104_v12, %v7235_v14  ;;  %v8198_v26 = vcombine.low %v7379_v16, %v15386_v40 }
 0x40f   :  { %v6834_v10 = vadd.f32 %v14063_v15, %v6815_v23  ;;  %v8249_v6 = vcombine.low %v7395_v17, %v7250_v2  ;;  %v8256_v57 = vrot.slane %v8248_v56, %v11706_v29  ;;  %v8265_v3 = vcombine.low %v7394_v46, %v7252_v48 }
 0x410   :  { %v8205_v21 = vrot.slane %v8197_v7, %v11706_v29  ;;  %v8212_v47 = vrot.slane %v8198_v26, %v11706_v29  ;;  %v8266_v4 = vcombine.low %v7396_v50, %v15386_v40  ;;  %v8317_v5 = vcombine.low %v7412_v11, %v7267_v62 }
 0x411   :  { %v8263_v0 = vrot.slane %v8249_v6, %v11706_v29  ;;  %v8273_v30 = vrot.slane %v8265_v3, %v11706_v29  ;;  %v8324_v12 = vrot.slane %v14157_v33, %v11706_v29  ;;  %v8333_v23 = vcombine.low %v14150_v55, %v7269_v43 }
 0x412   :  { %v14222_v2 = vcombine.low %v8205_v21, %v8212_v47  ;;  %v8280_v46 = vrot.slane %v8266_v4, %v11706_v29  ;;  %v8331_v58 = vrot.slane %v8317_v5, %v11706_v29  ;;  %v8334_v31 = vcombine.low %v7413_v25, %v15386_v40 }
 0x413   :  { %v6837_v61 = vadd.f32 %v10963_v34, %v14063_v15  ;;  %v6836_v62 = vadd.f32 %v14063_v15, %v6825_v59  ;;  %v14229_v28 = vcombine.low %v8256_v57, %v8263_v0  ;;  %v8113_v22 = vcombine.low %v7361_v45, %v14074_v19 }
 0x414   :  { %v14232_v38 = vcombine.low %v8273_v30, %v8280_v46  ;;  %v14234_v33 = vcombine.low %v8324_v12, %v8331_v58  ;;  %v8341_v55 = vrot.slane %v8333_v23, %v11706_v29  ;;  %v8348_v37 = vrot.slane %v8334_v31, %v11706_v29 }
 0x415   :  { %v8120_v49 = vrot.slane %v14125_v52, %v11706_v29  ;;  %v8127_v41 = vrot.slane %v8113_v22, %v11706_v29  ;;  %v6839_v59 = vmax.f32 %v6835_v24, 0.0  ;;  %v6838_v27 = vmax.f32 %v6834_v10, 0.0 }
 0x416   :  { %v14241_v34 = vcombine.low %v8341_v55, %v8348_v37  ;;  %v6841_v19 = vmax.f32 %v6837_v61, 0.0  ;;  %v6840_v60 = vmax.f32 %v6836_v62, 0.0 }
 0x417   :  { %v14243_v56 = vcombine.low %v8120_v49, %v8127_v41  ;;  %v7291_v35 = vcombine.high %v6839_v59, %v6839_v59  ;;  %v7274_v42 = vcombine.high %v6838_v27, %v6838_v27  ;;  %v7298_v53 = vrot.slane %v6839_v59, %v11706_v29 }
 0x418   :  { %v7325_v16 = vcombine.high %v6841_v19, %v6841_v19  ;;  %v7308_v17 = vcombine.high %v6840_v60, %v6840_v60  ;;  %v7281_v14 = vrot.slane %v6838_v27, %v11706_v29  ;;  %v14248_v52 = vrot.slane %v6841_v19, %v11706_v29 }
 0x419   :  { %v14251_v11 = vrot.slane %v7291_v35, %v11706_v29  ;;  %v14254_v50 = vrot.slane %v7274_v42, %v11706_v29  ;;  %v14257_v43 = vrot.slane %v6840_v60, %v11706_v29  ;;  %v7306_v10 = vcombine.high %v7298_v53, %v7298_v53 }
 0x41a   :  { %v14260_v45 = vrot.slane %v7325_v16, %v11706_v29  ;;  %v14263_v25 = vrot.slane %v7308_v17, %v11706_v29  ;;  %v7289_v6 = vcombine.high %v7281_v14, %v7281_v14  ;;  %v7340_v57 = vcombine.high %v14248_v52, %v14248_v52 }
 0x41b   :  { %v7307_v21 = vcombine.high %v14251_v11, %v14251_v11  ;;  %v7290_v47 = vcombine.high %v14254_v50, %v14254_v50  ;;  %v7323_v4 = vcombine.high %v14257_v43, %v14257_v43 }
 0x41c   :  { %v7341_v30 = vcombine.high %v14260_v45, %v14260_v45  ;;  %v7324_v12 = vcombine.high %v14263_v25, %v14263_v25 }
 0x424   :  { %v11000_v48 = vpop.f32.mrb[32].mxu1 }
 0x425   :  { %v7191_v24 = vadd.f32 %v11000_v48, %v14063_v15  ;;  %v7167_v7 = vpop.f32.mrb[33].mxu1 }
 0x426   :  { %v7190_v26 = vadd.f32 %v14063_v15, %v7167_v7 }
 0x427   :  { %v7195_v3 = vmax.f32 %v7191_v24, 0.0 }
 0x428   :  { %v7194_v5 = vmax.f32 %v7190_v26, 0.0  ;;  %v11003_v0 = vpop.f32.mrb[34].mxu1 }
 0x429   :  { %v7435_v23 = vcombine.high %v7195_v3, %v7195_v3  ;;  %v14280_v46 = vrot.slane %v7195_v3, %v11706_v29  ;;  %v7177_v58 = vpop.f32.mrb[35].mxu1  ;;  %v7193_v62 = vadd.f32 %v11003_v0, %v14063_v15 }
 0x42a   :  { %v7418_v31 = vcombine.high %v7194_v5, %v7194_v5  ;;  %v7425_v61 = vrot.slane %v7194_v5, %v11706_v29  ;;  %v7192_v22 = vadd.f32 %v14063_v15, %v7177_v58 }
 0x42b   :  { %v14286_v55 = vrot.slane %v7435_v23, %v11706_v29  ;;  %v7450_v37 = vcombine.high %v14280_v46, %v14280_v46  ;;  %v7604_v49 = vcombine.low %v7298_v53, %v14280_v46  ;;  %v10001_v41 = vcombine.high %v7298_v53, %v14280_v46 }
 0x42c   :  { %v14293_v59 = vcombine.low %v14280_v46, %v7306_v10  ;;  %v7432_v27 = vrot.slane %v7418_v31, %v11706_v29  ;;  %v7433_v19 = vcombine.high %v7425_v61, %v7425_v61  ;;  %v7536_v60 = vcombine.low %v7281_v14, %v7425_v61  ;;  %v7492_v46 = vld [vmem:[%s15060_s7 + $0x30] sm:$0xff] }
 0x42d   :  { %v7451_v15 = vcombine.high %v14286_v55, %v14286_v55  ;;  %v7612_v35 = vrot.slane %v7604_v49, %v11706_v29  ;;  %v7619_v42 = vrot.slane %v10001_v41, %v11706_v29  ;;  %v7621_v16 = vcombine.low %v14251_v11, %v14286_v55 }
 0x42e   :  { %v10002_v17 = vcombine.high %v14251_v11, %v14286_v55  ;;  %v7434_v53 = vcombine.high %v7432_v27, %v7432_v27  ;;  %v9997_v48 = vcombine.high %v7281_v14, %v7425_v61  ;;  %v7544_v24 = vrot.slane %v7536_v60, %v11706_v29 }
 0x42f   :  { %v14305_v7 = vcombine.low %v7612_v35, %v7619_v42  ;;  %v7629_v26 = vrot.slane %v7621_v16, %v11706_v29  ;;  %v7553_v10 = vcombine.low %v14254_v50, %v7432_v27  ;;  %v9998_v3 = vcombine.high %v14254_v50, %v7432_v27 }
 0x430   :  { %v7636_v5 = vrot.slane %v10002_v17, %v11706_v29  ;;  %v7551_v0 = vrot.slane %v9997_v48, %v11706_v29  ;;  %v14312_v23 = vcombine.low %v7425_v61, %v7289_v6  ;;  %v8163_v58 = vcombine.low %v7432_v27, %v7290_v47 }
 0x431   :  { %v7561_v31 = vrot.slane %v7553_v10, %v11706_v29  ;;  %v7568_v14 = vrot.slane %v9998_v3, %v11706_v29  ;;  %v8164_v49 = vcombine.low %v7434_v53, %v15386_v40  ;;  %v7197_v41 = vmax.f32 %v7193_v62, 0.0 }
 0x432   :  { %v14317_v60 = vcombine.low %v7629_v26, %v7636_v5  ;;  %v14319_v35 = vcombine.low %v7544_v24, %v7551_v0  ;;  %v8171_v42 = vrot.slane %v8163_v58, %v11706_v29  ;;  %v7196_v16 = vmax.f32 %v7192_v22, 0.0 }
 0x433   :  { %v14322_v17 = vcombine.low %v7561_v31, %v7568_v14  ;;  %v8178_v6 = vrot.slane %v8164_v49, %v11706_v29  ;;  %v7469_v61 = vcombine.high %v7197_v41, %v7197_v41  ;;  %v14326_v47 = vrot.slane %v7197_v41, %v11706_v29 }
 0x434   :  { %v7452_v27 = vcombine.high %v7196_v16, %v7196_v16  ;;  %v7459_v48 = vrot.slane %v7196_v16, %v11706_v29  ;;  %11009 = vmatprep.mubr.msk.f32.mxu1 %vm4930_vm4, %v14319_v35  ;;  %11136 = vmatprep.mubr.msk.f32.mxu0 %vm4930_vm4, %v14319_v35  ;;  %v8147_v62 = vcombine.low %v7433_v19, %v14254_v50 }
 0x435   :  { %v14334_v22 = vcombine.low %v8171_v42, %v8178_v6  ;;  %v14337_v53 = vrot.slane %v7469_v61, %v11706_v29  ;;  %v7484_v24 = vcombine.high %v14326_v47, %v14326_v47  ;;  %v7740_v26 = vcombine.low %v14248_v52, %v14326_v47  ;;  %11010 = vmatmul.mubr.msk.f32.gmra.mrb[38].mxu1 %vm4930_vm4, %v14322_v17 }
 0x436   :  { %v10009_v10 = vcombine.high %v14248_v52, %v14326_v47  ;;  %v14351_v50 = vcombine.low %v14326_v47, %v7340_v57  ;;  %v7466_v19 = vrot.slane %v7452_v27, %v11706_v29  ;;  %v7467_v3 = vcombine.high %v7459_v48, %v7459_v48  ;;  %11137 = vmatmul.mubr.msk.f32.vlgmr.msra.gmra.mrb[16].mxu0 %vm4930_vm4, %v14322_v17 }
 0x437   :  { %v7485_v5 = vcombine.high %v14337_v53, %v14337_v53  ;;  %v7748_v0 = vrot.slane %v7740_v26, %v11706_v29  ;;  %v7757_v58 = vcombine.low %v14260_v45, %v14337_v53  ;;  %v10010_v52 = vcombine.high %v14260_v45, %v14337_v53  ;;  %11012 = vmatprep.mubr.msk.f32.mxu1 %vm4930_vm4, %v14120_v63 }
 0x438   :  { %v7755_v57 = vrot.slane %v10009_v10, %v11706_v29  ;;  %v7468_v31 = vcombine.high %v7466_v19, %v7466_v19  ;;  %v7672_v14 = vcombine.low %v14257_v43, %v7459_v48  ;;  %v10005_v49 = vcombine.high %v14257_v43, %v7459_v48  ;;  %11139 = vmatprep.mubr.msk.f32.mxu0 %vm4930_vm4, %v14120_v63 }
 0x439   :  { %v7765_v41 = vrot.slane %v7757_v58, %v11706_v29  ;;  %v7772_v42 = vrot.slane %v10010_v52, %v11706_v29  ;;  %v7689_v16 = vcombine.low %v14263_v25, %v7466_v19  ;;  %v10006_v6 = vcombine.high %v14263_v25, %v7466_v19  ;;  %11013 = vmatmul.mubr.msk.f32.gmra.mrb[40].mxu1 %vm4930_vm4, %v14132_v1 }
 0x43a   :  { %v14376_v61 = vcombine.low %v7748_v0, %v7755_v57  ;;  %v7680_v47 = vrot.slane %v7672_v14, %v11706_v29  ;;  %v7687_v27 = vrot.slane %v10005_v49, %v11706_v29  ;;  %v8282_v26 = vcombine.low %v7459_v48, %v7323_v4  ;;  %11140 = vmatmul.mubr.msk.f32.gmra.mrb[18].mxu0 %vm4930_vm4, %v14132_v1 }
 0x43b   :  { %v14385_v10 = vcombine.low %v7765_v41, %v7772_v42  ;;  %v7697_v58 = vrot.slane %v7689_v16, %v11706_v29  ;;  %v7704_v52 = vrot.slane %v10006_v6, %v11706_v29  ;;  %11015 = vmatprep.mubr.msk.f32.mxu1 %vm4930_vm4, %v14305_v7  ;;  %11142 = vmatprep.mubr.msk.f32.mxu0 %vm4930_vm4, %v14305_v7 }
 0x43c   :  { %v14393_v0 = vcombine.low %v7680_v47, %v7687_v27  ;;  %11161 = vmatpush3.msra.mxu0 %v14057_v13  ;;  %v8154_v43 = vrot.slane %v14312_v23, %v11706_v29  ;;  %v8161_v4 = vrot.slane %v8147_v62, %v11706_v29  ;;  %v8215_v48 = vcombine.low %v7450_v37, %v14251_v11 }
 0x43d   :  { %v14403_v57 = vcombine.low %v7697_v58, %v7704_v52  ;;  %11016 = vmatmul.mubr.msk.f32.gmra.mrb[42].mxu1 %vm4930_vm4, %v14317_v60  ;;  %v8222_v14 = vrot.slane %v14293_v59, %v11706_v29  ;;  %v8231_v13 = vcombine.low %v14286_v55, %v7307_v21  ;;  %v8232_v23 = vcombine.low %v7451_v15, %v15386_v40 }
 0x43e   :  { %11143 = vmatmul.mubr.msk.f32.gmra.mrb[20].mxu0 %vm4930_vm4, %v14317_v60  ;;  %11018 = vmatprep.mubr.msk.f32.mxu1 %vm4930_vm4, %v14190_v44  ;;  %v14424_v37 = vcombine.low %v8154_v43, %v8161_v4  ;;  %v8229_v11 = vrot.slane %v8215_v48, %v11706_v29  ;;  %v8283_v21 = vcombine.low %v7467_v3, %v14263_v25 }
 0x43f   :  { %11145 = vmatprep.mubr.msk.f32.mxu0 %vm4930_vm4, %v14190_v44  ;;  %v8239_v55 = vrot.slane %v8231_v13, %v11706_v29  ;;  %v8246_v59 = vrot.slane %v8232_v23, %v11706_v29  ;;  %v8290_v15 = vrot.slane %v8282_v26, %v11706_v29  ;;  %v8299_v62 = vcombine.low %v7466_v19, %v7324_v12 }
 0x440   :  { %v14436_v49 = vcombine.low %v8222_v14, %v8229_v11  ;;  %v8297_v41 = vrot.slane %v8283_v21, %v11706_v29  ;;  %v8300_v42 = vcombine.low %v7468_v31, %v15386_v40  ;;  %v8351_v3 = vcombine.low %v7484_v24, %v14260_v45  ;;  %11186 = vmatprep.subr.mxu0 %v7492_v46 }
 0x441   :  { %11019 = vmatmul.mubr.msk.f32.gmra.mrb[44].mxu1 %vm4930_vm4, %v14192_v39  ;;  %v14443_v16 = vcombine.low %v8239_v55, %v8246_v59  ;;  %v8307_v6 = vrot.slane %v8299_v62, %v11706_v29  ;;  %v8358_v25 = vrot.slane %v14351_v50, %v11706_v29  ;;  %v8367_v12 = vcombine.low %v14337_v53, %v7341_v30 }
 0x442   :  { %11146 = vmatmul.mubr.msk.f32.gmra.mrb[22].mxu0 %vm4930_vm4, %v14192_v39  ;;  %11021 = vmatprep.mubr.msk.f32.mxu1 %vm4930_vm4, %v14393_v0  ;;  %v14456_v24 = vcombine.low %v8290_v15, %v8297_v41  ;;  %v8314_v19 = vrot.slane %v8300_v42, %v11706_v29  ;;  %v8365_v31 = vrot.slane %v8351_v3, %v11706_v29 }
 0x443   :  { %11148 = vmatprep.mubr.msk.f32.mxu0 %vm4930_vm4, %v14393_v0  ;;  %v8368_v50 = vcombine.low %v7485_v5, %v15386_v40  ;;  %v8375_v53 = vrot.slane %v8367_v12, %v11706_v29  ;;  %v7494_v5 = vld [vmem:[%s15060_s7 + $0x40] sm:$0xff] }
 0x444   :  { %v14463_v45 = vcombine.low %v8307_v6, %v8314_v19  ;;  %v14465_v30 = vcombine.low %v8358_v25, %v8365_v31 }
 0x445   :  { %11022 = vmatmul.mubr.msk.f32.gmra.mrb[46].mxu1 %vm4930_vm4, %v14403_v57  ;;  %v8382_v47 = vrot.slane %v8368_v50, %v11706_v29  ;;  %v7493_v29 = vld [vmem:[%s15060_s7 + $0x38] sm:$0xff] }
 0x446   :  { %11149 = vmatmul.mubr.msk.f32.gmra.mrb[24].mxu0 %vm4930_vm4, %v14403_v57  ;;  %11024 = vmatprep.mubr.msk.f32.mxu1 %vm4930_vm4, %v14180_v8 }
 0x447   :  { %11151 = vmatprep.mubr.msk.f32.mxu0 %vm4930_vm4, %v14180_v8  ;;  %v14477_v40 = vcombine.low %v8375_v53, %v8382_v47 }
 0x449   :  { %11025 = vmatmul.mubr.msk.f32.gmra.mrb[48].mxu1 %vm4930_vm4, %v14188_v54 }
 0x44a   :  { %11152 = vmatmul.mubr.msk.f32.gmra.mrb[26].mxu0 %vm4930_vm4, %v14188_v54  ;;  %11027 = vmatprep.mubr.msk.f32.mxu1 %vm4930_vm4, %v14376_v61 }
 0x44b   :  { %11154 = vmatprep.mubr.msk.f32.mxu0 %vm4930_vm4, %v14376_v61 }
 0x44d   :  { %11028 = vmatmul.mubr.msk.f32.gmra.mrb[50].mxu1 %vm4930_vm4, %v14385_v10 }
 0x44e   :  { %11155 = vmatmul.mubr.msk.f32.gmra.mrb[28].mxu0 %vm4930_vm4, %v14385_v10  ;;  %11032 = vmatprep.mubr.msk.f32.mxu1 %vm4930_vm4, %v14145_v32 }
 0x44f   :  { %11157 = vmatprep.mubr.msk.f32.mxu0 %vm4930_vm4, %v15476_v18 }
 0x451   :  { %11033 = vmatmul.mubr.msk.f32.vlgmr.msra.gmra.mrb[52].mxu1 %vm4930_vm4, %v14137_v51 }
 0x452   :  { %11057 = vmatpush3.msra.mxu1 %v14166_v20  ;;  %11158 = vmatmul.mubr.msk.f32.gmra.mrb[30].mxu0 %vm4930_vm4, %v15476_v18  ;;  %v7487_v20 = vld [vmem:[%s15060_s7 + $0x8] sm:$0xff] }
 0x453   :  { %11035 = vmatprep.mubr.msk.f32.mxu1 %vm4930_vm4, %v14319_v35  ;;  %11162 = vmatprep.mubr.msk.f32.mxu0 %vm4930_vm4, %v14424_v37 }
 0x454   :  { %11082 = vmatprep.subr.mxu1 %v7493_v29 }
 0x455   :  { %11036 = vmatmul.mubr.msk.f32.gmra.mrb[54].mxu1 %vm4930_vm4, %v14322_v17 }
 0x456   :  { %11163 = vmatmul.mubr.msk.f32.vlgmr.msra.gmra.mrb[16].mxu0 %vm4930_vm4, %v14334_v22  ;;  %11038 = vmatprep.mubr.msk.f32.mxu1 %vm4930_vm4, %v14120_v63 }
 0x457   :  { %11165 = vmatprep.mubr.msk.f32.mxu0 %vm4930_vm4, %v14205_v9  ;;  %11187 = vmatpush3.msra.mxu0 %v7492_v46 }
 0x458   :  { %11212 = vmatprep.subr.mxu0 %v7494_v5 }
 0x459   :  { %11039 = vmatmul.mubr.msk.f32.gmra.mrb[56].mxu1 %vm4930_vm4, %v14132_v1 }
 0x45a   :  { %11166 = vmatmul.mubr.msk.f32.gmra.mrb[18].mxu0 %vm4930_vm4, %v14222_v2  ;;  %11041 = vmatprep.mubr.msk.f32.mxu1 %vm4930_vm4, %v14305_v7 }
 0x45b   :  { %11168 = vmatprep.mubr.msk.f32.mxu0 %vm4930_vm4, %v14436_v49 }
 0x45d   :  { %11042 = vmatmul.mubr.msk.f32.gmra.mrb[58].mxu1 %vm4930_vm4, %v14317_v60 }
 0x45e   :  { %11169 = vmatmul.mubr.msk.f32.gmra.mrb[20].mxu0 %vm4930_vm4, %v14443_v16  ;;  %11044 = vmatprep.mubr.msk.f32.mxu1 %vm4930_vm4, %v14190_v44 }
 0x45f   :  { %11171 = vmatprep.mubr.msk.f32.mxu0 %vm4930_vm4, %v14229_v28 }
 0x461   :  { %11045 = vmatmul.mubr.msk.f32.gmra.mrb[60].mxu1 %vm4930_vm4, %v14192_v39 }
 0x462   :  { %11172 = vmatmul.mubr.msk.f32.gmra.mrb[22].mxu0 %vm4930_vm4, %v14232_v38  ;;  %11047 = vmatprep.mubr.msk.f32.mxu1 %vm4930_vm4, %v14393_v0 }
 0x463   :  { %11174 = vmatprep.mubr.msk.f32.mxu0 %vm4930_vm4, %v14456_v24 }
 0x465   :  { %11048 = vmatmul.mubr.msk.f32.gmra.mrb[62].mxu1 %vm4930_vm4, %v14403_v57 }
 0x466   :  { %11175 = vmatmul.mubr.msk.f32.gmra.mrb[24].mxu0 %vm4930_vm4, %v14463_v45  ;;  %11050 = vmatprep.mubr.msk.f32.mxu1 %vm4930_vm4, %v14180_v8 }
 0x467   :  { %11177 = vmatprep.mubr.msk.f32.mxu0 %vm4930_vm4, %v14234_v33 }
 0x469   :  { %11051 = vmatmul.mubr.msk.f32.gmra.mrb[64].mxu1 %vm4930_vm4, %v14188_v54 }
 0x46a   :  { %11178 = vmatmul.mubr.msk.f32.gmra.mrb[26].mxu0 %vm4930_vm4, %v14241_v34  ;;  %11053 = vmatprep.mubr.msk.f32.mxu1 %vm4930_vm4, %v14376_v61 }
 0x46b   :  { %11180 = vmatprep.mubr.msk.f32.mxu0 %vm4930_vm4, %v14465_v30 }
 0x46d   :  { %11054 = vmatmul.mubr.msk.f32.gmra.mrb[66].mxu1 %vm4930_vm4, %v14385_v10 }
 0x46e   :  { %11181 = vmatmul.mubr.msk.f32.gmra.mrb[28].mxu0 %vm4930_vm4, %v14477_v40  ;;  %11058 = vmatprep.mubr.msk.f32.mxu1 %vm4930_vm4, %v14243_v56 }
 0x46f   :  { %11183 = vmatprep.mubr.msk.f32.mxu0 %vm4930_vm4, %v15476_v18 }
 0x471   :  { %11059 = vmatmul.mubr.msk.f32.vlgmr.msra.gmra.mrb[52].mxu1 %vm4930_vm4, %v14142_v36 }
 0x472   :  { %11083 = vmatpush3.msra.mxu1 %v7493_v29  ;;  %11184 = vmatmul.mubr.msk.f32.gmra.mrb[30].mxu0 %vm4930_vm4, %v15476_v18 }
 0x473   :  { %11061 = vmatprep.mubr.msk.f32.mxu1 %vm4930_vm4, %v14424_v37  ;;  %11188 = vmatprep.mubr.msk.f32.mxu0 %vm4930_vm4, %v14243_v56 }
 0x474   :  { %11108 = vmatprep.subr.mxu1 %v7487_v20 }
 0x475   :  { %11062 = vmatmul.mubr.msk.f32.gmra.mrb[54].mxu1 %vm4930_vm4, %v14334_v22 }
 0x476   :  { %11189 = vmatmul.mubr.msk.f32.vlgmr.msra.gmra.mrb[16].mxu0 %vm4930_vm4, %v14142_v36  ;;  %11064 = vmatprep.mubr.msk.f32.mxu1 %vm4930_vm4, %v14205_v9 }
 0x477   :  { %11191 = vmatprep.mubr.msk.f32.mxu0 %vm4930_vm4, %v14424_v37  ;;  %11213 = vmatpush3.msra.mxu0 %v7494_v5 }
 0x479   :  { %11065 = vmatmul.mubr.msk.f32.gmra.mrb[56].mxu1 %vm4930_vm4, %v14222_v2 }
 0x47a   :  { %11192 = vmatmul.mubr.msk.f32.gmra.mrb[18].mxu0 %vm4930_vm4, %v14334_v22  ;;  %11067 = vmatprep.mubr.msk.f32.mxu1 %vm4930_vm4, %v14436_v49 }
 0x47b   :  { %11194 = vmatprep.mubr.msk.f32.mxu0 %vm4930_vm4, %v14205_v9 }
 0x47d   :  { %11068 = vmatmul.mubr.msk.f32.gmra.mrb[58].mxu1 %vm4930_vm4, %v14443_v16 }
 0x47e   :  { %11195 = vmatmul.mubr.msk.f32.gmra.mrb[20].mxu0 %vm4930_vm4, %v14222_v2  ;;  %11070 = vmatprep.mubr.msk.f32.mxu1 %vm4930_vm4, %v14229_v28 }
 0x47f   :  { %11197 = vmatprep.mubr.msk.f32.mxu0 %vm4930_vm4, %v14436_v49 }
 0x481   :  { %11071 = vmatmul.mubr.msk.f32.gmra.mrb[60].mxu1 %vm4930_vm4, %v14232_v38 }
 0x482   :  { %11198 = vmatmul.mubr.msk.f32.gmra.mrb[22].mxu0 %vm4930_vm4, %v14443_v16  ;;  %11073 = vmatprep.mubr.msk.f32.mxu1 %vm4930_vm4, %v14456_v24 }
 0x483   :  { %11200 = vmatprep.mubr.msk.f32.mxu0 %vm4930_vm4, %v14229_v28 }
 0x485   :  { %11074 = vmatmul.mubr.msk.f32.gmra.mrb[62].mxu1 %vm4930_vm4, %v14463_v45 }
 0x486   :  { %11201 = vmatmul.mubr.msk.f32.gmra.mrb[24].mxu0 %vm4930_vm4, %v14232_v38  ;;  %11076 = vmatprep.mubr.msk.f32.mxu1 %vm4930_vm4, %v14234_v33 }
 0x487   :  { %11203 = vmatprep.mubr.msk.f32.mxu0 %vm4930_vm4, %v14456_v24 }
 0x489   :  { %11077 = vmatmul.mubr.msk.f32.gmra.mrb[64].mxu1 %vm4930_vm4, %v14241_v34 }
 0x48a   :  { %11204 = vmatmul.mubr.msk.f32.gmra.mrb[26].mxu0 %vm4930_vm4, %v14463_v45  ;;  %11079 = vmatprep.mubr.msk.f32.mxu1 %vm4930_vm4, %v14465_v30 }
 0x48b   :  { %11206 = vmatprep.mubr.msk.f32.mxu0 %vm4930_vm4, %v14234_v33 }
 0x48d   :  { %11080 = vmatmul.mubr.msk.f32.gmra.mrb[66].mxu1 %vm4930_vm4, %v14477_v40 }
 0x48e   :  { %11207 = vmatmul.mubr.msk.f32.gmra.mrb[28].mxu0 %vm4930_vm4, %v14241_v34  ;;  %11084 = vmatprep.mubr.msk.f32.mxu1 %vm4930_vm4, %v14145_v32 }
 0x48f   :  { %11209 = vmatprep.mubr.msk.f32.mxu0 %vm4930_vm4, %v14465_v30 }
 0x491   :  { %11085 = vmatmul.mubr.msk.f32.vlgmr.msra.gmra.mrb[68].mxu1 %vm4930_vm4, %v14137_v51 }
 0x492   :  { %11109 = vmatpush3.msra.mxu1 %v7487_v20  ;;  %11210 = vmatmul.mubr.msk.f32.gmra.mrb[30].mxu0 %vm4930_vm4, %v14477_v40 }
 0x493   :  { %11087 = vmatprep.mubr.msk.f32.mxu1 %vm4930_vm4, %v14319_v35  ;;  %11214 = vmatprep.mubr.msk.f32.mxu0 %vm4930_vm4, %v14145_v32 }
 0x495   :  { %11088 = vmatmul.mubr.msk.f32.gmra.mrb[70].mxu1 %vm4930_vm4, %v14322_v17 }
 0x496   :  { %11215 = vmatmul.mubr.msk.f32.vlgmr.msra.gmra.mrb[16].mxu0 %vm4930_vm4, %v14137_v51  ;;  %11090 = vmatprep.mubr.msk.f32.mxu1 %vm4930_vm4, %v14120_v63 }
 0x497   :  { %11217 = vmatprep.mubr.msk.f32.mxu0 %vm4930_vm4, %v14319_v35 }
 0x499   :  { %11091 = vmatmul.mubr.msk.f32.gmra.mrb[72].mxu1 %vm4930_vm4, %v14132_v1 }
 0x49a   :  { %11218 = vmatmul.mubr.msk.f32.gmra.mrb[18].mxu0 %vm4930_vm4, %v14322_v17  ;;  %11093 = vmatprep.mubr.msk.f32.mxu1 %vm4930_vm4, %v14305_v7 }
 0x49b   :  { %11220 = vmatprep.mubr.msk.f32.mxu0 %vm4930_vm4, %v14120_v63 }
 0x49d   :  { %11094 = vmatmul.mubr.msk.f32.gmra.mrb[74].mxu1 %vm4930_vm4, %v14317_v60 }
 0x49e   :  { %11221 = vmatmul.mubr.msk.f32.gmra.mrb[20].mxu0 %vm4930_vm4, %v14132_v1  ;;  %11096 = vmatprep.mubr.msk.f32.mxu1 %vm4930_vm4, %v14190_v44 }
 0x49f   :  { %11223 = vmatprep.mubr.msk.f32.mxu0 %vm4930_vm4, %v14305_v7 }
 0x4a1   :  { %11097 = vmatmul.mubr.msk.f32.gmra.mrb[76].mxu1 %vm4930_vm4, %v14192_v39 }
 0x4a2   :  { %11224 = vmatmul.mubr.msk.f32.gmra.mrb[22].mxu0 %vm4930_vm4, %v14317_v60  ;;  %11099 = vmatprep.mubr.msk.f32.mxu1 %vm4930_vm4, %v14393_v0 }
 0x4a3   :  { %11226 = vmatprep.mubr.msk.f32.mxu0 %vm4930_vm4, %v14190_v44 }
 0x4a5   :  { %11100 = vmatmul.mubr.msk.f32.gmra.mrb[78].mxu1 %vm4930_vm4, %v14403_v57 }
 0x4a6   :  { %11227 = vmatmul.mubr.msk.f32.gmra.mrb[24].mxu0 %vm4930_vm4, %v14192_v39  ;;  %11102 = vmatprep.mubr.msk.f32.mxu1 %vm4930_vm4, %v14180_v8 }
 0x4a7   :  { %11229 = vmatprep.mubr.msk.f32.mxu0 %vm4930_vm4, %v14393_v0 }
 0x4a9   :  { %11103 = vmatmul.mubr.msk.f32.gmra.mrb[80].mxu1 %vm4930_vm4, %v14188_v54 }
 0x4aa   :  { %11230 = vmatmul.mubr.msk.f32.gmra.mrb[26].mxu0 %vm4930_vm4, %v14403_v57  ;;  %11105 = vmatprep.mubr.msk.f32.mxu1 %vm4930_vm4, %v14376_v61 }
 0x4ab   :  { %11232 = vmatprep.mubr.msk.f32.mxu0 %vm4930_vm4, %v14180_v8 }
 0x4ad   :  { %11106 = vmatmul.mubr.msk.f32.gmra.mrb[82].mxu1 %vm4930_vm4, %v14385_v10 }
 0x4ae   :  { %11233 = vmatmul.mubr.msk.f32.gmra.mrb[28].mxu0 %vm4930_vm4, %v14188_v54  ;;  %11110 = vmatprep.mubr.msk.f32.mxu1 %vm4930_vm4, %v14319_v35 }
 0x4af   :  { %11235 = vmatprep.mubr.msk.f32.mxu0 %vm4930_vm4, %v14376_v61 }
 0x4b1   :  { %11111 = vmatmul.mubr.msk.f32.vlgmr.msra.gmra.mrb[68].mxu1 %vm4930_vm4, %v14322_v17 }
 0x4b2   :  { %11236 = vmatmul.mubr.msk.f32.gmra.mrb[30].mxu0 %vm4930_vm4, %v14385_v10  ;;  %11113 = vmatprep.mubr.msk.f32.mxu1 %vm4930_vm4, %v14120_v63  ;;  %v14732_v63 = vld [vmem:[%s15062_s8] ss:$0 sm:$0xff] }
 0x4b5   :  { %11114 = vmatmul.mubr.msk.f32.gmra.mrb[70].mxu1 %vm4930_vm4, %v14132_v1 }
 0x4b6   :  { %11116 = vmatprep.mubr.msk.f32.mxu1 %vm4930_vm4, %v14305_v7 }
 0x4b9   :  { %11117 = vmatmul.mubr.msk.f32.gmra.mrb[72].mxu1 %vm4930_vm4, %v14317_v60 }
 0x4ba   :  { %11119 = vmatprep.mubr.msk.f32.mxu1 %vm4930_vm4, %v14190_v44 }
 0x4bd   :  { %11120 = vmatmul.mubr.msk.f32.gmra.mrb[74].mxu1 %vm4930_vm4, %v14192_v39 }
 0x4be   :  { %11122 = vmatprep.mubr.msk.f32.mxu1 %vm4930_vm4, %v14393_v0 }
 0x4c1   :  { %11123 = vmatmul.mubr.msk.f32.gmra.mrb[76].mxu1 %vm4930_vm4, %v14403_v57 }
 0x4c2   :  { %11125 = vmatprep.mubr.msk.f32.mxu1 %vm4930_vm4, %v14180_v8 }
 0x4c5   :  { %11126 = vmatmul.mubr.msk.f32.gmra.mrb[78].mxu1 %vm4930_vm4, %v14188_v54 }
 0x4c6   :  { %11128 = vmatprep.mubr.msk.f32.mxu1 %vm4930_vm4, %v14376_v61 }
 0x4c9   :  { %11129 = vmatmul.mubr.msk.f32.gmra.mrb[80].mxu1 %vm4930_vm4, %v14385_v10 }
 0x4ca   :  { %11131 = vmatprep.mubr.msk.f32.mxu1 %vm4930_vm4, %v15476_v18 }
 0x4cd   :  { %11132 = vmatmul.mubr.msk.f32.gmra.mrb[82].mxu1 %vm4930_vm4, %v15476_v18 }
 0x4da   :  { %v11008_v1 = vpop.f32.mrb[36].mxu1 }
 0x4db   :  { %v7878_v51 = vadd.f32 %v11008_v1, %v14732_v63  ;;  %v7872_v36 = vpop.f32.mrb[37].mxu1 }
 0x4dc   :  { %v7873_v32 = vadd.f32 %v14732_v63, %v7872_v36 }
 0x4dd   :  { %v7952_v8 = vmax.f32 %v7878_v51, 0.0 }
 0x4de   :  { %v7951_v54 = vmax.f32 %v7873_v32, 0.0 }
 0x4df   :  { %9560 = vst.msk [vmem:[%s15063_s9 + $0x8] sm:$0xff] %vm1503_vm1, %v7952_v8 }
 0x4e0   :  { %9559 = vst.msk [vmem:[%s15063_s9] sm:$0xff] %vm1503_vm1, %v7951_v54 }
 0x508   :  { %v11011_v18 = vpop.f32.mrb[38].mxu1 }
 0x509   :  { %v7888_v44 = vadd.f32 %v11011_v18, %v14732_v63  ;;  %v7882_v39 = vpop.f32.mrb[39].mxu1 }
 0x50a   :  { %v7883_v9 = vadd.f32 %v14732_v63, %v7882_v39 }
 0x50b   :  { %v7954_v2 = vmax.f32 %v7888_v44, 0.0 }
 0x50c   :  { %v7953_v28 = vmax.f32 %v7883_v9, 0.0  ;;  %v11014_v38 = vpop.f32.mrb[40].mxu1 }
 0x50d   :  { %9562 = vst.msk [vmem:[%s15063_s9 + $0x18] sm:$0xff] %vm1503_vm1, %v7954_v2  ;;  %v7898_v33 = vadd.f32 %v11014_v38, %v14732_v63  ;;  %v7892_v34 = vpop.f32.mrb[41].mxu1 }
 0x50e   :  { %9561 = vst.msk [vmem:[%s15063_s9 + $0x10] sm:$0xff] %vm1503_vm1, %v7953_v28  ;;  %v7893_v56 = vadd.f32 %v14732_v63, %v7892_v34 }
 0x50f   :  { %v7956_v7 = vmax.f32 %v7898_v33, 0.0 }
 0x510   :  { %v7955_v60 = vmax.f32 %v7893_v56, 0.0  ;;  %v11017_v35 = vpop.f32.mrb[42].mxu1 }
 0x511   :  { %9564 = vst.msk [vmem:[%s15063_s9 + $0x28] sm:$0xff] %vm1503_vm1, %v7956_v7  ;;  %v7908_v17 = vadd.f32 %v11017_v35, %v14732_v63  ;;  %v7902_v22 = vpop.f32.mrb[43].mxu1 }
 0x512   :  { %9563 = vst.msk [vmem:[%s15063_s9 + $0x20] sm:$0xff] %vm1503_vm1, %v7955_v60  ;;  %v7903_v61 = vadd.f32 %v14732_v63, %v7902_v22 }
 0x513   :  { %v7958_v27 = vmax.f32 %v7908_v17, 0.0 }
 0x514   :  { %v7957_v26 = vmax.f32 %v7903_v61, 0.0  ;;  %v11020_v10 = vpop.f32.mrb[44].mxu1 }
 0x515   :  { %9566 = vst.msk [vmem:[%s15063_s9 + $0x38] sm:$0xff] %vm1503_vm1, %v7958_v27  ;;  %v7918_v58 = vadd.f32 %v11020_v10, %v14732_v63  ;;  %v7912_v52 = vpop.f32.mrb[45].mxu1 }
 0x516   :  { %9565 = vst.msk [vmem:[%s15063_s9 + $0x30] sm:$0xff] %vm1503_vm1, %v7957_v26  ;;  %v7913_v0 = vadd.f32 %v14732_v63, %v7912_v52 }
 0x517   :  { %v7960_v43 = vmax.f32 %v7918_v58, 0.0 }
 0x518   :  { %v7959_v4 = vmax.f32 %v7913_v0, 0.0  ;;  %v11023_v48 = vpop.f32.mrb[46].mxu1 }
 0x519   :  { %9568 = vst.msk [vmem:[%s15063_s9 + $0x48] sm:$0xff] %vm1503_vm1, %v7960_v43  ;;  %v7928_v57 = vadd.f32 %v11023_v48, %v14732_v63  ;;  %v7922_v14 = vpop.f32.mrb[47].mxu1 }
 0x51a   :  { %9567 = vst.msk [vmem:[%s15063_s9 + $0x40] sm:$0xff] %vm1503_vm1, %v7959_v4  ;;  %v7923_v13 = vadd.f32 %v14732_v63, %v7922_v14 }
 0x51b   :  { %v7962_v23 = vmax.f32 %v7928_v57, 0.0 }
 0x51c   :  { %v7961_v46 = vmax.f32 %v7923_v13, 0.0  ;;  %v11026_v37 = vpop.f32.mrb[48].mxu1 }
 0x51d   :  { %9570 = vst.msk [vmem:[%s15063_s9 + $0x58] sm:$0xff] %vm1503_vm1, %v7962_v23  ;;  %v7938_v11 = vadd.f32 %v11026_v37, %v14732_v63  ;;  %v7932_v21 = vpop.f32.mrb[49].mxu1 }
 0x51e   :  { %9569 = vst.msk [vmem:[%s15063_s9 + $0x50] sm:$0xff] %vm1503_vm1, %v7961_v46  ;;  %v7933_v55 = vadd.f32 %v14732_v63, %v7932_v21 }
 0x51f   :  { %v7964_v59 = vmax.f32 %v7938_v11, 0.0 }
 0x520   :  { %v7963_v15 = vmax.f32 %v7933_v55, 0.0  ;;  %v11029_v62 = vpop.f32.mrb[50].mxu1 }
 0x521   :  { %9572 = vst.msk [vmem:[%s15063_s9 + $0x68] sm:$0xff] %vm1503_vm1, %v7964_v59  ;;  %v7948_v49 = vadd.f32 %v11029_v62, %v14732_v63  ;;  %v7942_v41 = vpop.f32.mrb[51].mxu1 }
 0x522   :  { %9571 = vst.msk [vmem:[%s15063_s9 + $0x60] sm:$0xff] %vm1503_vm1, %v7963_v15  ;;  %v7943_v42 = vadd.f32 %v14732_v63, %v7942_v41 }
 0x523   :  { %v7966_v3 = vmax.f32 %v7948_v49, 0.0 }
 0x524   :  { %v7965_v16 = vmax.f32 %v7943_v42, 0.0 }
 0x525   :  { %9574 = vst.msk [vmem:[%s15063_s9 + $0x78] sm:$0xff] %vm1503_vm1, %v7966_v3 }
 0x526   :  { %9573 = vst.msk [vmem:[%s15063_s9 + $0x70] sm:$0xff] %vm1503_vm1, %v7965_v16 }
 0x544   :  { %v11060_v6 = vpop.f32.mrb[52].mxu1 }
 0x545   :  { %v8562_v25 = vadd.f32 %v11060_v6, %v14732_v63  ;;  %v8482_v12 = vpop.f32.mrb[53].mxu1 }
 0x546   :  { %v8561_v24 = vadd.f32 %v14732_v63, %v8482_v12 }
 0x547   :  { %v8578_v19 = vmax.f32 %v8562_v25, 0.0 }
 0x548   :  { %v8577_v31 = vmax.f32 %v8561_v24, 0.0  ;;  %v11063_v50 = vpop.f32.mrb[54].mxu1 }
 0x549   :  { %10156 = vst.msk [vmem:[%s15063_s9 + $0x88] sm:$0xff] %vm1503_vm1, %v8578_v19  ;;  %v8564_v45 = vadd.f32 %v11063_v50, %v14732_v63  ;;  %v8492_v30 = vpop.f32.mrb[55].mxu1 }
 0x54a   :  { %10155 = vst.msk [vmem:[%s15063_s9 + $0x80] sm:$0xff] %vm1503_vm1, %v8577_v31  ;;  %v8563_v53 = vadd.f32 %v14732_v63, %v8492_v30 }
 0x54b   :  { %v8580_v47 = vmax.f32 %v8564_v45, 0.0 }
 0x54c   :  { %v8579_v40 = vmax.f32 %v8563_v53, 0.0  ;;  %v11066_v29 = vpop.f32.mrb[56].mxu1 }
 0x54d   :  { %10158 = vst.msk [vmem:[%s15063_s9 + $0x98] sm:$0xff] %vm1503_vm1, %v8580_v47  ;;  %v8566_v5 = vadd.f32 %v11066_v29, %v14732_v63  ;;  %v8502_v20 = vpop.f32.mrb[57].mxu1 }
 0x54e   :  { %10157 = vst.msk [vmem:[%s15063_s9 + $0x90] sm:$0xff] %vm1503_vm1, %v8579_v40  ;;  %v8565_v1 = vadd.f32 %v14732_v63, %v8502_v20 }
 0x54f   :  { %v8582_v51 = vmax.f32 %v8566_v5, 0.0 }
 0x550   :  { %v8581_v36 = vmax.f32 %v8565_v1, 0.0  ;;  %v11069_v32 = vpop.f32.mrb[58].mxu1 }
 0x551   :  { %10160 = vst.msk [vmem:[%s15063_s9 + $0xa8] sm:$0xff] %vm1503_vm1, %v8582_v51  ;;  %v8568_v8 = vadd.f32 %v11069_v32, %v14732_v63  ;;  %v8512_v54 = vpop.f32.mrb[59].mxu1 }
 0x552   :  { %10159 = vst.msk [vmem:[%s15063_s9 + $0xa0] sm:$0xff] %vm1503_vm1, %v8581_v36  ;;  %v8567_v18 = vadd.f32 %v14732_v63, %v8512_v54 }
 0x553   :  { %v8584_v44 = vmax.f32 %v8568_v8, 0.0 }
 0x554   :  { %v8583_v39 = vmax.f32 %v8567_v18, 0.0  ;;  %v11072_v9 = vpop.f32.mrb[60].mxu1 }
 0x555   :  { %10162 = vst.msk [vmem:[%s15063_s9 + $0xb8] sm:$0xff] %vm1503_vm1, %v8584_v44  ;;  %v8570_v2 = vadd.f32 %v11072_v9, %v14732_v63  ;;  %v8522_v28 = vpop.f32.mrb[61].mxu1 }
 0x556   :  { %10161 = vst.msk [vmem:[%s15063_s9 + $0xb0] sm:$0xff] %vm1503_vm1, %v8583_v39  ;;  %v8569_v38 = vadd.f32 %v14732_v63, %v8522_v28 }
 0x557   :  { %v8586_v33 = vmax.f32 %v8570_v2, 0.0 }
 0x558   :  { %v8585_v34 = vmax.f32 %v8569_v38, 0.0  ;;  %v11075_v56 = vpop.f32.mrb[62].mxu1 }
 0x559   :  { %10164 = vst.msk [vmem:[%s15063_s9 + $0xc8] sm:$0xff] %vm1503_vm1, %v8586_v33  ;;  %v8572_v7 = vadd.f32 %v11075_v56, %v14732_v63  ;;  %v8532_v60 = vpop.f32.mrb[63].mxu1 }
 0x55a   :  { %10163 = vst.msk [vmem:[%s15063_s9 + $0xc0] sm:$0xff] %vm1503_vm1, %v8585_v34  ;;  %v8571_v35 = vadd.f32 %v14732_v63, %v8532_v60 }
 0x55b   :  { %v8588_v17 = vmax.f32 %v8572_v7, 0.0 }
 0x55c   :  { %v8587_v22 = vmax.f32 %v8571_v35, 0.0  ;;  %v11078_v61 = vpop.f32.mrb[64].mxu1 }
 0x55d   :  { %10166 = vst.msk [vmem:[%s15063_s9 + $0xd8] sm:$0xff] %vm1503_vm1, %v8588_v17  ;;  %v8574_v27 = vadd.f32 %v11078_v61, %v14732_v63  ;;  %v8542_v26 = vpop.f32.mrb[65].mxu1 }
 0x55e   :  { %10165 = vst.msk [vmem:[%s15063_s9 + $0xd0] sm:$0xff] %vm1503_vm1, %v8587_v22  ;;  %v8573_v10 = vadd.f32 %v14732_v63, %v8542_v26 }
 0x55f   :  { %v8590_v58 = vmax.f32 %v8574_v27, 0.0 }
 0x560   :  { %v8589_v52 = vmax.f32 %v8573_v10, 0.0  ;;  %v11081_v0 = vpop.f32.mrb[66].mxu1 }
 0x561   :  { %10168 = vst.msk [vmem:[%s15063_s9 + $0xe8] sm:$0xff] %vm1503_vm1, %v8590_v58  ;;  %v8576_v43 = vadd.f32 %v11081_v0, %v14732_v63  ;;  %v8552_v4 = vpop.f32.mrb[67].mxu1 }
 0x562   :  { %10167 = vst.msk [vmem:[%s15063_s9 + $0xe0] sm:$0xff] %vm1503_vm1, %v8589_v52  ;;  %v8575_v48 = vadd.f32 %v14732_v63, %v8552_v4 }
 0x563   :  { %v8592_v57 = vmax.f32 %v8576_v43, 0.0 }
 0x564   :  { %v8591_v14 = vmax.f32 %v8575_v48, 0.0 }
 0x565   :  { %10170 = vst.msk [vmem:[%s15063_s9 + $0xf8] sm:$0xff] %vm1503_vm1, %v8592_v57 }
 0x566   :  { %10169 = vst.msk [vmem:[%s15063_s9 + $0xf0] sm:$0xff] %vm1503_vm1, %v8591_v14 }
 0x569   :  { %v11216_v13 = vpop.f32.mrb[16].mxu0 }
 0x56a   :  { %v9528_v23 = vadd.f32 %v11216_v13, %v14732_v63  ;;  %v9432_v46 = vpop.f32.mrb[17].mxu0 }
 0x56b   :  { %v9527_v37 = vadd.f32 %v14732_v63, %v9432_v46 }
 0x56c   :  { %v9544_v11 = vmax.f32 %v9528_v23, 0.0 }
 0x56d   :  { %v9543_v21 = vmax.f32 %v9527_v37, 0.0  ;;  %v11219_v55 = vpop.f32.mrb[18].mxu0 }
 0x56e   :  { %10188 = vst.msk [vmem:[%s15063_s9 + $0x188] sm:$0xff] %vm1503_vm1, %v9544_v11  ;;  %v9530_v59 = vadd.f32 %v11219_v55, %v14732_v63  ;;  %v9442_v15 = vpop.f32.mrb[19].mxu0 }
 0x56f   :  { %10187 = vst.msk [vmem:[%s15063_s9 + $0x180] sm:$0xff] %vm1503_vm1, %v9543_v21  ;;  %v9529_v62 = vadd.f32 %v14732_v63, %v9442_v15 }
 0x570   :  { %v9546_v49 = vmax.f32 %v9530_v59, 0.0 }
 0x571   :  { %v9545_v41 = vmax.f32 %v9529_v62, 0.0  ;;  %v11222_v42 = vpop.f32.mrb[20].mxu0 }
 0x572   :  { %10190 = vst.msk [vmem:[%s15063_s9 + $0x198] sm:$0xff] %vm1503_vm1, %v9546_v49  ;;  %v9532_v3 = vadd.f32 %v11222_v42, %v14732_v63  ;;  %v9452_v16 = vpop.f32.mrb[21].mxu0 }
 0x573   :  { %10189 = vst.msk [vmem:[%s15063_s9 + $0x190] sm:$0xff] %vm1503_vm1, %v9545_v41  ;;  %v9531_v6 = vadd.f32 %v14732_v63, %v9452_v16 }
 0x574   :  { %v9548_v25 = vmax.f32 %v9532_v3, 0.0 }
 0x575   :  { %v9547_v12 = vmax.f32 %v9531_v6, 0.0  ;;  %v11225_v24 = vpop.f32.mrb[22].mxu0 }
 0x576   :  { %10192 = vst.msk [vmem:[%s15063_s9 + $0x1a8] sm:$0xff] %vm1503_vm1, %v9548_v25  ;;  %v9534_v19 = vadd.f32 %v11225_v24, %v14732_v63  ;;  %v9462_v31 = vpop.f32.mrb[23].mxu0 }
 0x577   :  { %10191 = vst.msk [vmem:[%s15063_s9 + $0x1a0] sm:$0xff] %vm1503_vm1, %v9547_v12  ;;  %v9533_v50 = vadd.f32 %v14732_v63, %v9462_v31 }
 0x578   :  { %v9550_v45 = vmax.f32 %v9534_v19, 0.0 }
 0x579   :  { %v9549_v30 = vmax.f32 %v9533_v50, 0.0  ;;  %v11228_v53 = vpop.f32.mrb[24].mxu0 }
 0x57a   :  { %10194 = vst.msk [vmem:[%s15063_s9 + $0x1b8] sm:$0xff] %vm1503_vm1, %v9550_v45  ;;  %v9536_v47 = vadd.f32 %v11228_v53, %v14732_v63  ;;  %v9472_v40 = vpop.f32.mrb[25].mxu0 }
 0x57b   :  { %10193 = vst.msk [vmem:[%s15063_s9 + $0x1b0] sm:$0xff] %vm1503_vm1, %v9549_v30  ;;  %v9535_v29 = vadd.f32 %v14732_v63, %v9472_v40 }
 0x57c   :  { %v9552_v5 = vmax.f32 %v9536_v47, 0.0 }
 0x57d   :  { %v9551_v20 = vmax.f32 %v9535_v29, 0.0  ;;  %v11231_v1 = vpop.f32.mrb[26].mxu0 }
 0x57e   :  { %10196 = vst.msk [vmem:[%s15063_s9 + $0x1c8] sm:$0xff] %vm1503_vm1, %v9552_v5  ;;  %v9538_v51 = vadd.f32 %v11231_v1, %v14732_v63  ;;  %v9482_v36 = vpop.f32.mrb[27].mxu0 }
 0x57f   :  { %10195 = vst.msk [vmem:[%s15063_s9 + $0x1c0] sm:$0xff] %vm1503_vm1, %v9551_v20  ;;  %v9537_v32 = vadd.f32 %v14732_v63, %v9482_v36 }
 0x580   :  { %v9554_v8 = vmax.f32 %v9538_v51, 0.0 }
 0x581   :  { %v9553_v54 = vmax.f32 %v9537_v32, 0.0  ;;  %v11234_v18 = vpop.f32.mrb[28].mxu0 }
 0x582   :  { %10198 = vst.msk [vmem:[%s15063_s9 + $0x1d8] sm:$0xff] %vm1503_vm1, %v9554_v8  ;;  %v9540_v44 = vadd.f32 %v11234_v18, %v14732_v63  ;;  %v9492_v39 = vpop.f32.mrb[29].mxu0 }
 0x583   :  { %10197 = vst.msk [vmem:[%s15063_s9 + $0x1d0] sm:$0xff] %vm1503_vm1, %v9553_v54  ;;  %v9539_v9 = vadd.f32 %v14732_v63, %v9492_v39 }
 0x584   :  { %v9556_v2 = vmax.f32 %v9540_v44, 0.0  ;;  %v11112_v28 = vpop.f32.mrb[68].mxu1 }
 0x585   :  { %v9555_v38 = vmax.f32 %v9539_v9, 0.0  ;;  %v8884_v33 = vadd.f32 %v11112_v28, %v14732_v63  ;;  %v11237_v34 = vpop.f32.mrb[30].mxu0  ;;  %v8804_v56 = vpop.f32.mrb[69].mxu1 }
 0x586   :  { %10200 = vst.msk [vmem:[%s15063_s9 + $0x1e8] sm:$0xff] %vm1503_vm1, %v9556_v2  ;;  %v9542_v7 = vadd.f32 %v11237_v34, %v14732_v63  ;;  %v8883_v60 = vadd.f32 %v14732_v63, %v8804_v56  ;;  %v9502_v35 = vpop.f32.mrb[31].mxu0 }
 0x587   :  { %10199 = vst.msk [vmem:[%s15063_s9 + $0x1e0] sm:$0xff] %vm1503_vm1, %v9555_v38  ;;  %v8900_v17 = vmax.f32 %v8884_v33, 0.0  ;;  %v9541_v22 = vadd.f32 %v14732_v63, %v9502_v35 }
 0x588   :  { %v9558_v61 = vmax.f32 %v9542_v7, 0.0  ;;  %v8899_v27 = vmax.f32 %v8883_v60, 0.0  ;;  %v11115_v26 = vpop.f32.mrb[70].mxu1 }
 0x589   :  { %10172 = vst.msk [vmem:[%s15063_s9 + $0x108] sm:$0xff] %vm1503_vm1, %v8900_v17  ;;  %v9557_v10 = vmax.f32 %v9541_v22, 0.0  ;;  %v8886_v58 = vadd.f32 %v11115_v26, %v14732_v63  ;;  %v8814_v52 = vpop.f32.mrb[71].mxu1 }
 0x58a   :  { %10202 = vst.msk [vmem:[%s15063_s9 + $0x1f8] sm:$0xff] %vm1503_vm1, %v9558_v61  ;;  %10171 = vst.msk [vmem:[%s15063_s9 + $0x100] sm:$0xff] %vm1503_vm1, %v8899_v27  ;;  %v8885_v0 = vadd.f32 %v14732_v63, %v8814_v52 }
 0x58b   :  { %10201 = vst.msk [vmem:[%s15063_s9 + $0x1f0] sm:$0xff] %vm1503_vm1, %v9557_v10  ;;  %v8902_v43 = vmax.f32 %v8886_v58, 0.0 }
 0x58c   :  { %v8901_v4 = vmax.f32 %v8885_v0, 0.0  ;;  %v11118_v48 = vpop.f32.mrb[72].mxu1 }
 0x58d   :  { %10174 = vst.msk [vmem:[%s15063_s9 + $0x118] sm:$0xff] %vm1503_vm1, %v8902_v43  ;;  %v8888_v57 = vadd.f32 %v11118_v48, %v14732_v63  ;;  %v8824_v14 = vpop.f32.mrb[73].mxu1 }
 0x58e   :  { %10173 = vst.msk [vmem:[%s15063_s9 + $0x110] sm:$0xff] %vm1503_vm1, %v8901_v4  ;;  %v8887_v13 = vadd.f32 %v14732_v63, %v8824_v14 }
 0x58f   :  { %v8904_v23 = vmax.f32 %v8888_v57, 0.0 }
 0x590   :  { %v8903_v46 = vmax.f32 %v8887_v13, 0.0  ;;  %v11121_v37 = vpop.f32.mrb[74].mxu1 }
 0x591   :  { %10176 = vst.msk [vmem:[%s15063_s9 + $0x128] sm:$0xff] %vm1503_vm1, %v8904_v23  ;;  %v8890_v11 = vadd.f32 %v11121_v37, %v14732_v63  ;;  %v8834_v21 = vpop.f32.mrb[75].mxu1 }
 0x592   :  { %10175 = vst.msk [vmem:[%s15063_s9 + $0x120] sm:$0xff] %vm1503_vm1, %v8903_v46  ;;  %v8889_v55 = vadd.f32 %v14732_v63, %v8834_v21 }
 0x593   :  { %v8906_v59 = vmax.f32 %v8890_v11, 0.0 }
 0x594   :  { %v8905_v15 = vmax.f32 %v8889_v55, 0.0  ;;  %v11124_v62 = vpop.f32.mrb[76].mxu1 }
 0x595   :  { %10178 = vst.msk [vmem:[%s15063_s9 + $0x138] sm:$0xff] %vm1503_vm1, %v8906_v59  ;;  %v8892_v49 = vadd.f32 %v11124_v62, %v14732_v63  ;;  %v8844_v41 = vpop.f32.mrb[77].mxu1 }
 0x596   :  { %10177 = vst.msk [vmem:[%s15063_s9 + $0x130] sm:$0xff] %vm1503_vm1, %v8905_v15  ;;  %v8891_v42 = vadd.f32 %v14732_v63, %v8844_v41 }
 0x597   :  { %v8908_v3 = vmax.f32 %v8892_v49, 0.0 }
 0x598   :  { %v8907_v16 = vmax.f32 %v8891_v42, 0.0  ;;  %v11127_v6 = vpop.f32.mrb[78].mxu1 }
 0x599   :  { %10180 = vst.msk [vmem:[%s15063_s9 + $0x148] sm:$0xff] %vm1503_vm1, %v8908_v3  ;;  %v8894_v25 = vadd.f32 %v11127_v6, %v14732_v63  ;;  %v8854_v12 = vpop.f32.mrb[79].mxu1 }
 0x59a   :  { %10179 = vst.msk [vmem:[%s15063_s9 + $0x140] sm:$0xff] %vm1503_vm1, %v8907_v16  ;;  %v8893_v24 = vadd.f32 %v14732_v63, %v8854_v12 }
 0x59b   :  { %v8910_v19 = vmax.f32 %v8894_v25, 0.0 }
 0x59c   :  { %v8909_v31 = vmax.f32 %v8893_v24, 0.0  ;;  %v11130_v50 = vpop.f32.mrb[80].mxu1 }
 0x59d   :  { %10182 = vst.msk [vmem:[%s15063_s9 + $0x158] sm:$0xff] %vm1503_vm1, %v8910_v19  ;;  %v8896_v45 = vadd.f32 %v11130_v50, %v14732_v63  ;;  %v8864_v30 = vpop.f32.mrb[81].mxu1 }
 0x59e   :  { %10181 = vst.msk [vmem:[%s15063_s9 + $0x150] sm:$0xff] %vm1503_vm1, %v8909_v31  ;;  %v8895_v53 = vadd.f32 %v14732_v63, %v8864_v30 }
 0x59f   :  { %v8912_v47 = vmax.f32 %v8896_v45, 0.0 }
 0x5a0   :  { %v8911_v40 = vmax.f32 %v8895_v53, 0.0  ;;  %v11133_v29 = vpop.f32.mrb[82].mxu1 }
 0x5a1   :  { %10184 = vst.msk [vmem:[%s15063_s9 + $0x168] sm:$0xff] %vm1503_vm1, %v8912_v47  ;;  %v8898_v5 = vadd.f32 %v11133_v29, %v14732_v63  ;;  %v8874_v20 = vpop.f32.mrb[83].mxu1 }
 0x5a2   :  { %10183 = vst.msk [vmem:[%s15063_s9 + $0x160] sm:$0xff] %vm1503_vm1, %v8911_v40  ;;  %v8897_v1 = vadd.f32 %v14732_v63, %v8874_v20 }
 0x5a3   :  { %v8914_v51 = vmax.f32 %v8898_v5, 0.0 }
 0x5a4   :  { %v8913_v36 = vmax.f32 %v8897_v1, 0.0 }
 0x5a5   :  { %10186 = vst.msk [vmem:[%s15063_s9 + $0x178] sm:$0xff] %vm1503_vm1, %v8914_v51 }
 0x5a6   :  { %10185 = vst.msk [vmem:[%s15063_s9 + $0x170] sm:$0xff] %vm1503_vm1, %v8913_v36 }

</bundles_post_ra>
